<compile_context>
chip_gen: v7x
topology: tpu7x:2x2x1
jax: 0.10.0
libtpu: 0.0.40
codegen_flags: <defaults>
</compile_context>

<pallas_src>
import functools

import jax
import jax.numpy as jnp
from jax.experimental import pallas as pl
from jax.experimental.pallas import tpu as pltpu


# ----------------------------------------------------------------------------
# In-kernel helpers
# ----------------------------------------------------------------------------
def _fill_shifted_pads(pad_l, pad_c, pad_r, val_f32, H, W, C):
    """Write rows 1..H of the three dx-shifted, H-padded bf16 buffers.

    pad_c rows 1..H <- val                                   (dx =  0 tap)
    pad_l rows 1..H <- val shifted right one col (col 0  = 0) (dx = -1 tap)
    pad_r rows 1..H <- val shifted left  one col (col W-1= 0) (dx = +1 tap)

    Rolls run on the f32 value (native 32-bit sublane rotate on the XLU) and
    are cast to bf16 on the aligned whole-tile store.  Halo rows 0 and H+1
    are zeroed by the caller and never written here.
    """
    zcol = jnp.zeros((H, 1, C), jnp.bfloat16)

    pad_c[1:H + 1] = val_f32.astype(jnp.bfloat16)

    # out[:, w] = val[:, w-1]  (jnp.roll semantics), wrapped column 0 zeroed.
    pad_l[1:H + 1] = pltpu.roll(val_f32, shift=1, axis=1).astype(jnp.bfloat16)
    pad_l[1:H + 1, 0:1, :] = zcol

    # out[:, w] = val[:, w+1]  (shift = W-1 ≡ -1), wrapped column W-1 zeroed.
    pad_r[1:H + 1] = pltpu.roll(val_f32, shift=W - 1,
                                axis=1).astype(jnp.bfloat16)
    pad_r[1:H + 1, W - 1:W, :] = zcol


def _conv3x3(pads, w_ref, b_ref, H, W, C):
    """3x3 same-conv as 5 MXU matmuls (4 K=2C tap-pairs + 1 K=C tap).

    pads  = (pad_l, pad_c, pad_r): (H+2, W, C) bf16 buffers indexed by dx.
    w_ref = (9*C, C) bf16; rows [t*C:(t+1)*C] hold HWIO w[dy, dx], t = 3*dy+dx.
    b_ref = (1, C) f32 folded-BN bias.
    """
    def patch(t):                      # tap t = 3*dy + dx -> (H*W, C) bf16
        dy, dx = divmod(t, 3)
        # Whole-tile leading-dim slice; reshape is layout-preserving (free).
        return pads[dx][dy:dy + H].reshape(H * W, C)

    # Bias-initialised accumulator (saves one full-tile f32 add).
    acc = jnp.broadcast_to(b_ref[...], (H * W, C))
    for p in range(4):                 # 4 packed pairs: K = 2C
        lhs = jnp.concatenate([patch(2 * p), patch(2 * p + 1)], axis=1)
        acc = acc + jnp.dot(lhs, w_ref[2 * p * C:(2 * p + 2) * C],
                            preferred_element_type=jnp.float32)
    # Last (9th) tap alone: K = C.
    acc = acc + jnp.dot(patch(8), w_ref[8 * C:9 * C],
                        preferred_element_type=jnp.float32)
    return acc                         # (H*W, C) f32


# ----------------------------------------------------------------------------
# Fused residual-block kernel (one batch element per grid step)
# ----------------------------------------------------------------------------
def _resblock_kernel(x_ref, w1_ref, b1_ref, w2_ref, b2_ref, alpha_ref,
                     o_ref, pad_l, pad_c, pad_r, *, H, W, C):
    alpha = alpha_ref[0, 0]            # shared PReLU slope (SMEM scalar)

    # Zero only the two halo rows of each pad buffer (6 single-tile stores).
    zrow = jnp.zeros((1, W, C), jnp.bfloat16)
    for buf in (pad_l, pad_c, pad_r):
        buf[0:1] = zrow
        buf[H + 1:H + 2] = zrow

    pads = (pad_l, pad_c, pad_r)

    # ---- conv1 (+ folded BN1) --------------------------------------------
    _fill_shifted_pads(pad_l, pad_c, pad_r, x_ref[0], H, W, C)
    h = _conv3x3(pads, w1_ref, b1_ref, H, W, C)

    # ---- PReLU (single shared parameter, f32) ----------------------------
    h = jnp.maximum(h, 0.0) + alpha * jnp.minimum(h, 0.0)

    # ---- conv2 (+ folded BN2): reuse the same pad scratch ----------------
    _fill_shifted_pads(pad_l, pad_c, pad_r, h.reshape(H, W, C), H, W, C)
    y = _conv3x3(pads, w2_ref, b2_ref, H, W, C)

    # ---- residual add: re-read x from the VMEM-resident input block ------
    o_ref[0] = (x_ref[0] + y.reshape(H, W, C)).astype(o_ref.dtype)


# ----------------------------------------------------------------------------
# Wrappers
# ----------------------------------------------------------------------------
def residual_block_forward_nhwc(x_nhwc, params):
    """Preferred entry point: NHWC activations, no HBM layout transposes."""
    w1p, b1, w2p, b2, alpha = params
    N, H, W, C = x_nhwc.shape

    kern = functools.partial(_resblock_kernel, H=H, W=W, C=C)
    # NOTE: grid=(N,) + "parallel" lets megacore parts split the batch.  For
    # large images (or v7x where N == num cores gives a single un-pipelined
    # step per core) a spatial row-tile grid axis with an H-halo would be
    # added to restore DMA/compute overlap; unnecessary at these small shapes.
    return pl.pallas_call(
        kern,
        out_shape=jax.ShapeDtypeStruct((N, H, W, C), jnp.float32),
        grid=(N,),
        in_specs=[
            pl.BlockSpec((1, H, W, C), lambda n: (n, 0, 0, 0)),
            pl.BlockSpec((9 * C, C), lambda n: (0, 0)),      # packed conv1 w
            pl.BlockSpec((1, C), lambda n: (0, 0)),           # folded bias1
            pl.BlockSpec((9 * C, C), lambda n: (0, 0)),      # packed conv2 w
            pl.BlockSpec((1, C), lambda n: (0, 0)),           # folded bias2
            pl.BlockSpec((1, 1), lambda n: (0, 0),
                         memory_space=pltpu.MemorySpace.SMEM),  # PReLU alpha
        ],
        out_specs=pl.BlockSpec((1, H, W, C), lambda n: (n, 0, 0, 0)),
        scratch_shapes=[
            pltpu.VMEM((H + 2, W, C), jnp.bfloat16),   # pad_l (dx = -1 tap)
            pltpu.VMEM((H + 2, W, C), jnp.bfloat16),   # pad_c (dx =  0 tap)
            pltpu.VMEM((H + 2, W, C), jnp.bfloat16),   # pad_r (dx = +1 tap)
        ],
        compiler_params=pltpu.CompilerParams(
            dimension_semantics=("parallel",),
            vmem_limit_bytes=32 * 1024 * 1024,
        ),
    )(x_nhwc, w1p, b1, w2p, b2, alpha)


def residual_block_forward(x_nchw, params):
    """PyTorch-layout (NCHW) parity wrapper.

    Prefer residual_block_forward_nhwc in a real pipeline: these transposes
    re-read/write the full activation tensor in HBM and roughly double the
    end-to-end HBM traffic of this otherwise memory-bound fused block.
    """
    x = jnp.transpose(x_nchw.astype(jnp.float32), (0, 2, 3, 1))
    y = residual_block_forward_nhwc(x, params)
    return jnp.transpose(y, (0, 3, 1, 2))


# ----------------------------------------------------------------------------
# Parameters: conv weights (HWIO) with eval-mode BatchNorm folded in
# ----------------------------------------------------------------------------
def _fold_conv_bn(w, b, gamma, beta, mean, var, eps=1e-5):
    s = gamma * jax.lax.rsqrt(var + eps)
    return w * s[None, None, None, :], (b - mean) * s + beta


def pack_params(w1, b1, w2, b2, alpha, C):
    """Kernel layout: weights (9*C, C) bf16 (row block t = 3*dy+dx holds the
    HWIO tap w[dy, dx]); biases (1, C) f32; alpha as a (1, 1) f32 SMEM scalar."""
    return (w1.reshape(9 * C, C).astype(jnp.bfloat16), b1.reshape(1, C),
            w2.reshape(9 * C, C).astype(jnp.bfloat16), b2.reshape(1, C),
            jnp.full((1, 1), alpha, jnp.float32))


def init_params(key, C):
    # TODO(synk): BatchNorm2d training-mode (per-batch) statistics and
    # running-stat updates are not implemented; eval-mode running stats are
    # folded into the conv weights/biases (inference semantics).
    ks = jax.random.split(key, 12)
    std = (2.0 / (9.0 * C)) ** 0.5

    def bn(i):
        gamma = 1.0 + 0.1 * jax.random.normal(ks[i], (C,), jnp.float32)
        beta = 0.1 * jax.random.normal(ks[i + 1], (C,), jnp.float32)
        mean = 0.1 * jax.random.normal(ks[i + 2], (C,), jnp.float32)
        var = jnp.abs(1.0 + 0.1 * jax.random.normal(ks[i + 3], (C,),
                                                    jnp.float32))
        return gamma, beta, mean, var

    w1 = std * jax.random.normal(ks[0], (3, 3, C, C), jnp.float32)
    b1 = 0.01 * jax.random.normal(ks[1], (C,), jnp.float32)
    w2 = std * jax.random.normal(ks[2], (3, 3, C, C), jnp.float32)
    b2 = 0.01 * jax.random.normal(ks[3], (C,), jnp.float32)

    w1f, b1f = _fold_conv_bn(w1, b1, *bn(4))
    w2f, b2f = _fold_conv_bn(w2, b2, *bn(8))

    alpha = 0.25                                # nn.PReLU(1, init=0.25)
    raw = (w1f, b1f, w2f, b2f, alpha)           # HWIO f32, for the reference
    return pack_params(w1f, b1f, w2f, b2f, alpha, C), raw


# ----------------------------------------------------------------------------
# Pure-JAX reference (same bf16-operand / f32-accumulate numerics)
# ----------------------------------------------------------------------------
def _reference(x_nchw, raw_params):
    w1, b1, w2, b2, alpha = raw_params
    x = jnp.transpose(x_nchw.astype(jnp.float32), (0, 2, 3, 1))

    def conv(h, w, b):
        y = jax.lax.conv_general_dilated(
            h.astype(jnp.bfloat16), w.astype(jnp.bfloat16),
            window_strides=(1, 1), padding=((1, 1), (1, 1)),
            dimension_numbers=("NHWC", "HWIO", "NHWC"),
            preferred_element_type=jnp.float32)
        return y + b

    h = conv(x, w1, b1)
    h = jnp.maximum(h, 0.0) + alpha * jnp.minimum(h, 0.0)
    y = conv(h, w2, b2)
    return jnp.transpose(x + y, (0, 3, 1, 2))


if __name__ == "__main__":
    key = jax.random.PRNGKey(0)
    kx, kp = jax.random.split(key)

    # num_features=128 (128-lane aligned), batch=2, 16x16 spatial
    # (W = 16 = one bf16 sublane pack -> free patch reshapes in the kernel).
    N, C, H, W = 2, 128, 16, 16
    x = jax.random.normal(kx, (N, C, H, W), jnp.float32)
    kparams, raw = init_params(kp, C)

    out = jax.block_until_ready(residual_block_forward(x, kparams))
    assert out.shape == (N, C, H, W), out.shape
    assert out.dtype == jnp.float32

    ref = jax.block_until_ready(_reference(x, raw))
    err = float(jnp.max(jnp.abs(out - ref)) / (jnp.max(jnp.abs(ref)) + 1e-6))
    assert err < 2e-2, f"mismatch vs reference: rel-max-err={err}"

    print("KERNEL_OK")
</pallas_src>

<mosaic_0001>
module attributes {stable_mosaic.version = 11 : i64} {
  func.func @_resblock_kernel(%arg0: i32, %arg1: memref<1x16x16x128xf32, #tpu.memory_space<vmem>>, %arg2: memref<1152x128xbf16, #tpu.memory_space<vmem>>, %arg3: memref<1x128xf32, #tpu.memory_space<vmem>>, %arg4: memref<1152x128xbf16, #tpu.memory_space<vmem>>, %arg5: memref<1x128xf32, #tpu.memory_space<vmem>>, %arg6: memref<1x1xf32, #tpu.memory_space<smem>>, %arg7: memref<1x16x16x128xf32, #tpu.memory_space<vmem>>, %arg8: memref<18x16x128xbf16, #tpu.memory_space<vmem>>, %arg9: memref<18x16x128xbf16, #tpu.memory_space<vmem>>, %arg10: memref<18x16x128xbf16, #tpu.memory_space<vmem>>) attributes {dimension_semantics = [#tpu.dimension_semantics<parallel>], iteration_bounds = array<i64: 2>, scalar_prefetch = 0 : i64, scratch_operands = 3 : i64, tpu.core_type = #tpu.core_type<tc>, window_params = [{transform_indices = @transform_0, window_bounds = array<i64: 1, 16, 16, 128>}, {pipeline_mode = #tpu.pipeline_mode<synchronous>, transform_indices = @transform_1, window_bounds = array<i64: 1152, 128>}, {pipeline_mode = #tpu.pipeline_mode<synchronous>, transform_indices = @transform_2, window_bounds = array<i64: 1, 128>}, {pipeline_mode = #tpu.pipeline_mode<synchronous>, transform_indices = @transform_3, window_bounds = array<i64: 1152, 128>}, {pipeline_mode = #tpu.pipeline_mode<synchronous>, transform_indices = @transform_4, window_bounds = array<i64: 1, 128>}, {transform_indices = @transform_5, window_bounds = array<i64: 1, 1>}, {transform_indices = @transform_6, window_bounds = array<i64: 1, 16, 16, 128>}]} {
    %c0 = arith.constant 0 : index
    %c0_0 = arith.constant 0 : index
    %0 = memref.load %arg6[%c0, %c0_0] : memref<1x1xf32, #tpu.memory_space<smem>>
    %cst = arith.constant 0.000000e+00 : bf16
    %1 = vector.broadcast %cst : bf16 to vector<1x16x128xbf16>
    %c0_1 = arith.constant 0 : index
    %c0_2 = arith.constant 0 : index
    %c0_3 = arith.constant 0 : index
    %2 = vector.load %arg8[%c0_1, %c0_2, %c0_3] : memref<18x16x128xbf16, #tpu.memory_space<vmem>>, vector<1x16x128xbf16>
    tpu.vector_store %arg8[%c0_1, %c0_2, %c0_3], %1 {strides = array<i32>} : memref<18x16x128xbf16, #tpu.memory_space<vmem>>, vector<1x16x128xbf16>,
    %c17 = arith.constant 17 : index
    %c0_4 = arith.constant 0 : index
    %c0_5 = arith.constant 0 : index
    %3 = vector.load %arg8[%c17, %c0_4, %c0_5] : memref<18x16x128xbf16, #tpu.memory_space<vmem>>, vector<1x16x128xbf16>
    tpu.vector_store %arg8[%c17, %c0_4, %c0_5], %1 {strides = array<i32>} : memref<18x16x128xbf16, #tpu.memory_space<vmem>>, vector<1x16x128xbf16>,
    %c0_6 = arith.constant 0 : index
    %c0_7 = arith.constant 0 : index
    %c0_8 = arith.constant 0 : index
    %4 = vector.load %arg9[%c0_6, %c0_7, %c0_8] : memref<18x16x128xbf16, #tpu.memory_space<vmem>>, vector<1x16x128xbf16>
    tpu.vector_store %arg9[%c0_6, %c0_7, %c0_8], %1 {strides = array<i32>} : memref<18x16x128xbf16, #tpu.memory_space<vmem>>, vector<1x16x128xbf16>,
    %c17_9 = arith.constant 17 : index
    %c0_10 = arith.constant 0 : index
    %c0_11 = arith.constant 0 : index
    %5 = vector.load %arg9[%c17_9, %c0_10, %c0_11] : memref<18x16x128xbf16, #tpu.memory_space<vmem>>, vector<1x16x128xbf16>
    tpu.vector_store %arg9[%c17_9, %c0_10, %c0_11], %1 {strides = array<i32>} : memref<18x16x128xbf16, #tpu.memory_space<vmem>>, vector<1x16x128xbf16>,
    %c0_12 = arith.constant 0 : index
    %c0_13 = arith.constant 0 : index
    %c0_14 = arith.constant 0 : index
    %6 = vector.load %arg10[%c0_12, %c0_13, %c0_14] : memref<18x16x128xbf16, #tpu.memory_space<vmem>>, vector<1x16x128xbf16>
    tpu.vector_store %arg10[%c0_12, %c0_13, %c0_14], %1 {strides = array<i32>} : memref<18x16x128xbf16, #tpu.memory_space<vmem>>, vector<1x16x128xbf16>,
    %c17_15 = arith.constant 17 : index
    %c0_16 = arith.constant 0 : index
    %c0_17 = arith.constant 0 : index
    %7 = vector.load %arg10[%c17_15, %c0_16, %c0_17] : memref<18x16x128xbf16, #tpu.memory_space<vmem>>, vector<1x16x128xbf16>
    tpu.vector_store %arg10[%c17_15, %c0_16, %c0_17], %1 {strides = array<i32>} : memref<18x16x128xbf16, #tpu.memory_space<vmem>>, vector<1x16x128xbf16>,
    %c0_18 = arith.constant 0 : index
    %c0_19 = arith.constant 0 : index
    %c0_20 = arith.constant 0 : index
    %c0_21 = arith.constant 0 : index
    %8 = vector.load %arg1[%c0_18, %c0_19, %c0_20, %c0_21] : memref<1x16x16x128xf32, #tpu.memory_space<vmem>>, vector<1x16x16x128xf32>
    %9 = vector.shape_cast %8 : vector<1x16x16x128xf32> to vector<16x16x128xf32>
    %cst_22 = arith.constant 0.000000e+00 : bf16
    %10 = vector.broadcast %cst_22 : bf16 to vector<16x1x128xbf16>
    %11 = arith.truncf %9 : vector<16x16x128xf32> to vector<16x16x128xbf16>
    %c1 = arith.constant 1 : index
    %c0_23 = arith.constant 0 : index
    %c0_24 = arith.constant 0 : index
    %12 = vector.load %arg9[%c1, %c0_23, %c0_24] : memref<18x16x128xbf16, #tpu.memory_space<vmem>>, vector<16x16x128xbf16>
    tpu.vector_store %arg9[%c1, %c0_23, %c0_24], %11 {strides = array<i32>} : memref<18x16x128xbf16, #tpu.memory_space<vmem>>, vector<16x16x128xbf16>,
    %c1_i32 = arith.constant 1 : i32
    %13 = tpu.dynamic_rotate %9 by %c1_i32 dim 1 : vector<16x16x128xf32>, i32 -> vector<16x16x128xf32>
    %14 = arith.truncf %13 : vector<16x16x128xf32> to vector<16x16x128xbf16>
    %c1_25 = arith.constant 1 : index
    %c0_26 = arith.constant 0 : index
    %c0_27 = arith.constant 0 : index
    %15 = vector.load %arg8[%c1_25, %c0_26, %c0_27] : memref<18x16x128xbf16, #tpu.memory_space<vmem>>, vector<16x16x128xbf16>
    tpu.vector_store %arg8[%c1_25, %c0_26, %c0_27], %14 {strides = array<i32>} : memref<18x16x128xbf16, #tpu.memory_space<vmem>>, vector<16x16x128xbf16>,
    %c1_28 = arith.constant 1 : index
    %c0_29 = arith.constant 0 : index
    %c0_30 = arith.constant 0 : index
    %16 = vector.load %arg8[%c1_28, %c0_29, %c0_30] : memref<18x16x128xbf16, #tpu.memory_space<vmem>>, vector<16x1x128xbf16>
    tpu.vector_store %arg8[%c1_28, %c0_29, %c0_30], %10 {strides = array<i32>} : memref<18x16x128xbf16, #tpu.memory_space<vmem>>, vector<16x1x128xbf16>,
    %c15_i32 = arith.constant 15 : i32
    %17 = tpu.dynamic_rotate %9 by %c15_i32 dim 1 : vector<16x16x128xf32>, i32 -> vector<16x16x128xf32>
    %18 = arith.truncf %17 : vector<16x16x128xf32> to vector<16x16x128xbf16>
    %c1_31 = arith.constant 1 : index
    %c0_32 = arith.constant 0 : index
    %c0_33 = arith.constant 0 : index
    %19 = vector.load %arg10[%c1_31, %c0_32, %c0_33] : memref<18x16x128xbf16, #tpu.memory_space<vmem>>, vector<16x16x128xbf16>
    tpu.vector_store %arg10[%c1_31, %c0_32, %c0_33], %18 {strides = array<i32>} : memref<18x16x128xbf16, #tpu.memory_space<vmem>>, vector<16x16x128xbf16>,
    %c1_34 = arith.constant 1 : index
    %c15 = arith.constant 15 : index
    %c0_35 = arith.constant 0 : index
    %20 = vector.load %arg10[%c1_34, %c15, %c0_35] : memref<18x16x128xbf16, #tpu.memory_space<vmem>>, vector<16x1x128xbf16>
    tpu.vector_store %arg10[%c1_34, %c15, %c0_35], %10 {strides = array<i32>} : memref<18x16x128xbf16, #tpu.memory_space<vmem>>, vector<16x1x128xbf16>,
    %c0_36 = arith.constant 0 : index
    %c0_37 = arith.constant 0 : index
    %21 = vector.load %arg3[%c0_36, %c0_37] : memref<1x128xf32, #tpu.memory_space<vmem>>, vector<1x128xf32>
    %22 = vector.shape_cast %21 : vector<1x128xf32> to vector<1x128xf32>
    %23 = vector.broadcast %22 : vector<1x128xf32> to vector<256x128xf32>
    %c0_38 = arith.constant 0 : index
    %c0_39 = arith.constant 0 : index
    %c0_40 = arith.constant 0 : index
    %24 = vector.load %arg8[%c0_38, %c0_39, %c0_40] : memref<18x16x128xbf16, #tpu.memory_space<vmem>>, vector<16x16x128xbf16>
    %25 = vector.shape_cast %24 : vector<16x16x128xbf16> to vector<256x128xbf16>
    %c0_41 = arith.constant 0 : index
    %c0_42 = arith.constant 0 : index
    %c0_43 = arith.constant 0 : index
    %26 = vector.load %arg9[%c0_41, %c0_42, %c0_43] : memref<18x16x128xbf16, #tpu.memory_space<vmem>>, vector<16x16x128xbf16>
    %27 = vector.shape_cast %26 : vector<16x16x128xbf16> to vector<256x128xbf16>
    %28 = tpu.concatenate %25, %27 in 1 : vector<256x128xbf16>, vector<256x128xbf16> -> vector<256x256xbf16>
    %c0_44 = arith.constant 0 : index
    %c0_45 = arith.constant 0 : index
    %29 = vector.load %arg2[%c0_44, %c0_45] : memref<1152x128xbf16, #tpu.memory_space<vmem>>, vector<256x128xbf16>
    %cst_46 = arith.constant dense<0.000000e+00> : vector<256x128xf32>
    %30 = tpu.matmul %28, %29, %cst_46 {dimension_numbers = #tpu.dot_dimension_numbers<[1], [0], [0], [1], [0, 0, 1, 1], [], []>} : vector<256x256xbf16>, vector<256x128xbf16>, vector<256x128xf32> -> vector<256x128xf32>
    %31 = arith.addf %23, %30 : vector<256x128xf32>
    %c0_47 = arith.constant 0 : index
    %c0_48 = arith.constant 0 : index
    %c0_49 = arith.constant 0 : index
    %32 = vector.load %arg10[%c0_47, %c0_48, %c0_49] : memref<18x16x128xbf16, #tpu.memory_space<vmem>>, vector<16x16x128xbf16>
    %33 = vector.shape_cast %32 : vector<16x16x128xbf16> to vector<256x128xbf16>
    %c1_50 = arith.constant 1 : index
    %c0_51 = arith.constant 0 : index
    %c0_52 = arith.constant 0 : index
    %34 = vector.load %arg8[%c1_50, %c0_51, %c0_52] : memref<18x16x128xbf16, #tpu.memory_space<vmem>>, vector<16x16x128xbf16>
    %35 = vector.shape_cast %34 : vector<16x16x128xbf16> to vector<256x128xbf16>
    %36 = tpu.concatenate %33, %35 in 1 : vector<256x128xbf16>, vector<256x128xbf16> -> vector<256x256xbf16>
    %c256 = arith.constant 256 : index
    %c0_53 = arith.constant 0 : index
    %37 = vector.load %arg2[%c256, %c0_53] : memref<1152x128xbf16, #tpu.memory_space<vmem>>, vector<256x128xbf16>
    %cst_54 = arith.constant dense<0.000000e+00> : vector<256x128xf32>
    %38 = tpu.matmul %36, %37, %cst_54 {dimension_numbers = #tpu.dot_dimension_numbers<[1], [0], [0], [1], [0, 0, 1, 1], [], []>} : vector<256x256xbf16>, vector<256x128xbf16>, vector<256x128xf32> -> vector<256x128xf32>
    %39 = arith.addf %31, %38 : vector<256x128xf32>
    %c1_55 = arith.constant 1 : index
    %c0_56 = arith.constant 0 : index
    %c0_57 = arith.constant 0 : index
    %40 = vector.load %arg9[%c1_55, %c0_56, %c0_57] : memref<18x16x128xbf16, #tpu.memory_space<vmem>>, vector<16x16x128xbf16>
    %41 = vector.shape_cast %40 : vector<16x16x128xbf16> to vector<256x128xbf16>
    %c1_58 = arith.constant 1 : index
    %c0_59 = arith.constant 0 : index
    %c0_60 = arith.constant 0 : index
    %42 = vector.load %arg10[%c1_58, %c0_59, %c0_60] : memref<18x16x128xbf16, #tpu.memory_space<vmem>>, vector<16x16x128xbf16>
    %43 = vector.shape_cast %42 : vector<16x16x128xbf16> to vector<256x128xbf16>
    %44 = tpu.concatenate %41, %43 in 1 : vector<256x128xbf16>, vector<256x128xbf16> -> vector<256x256xbf16>
    %c512 = arith.constant 512 : index
    %c0_61 = arith.constant 0 : index
    %45 = vector.load %arg2[%c512, %c0_61] : memref<1152x128xbf16, #tpu.memory_space<vmem>>, vector<256x128xbf16>
    %cst_62 = arith.constant dense<0.000000e+00> : vector<256x128xf32>
    %46 = tpu.matmul %44, %45, %cst_62 {dimension_numbers = #tpu.dot_dimension_numbers<[1], [0], [0], [1], [0, 0, 1, 1], [], []>} : vector<256x256xbf16>, vector<256x128xbf16>, vector<256x128xf32> -> vector<256x128xf32>
    %47 = arith.addf %39, %46 : vector<256x128xf32>
    %c2 = arith.constant 2 : index
    %c0_63 = arith.constant 0 : index
    %c0_64 = arith.constant 0 : index
    %48 = vector.load %arg8[%c2, %c0_63, %c0_64] : memref<18x16x128xbf16, #tpu.memory_space<vmem>>, vector<16x16x128xbf16>
    %49 = vector.shape_cast %48 : vector<16x16x128xbf16> to vector<256x128xbf16>
    %c2_65 = arith.constant 2 : index
    %c0_66 = arith.constant 0 : index
    %c0_67 = arith.constant 0 : index
    %50 = vector.load %arg9[%c2_65, %c0_66, %c0_67] : memref<18x16x128xbf16, #tpu.memory_space<vmem>>, vector<16x16x128xbf16>
    %51 = vector.shape_cast %50 : vector<16x16x128xbf16> to vector<256x128xbf16>
    %52 = tpu.concatenate %49, %51 in 1 : vector<256x128xbf16>, vector<256x128xbf16> -> vector<256x256xbf16>
    %c768 = arith.constant 768 : index
    %c0_68 = arith.constant 0 : index
    %53 = vector.load %arg2[%c768, %c0_68] : memref<1152x128xbf16, #tpu.memory_space<vmem>>, vector<256x128xbf16>
    %cst_69 = arith.constant dense<0.000000e+00> : vector<256x128xf32>
    %54 = tpu.matmul %52, %53, %cst_69 {dimension_numbers = #tpu.dot_dimension_numbers<[1], [0], [0], [1], [0, 0, 1, 1], [], []>} : vector<256x256xbf16>, vector<256x128xbf16>, vector<256x128xf32> -> vector<256x128xf32>
    %55 = arith.addf %47, %54 : vector<256x128xf32>
    %c2_70 = arith.constant 2 : index
    %c0_71 = arith.constant 0 : index
    %c0_72 = arith.constant 0 : index
    %56 = vector.load %arg10[%c2_70, %c0_71, %c0_72] : memref<18x16x128xbf16, #tpu.memory_space<vmem>>, vector<16x16x128xbf16>
    %57 = vector.shape_cast %56 : vector<16x16x128xbf16> to vector<256x128xbf16>
    %c1024 = arith.constant 1024 : index
    %c0_73 = arith.constant 0 : index
    %58 = vector.load %arg2[%c1024, %c0_73] : memref<1152x128xbf16, #tpu.memory_space<vmem>>, vector<128x128xbf16>
    %cst_74 = arith.constant dense<0.000000e+00> : vector<256x128xf32>
    %59 = tpu.matmul %57, %58, %cst_74 {dimension_numbers = #tpu.dot_dimension_numbers<[1], [0], [0], [1], [0, 0, 1, 1], [], []>} : vector<256x128xbf16>, vector<128x128xbf16>, vector<256x128xf32> -> vector<256x128xf32>
    %60 = arith.addf %55, %59 : vector<256x128xf32>
    %cst_75 = arith.constant 0.000000e+00 : f32
    %61 = vector.broadcast %cst_75 : f32 to vector<256x128xf32>
    %62 = arith.maximumf %60, %61 : vector<256x128xf32>
    %cst_76 = arith.constant 0.000000e+00 : f32
    %63 = vector.broadcast %cst_76 : f32 to vector<256x128xf32>
    %64 = arith.minimumf %60, %63 : vector<256x128xf32>
    %65 = vector.broadcast %0 : f32 to vector<256x128xf32>
    %66 = arith.mulf %65, %64 : vector<256x128xf32>
    %67 = arith.addf %62, %66 : vector<256x128xf32>
    %68 = vector.shape_cast %67 : vector<256x128xf32> to vector<16x16x128xf32>
    %cst_77 = arith.constant 0.000000e+00 : bf16
    %69 = vector.broadcast %cst_77 : bf16 to vector<16x1x128xbf16>
    %70 = arith.truncf %68 : vector<16x16x128xf32> to vector<16x16x128xbf16>
    %c1_78 = arith.constant 1 : index
    %c0_79 = arith.constant 0 : index
    %c0_80 = arith.constant 0 : index
    %71 = vector.load %arg9[%c1_78, %c0_79, %c0_80] : memref<18x16x128xbf16, #tpu.memory_space<vmem>>, vector<16x16x128xbf16>
    tpu.vector_store %arg9[%c1_78, %c0_79, %c0_80], %70 {strides = array<i32>} : memref<18x16x128xbf16, #tpu.memory_space<vmem>>, vector<16x16x128xbf16>,
    %c1_i32_81 = arith.constant 1 : i32
    %72 = tpu.dynamic_rotate %68 by %c1_i32_81 dim 1 : vector<16x16x128xf32>, i32 -> vector<16x16x128xf32>
    %73 = arith.truncf %72 : vector<16x16x128xf32> to vector<16x16x128xbf16>
    %c1_82 = arith.constant 1 : index
    %c0_83 = arith.constant 0 : index
    %c0_84 = arith.constant 0 : index
    %74 = vector.load %arg8[%c1_82, %c0_83, %c0_84] : memref<18x16x128xbf16, #tpu.memory_space<vmem>>, vector<16x16x128xbf16>
    tpu.vector_store %arg8[%c1_82, %c0_83, %c0_84], %73 {strides = array<i32>} : memref<18x16x128xbf16, #tpu.memory_space<vmem>>, vector<16x16x128xbf16>,
    %c1_85 = arith.constant 1 : index
    %c0_86 = arith.constant 0 : index
    %c0_87 = arith.constant 0 : index
    %75 = vector.load %arg8[%c1_85, %c0_86, %c0_87] : memref<18x16x128xbf16, #tpu.memory_space<vmem>>, vector<16x1x128xbf16>
    tpu.vector_store %arg8[%c1_85, %c0_86, %c0_87], %69 {strides = array<i32>} : memref<18x16x128xbf16, #tpu.memory_space<vmem>>, vector<16x1x128xbf16>,
    %c15_i32_88 = arith.constant 15 : i32
    %76 = tpu.dynamic_rotate %68 by %c15_i32_88 dim 1 : vector<16x16x128xf32>, i32 -> vector<16x16x128xf32>
    %77 = arith.truncf %76 : vector<16x16x128xf32> to vector<16x16x128xbf16>
    %c1_89 = arith.constant 1 : index
    %c0_90 = arith.constant 0 : index
    %c0_91 = arith.constant 0 : index
    %78 = vector.load %arg10[%c1_89, %c0_90, %c0_91] : memref<18x16x128xbf16, #tpu.memory_space<vmem>>, vector<16x16x128xbf16>
    tpu.vector_store %arg10[%c1_89, %c0_90, %c0_91], %77 {strides = array<i32>} : memref<18x16x128xbf16, #tpu.memory_space<vmem>>, vector<16x16x128xbf16>,
    %c1_92 = arith.constant 1 : index
    %c15_93 = arith.constant 15 : index
    %c0_94 = arith.constant 0 : index
    %79 = vector.load %arg10[%c1_92, %c15_93, %c0_94] : memref<18x16x128xbf16, #tpu.memory_space<vmem>>, vector<16x1x128xbf16>
    tpu.vector_store %arg10[%c1_92, %c15_93, %c0_94], %69 {strides = array<i32>} : memref<18x16x128xbf16, #tpu.memory_space<vmem>>, vector<16x1x128xbf16>,
    %c0_95 = arith.constant 0 : index
    %c0_96 = arith.constant 0 : index
    %80 = vector.load %arg5[%c0_95, %c0_96] : memref<1x128xf32, #tpu.memory_space<vmem>>, vector<1x128xf32>
    %81 = vector.shape_cast %80 : vector<1x128xf32> to vector<1x128xf32>
    %82 = vector.broadcast %81 : vector<1x128xf32> to vector<256x128xf32>
    %c0_97 = arith.constant 0 : index
    %c0_98 = arith.constant 0 : index
    %c0_99 = arith.constant 0 : index
    %83 = vector.load %arg8[%c0_97, %c0_98, %c0_99] : memref<18x16x128xbf16, #tpu.memory_space<vmem>>, vector<16x16x128xbf16>
    %84 = vector.shape_cast %83 : vector<16x16x128xbf16> to vector<256x128xbf16>
    %c0_100 = arith.constant 0 : index
    %c0_101 = arith.constant 0 : index
    %c0_102 = arith.constant 0 : index
    %85 = vector.load %arg9[%c0_100, %c0_101, %c0_102] : memref<18x16x128xbf16, #tpu.memory_space<vmem>>, vector<16x16x128xbf16>
    %86 = vector.shape_cast %85 : vector<16x16x128xbf16> to vector<256x128xbf16>
    %87 = tpu.concatenate %84, %86 in 1 : vector<256x128xbf16>, vector<256x128xbf16> -> vector<256x256xbf16>
    %c0_103 = arith.constant 0 : index
    %c0_104 = arith.constant 0 : index
    %88 = vector.load %arg4[%c0_103, %c0_104] : memref<1152x128xbf16, #tpu.memory_space<vmem>>, vector<256x128xbf16>
    %cst_105 = arith.constant dense<0.000000e+00> : vector<256x128xf32>
    %89 = tpu.matmul %87, %88, %cst_105 {dimension_numbers = #tpu.dot_dimension_numbers<[1], [0], [0], [1], [0, 0, 1, 1], [], []>} : vector<256x256xbf16>, vector<256x128xbf16>, vector<256x128xf32> -> vector<256x128xf32>
    %90 = arith.addf %82, %89 : vector<256x128xf32>
    %c0_106 = arith.constant 0 : index
    %c0_107 = arith.constant 0 : index
    %c0_108 = arith.constant 0 : index
    %91 = vector.load %arg10[%c0_106, %c0_107, %c0_108] : memref<18x16x128xbf16, #tpu.memory_space<vmem>>, vector<16x16x128xbf16>
    %92 = vector.shape_cast %91 : vector<16x16x128xbf16> to vector<256x128xbf16>
    %c1_109 = arith.constant 1 : index
    %c0_110 = arith.constant 0 : index
    %c0_111 = arith.constant 0 : index
    %93 = vector.load %arg8[%c1_109, %c0_110, %c0_111] : memref<18x16x128xbf16, #tpu.memory_space<vmem>>, vector<16x16x128xbf16>
    %94 = vector.shape_cast %93 : vector<16x16x128xbf16> to vector<256x128xbf16>
    %95 = tpu.concatenate %92, %94 in 1 : vector<256x128xbf16>, vector<256x128xbf16> -> vector<256x256xbf16>
    %c256_112 = arith.constant 256 : index
    %c0_113 = arith.constant 0 : index
    %96 = vector.load %arg4[%c256_112, %c0_113] : memref<1152x128xbf16, #tpu.memory_space<vmem>>, vector<256x128xbf16>
    %cst_114 = arith.constant dense<0.000000e+00> : vector<256x128xf32>
    %97 = tpu.matmul %95, %96, %cst_114 {dimension_numbers = #tpu.dot_dimension_numbers<[1], [0], [0], [1], [0, 0, 1, 1], [], []>} : vector<256x256xbf16>, vector<256x128xbf16>, vector<256x128xf32> -> vector<256x128xf32>
    %98 = arith.addf %90, %97 : vector<256x128xf32>
    %c1_115 = arith.constant 1 : index
    %c0_116 = arith.constant 0 : index
    %c0_117 = arith.constant 0 : index
    %99 = vector.load %arg9[%c1_115, %c0_116, %c0_117] : memref<18x16x128xbf16, #tpu.memory_space<vmem>>, vector<16x16x128xbf16>
    %100 = vector.shape_cast %99 : vector<16x16x128xbf16> to vector<256x128xbf16>
    %c1_118 = arith.constant 1 : index
    %c0_119 = arith.constant 0 : index
    %c0_120 = arith.constant 0 : index
    %101 = vector.load %arg10[%c1_118, %c0_119, %c0_120] : memref<18x16x128xbf16, #tpu.memory_space<vmem>>, vector<16x16x128xbf16>
    %102 = vector.shape_cast %101 : vector<16x16x128xbf16> to vector<256x128xbf16>
    %103 = tpu.concatenate %100, %102 in 1 : vector<256x128xbf16>, vector<256x128xbf16> -> vector<256x256xbf16>
    %c512_121 = arith.constant 512 : index
    %c0_122 = arith.constant 0 : index
    %104 = vector.load %arg4[%c512_121, %c0_122] : memref<1152x128xbf16, #tpu.memory_space<vmem>>, vector<256x128xbf16>
    %cst_123 = arith.constant dense<0.000000e+00> : vector<256x128xf32>
    %105 = tpu.matmul %103, %104, %cst_123 {dimension_numbers = #tpu.dot_dimension_numbers<[1], [0], [0], [1], [0, 0, 1, 1], [], []>} : vector<256x256xbf16>, vector<256x128xbf16>, vector<256x128xf32> -> vector<256x128xf32>
    %106 = arith.addf %98, %105 : vector<256x128xf32>
    %c2_124 = arith.constant 2 : index
    %c0_125 = arith.constant 0 : index
    %c0_126 = arith.constant 0 : index
    %107 = vector.load %arg8[%c2_124, %c0_125, %c0_126] : memref<18x16x128xbf16, #tpu.memory_space<vmem>>, vector<16x16x128xbf16>
    %108 = vector.shape_cast %107 : vector<16x16x128xbf16> to vector<256x128xbf16>
    %c2_127 = arith.constant 2 : index
    %c0_128 = arith.constant 0 : index
    %c0_129 = arith.constant 0 : index
    %109 = vector.load %arg9[%c2_127, %c0_128, %c0_129] : memref<18x16x128xbf16, #tpu.memory_space<vmem>>, vector<16x16x128xbf16>
    %110 = vector.shape_cast %109 : vector<16x16x128xbf16> to vector<256x128xbf16>
    %111 = tpu.concatenate %108, %110 in 1 : vector<256x128xbf16>, vector<256x128xbf16> -> vector<256x256xbf16>
    %c768_130 = arith.constant 768 : index
    %c0_131 = arith.constant 0 : index
    %112 = vector.load %arg4[%c768_130, %c0_131] : memref<1152x128xbf16, #tpu.memory_space<vmem>>, vector<256x128xbf16>
    %cst_132 = arith.constant dense<0.000000e+00> : vector<256x128xf32>
    %113 = tpu.matmul %111, %112, %cst_132 {dimension_numbers = #tpu.dot_dimension_numbers<[1], [0], [0], [1], [0, 0, 1, 1], [], []>} : vector<256x256xbf16>, vector<256x128xbf16>, vector<256x128xf32> -> vector<256x128xf32>
    %114 = arith.addf %106, %113 : vector<256x128xf32>
    %c2_133 = arith.constant 2 : index
    %c0_134 = arith.constant 0 : index
    %c0_135 = arith.constant 0 : index
    %115 = vector.load %arg10[%c2_133, %c0_134, %c0_135] : memref<18x16x128xbf16, #tpu.memory_space<vmem>>, vector<16x16x128xbf16>
    %116 = vector.shape_cast %115 : vector<16x16x128xbf16> to vector<256x128xbf16>
    %c1024_136 = arith.constant 1024 : index
    %c0_137 = arith.constant 0 : index
    %117 = vector.load %arg4[%c1024_136, %c0_137] : memref<1152x128xbf16, #tpu.memory_space<vmem>>, vector<128x128xbf16>
    %cst_138 = arith.constant dense<0.000000e+00> : vector<256x128xf32>
    %118 = tpu.matmul %116, %117, %cst_138 {dimension_numbers = #tpu.dot_dimension_numbers<[1], [0], [0], [1], [0, 0, 1, 1], [], []>} : vector<256x128xbf16>, vector<128x128xbf16>, vector<256x128xf32> -> vector<256x128xf32>
    %119 = arith.addf %114, %118 : vector<256x128xf32>
    %c0_139 = arith.constant 0 : index
    %c0_140 = arith.constant 0 : index
    %c0_141 = arith.constant 0 : index
    %c0_142 = arith.constant 0 : index
    %120 = vector.load %arg1[%c0_139, %c0_140, %c0_141, %c0_142] : memref<1x16x16x128xf32, #tpu.memory_space<vmem>>, vector<1x16x16x128xf32>
    %121 = vector.shape_cast %120 : vector<1x16x16x128xf32> to vector<16x16x128xf32>
    %122 = vector.shape_cast %119 : vector<256x128xf32> to vector<16x16x128xf32>
    %123 = arith.addf %121, %122 : vector<16x16x128xf32>
    %c0_143 = arith.constant 0 : index
    %c0_144 = arith.constant 0 : index
    %c0_145 = arith.constant 0 : index
    %c0_146 = arith.constant 0 : index
    %124 = vector.load %arg7[%c0_143, %c0_144, %c0_145, %c0_146] : memref<1x16x16x128xf32, #tpu.memory_space<vmem>>, vector<1x16x16x128xf32>
    %125 = vector.shape_cast %124 : vector<1x16x16x128xf32> to vector<16x16x128xf32>
    %126 = vector.shape_cast %123 : vector<16x16x128xf32> to vector<1x16x16x128xf32>
    tpu.vector_store %arg7[%c0_143, %c0_144, %c0_145, %c0_146], %126 {strides = array<i32>} : memref<1x16x16x128xf32, #tpu.memory_space<vmem>>, vector<1x16x16x128xf32>,
    return
  }
  func.func @transform_0(%arg0: i32) -> (i32, i32, i32, i32) {
    %c0_i32 = arith.constant 0 : i32
    %c0_i32_0 = arith.constant 0 : i32
    %c0_i32_1 = arith.constant 0 : i32
    %c0_i32_2 = arith.constant 0 : i32
    return %arg0, %c0_i32, %c0_i32_0, %c0_i32_1 : i32, i32, i32, i32
  }
  func.func @transform_1(%arg0: i32) -> (i32, i32) {
    %c0_i32 = arith.constant 0 : i32
    %c0_i32_0 = arith.constant 0 : i32
    %c0_i32_1 = arith.constant 0 : i32
    return %c0_i32, %c0_i32_0 : i32, i32
  }
  func.func @transform_2(%arg0: i32) -> (i32, i32) {
    %c0_i32 = arith.constant 0 : i32
    %c0_i32_0 = arith.constant 0 : i32
    %c0_i32_1 = arith.constant 0 : i32
    return %c0_i32, %c0_i32_0 : i32, i32
  }
  func.func @transform_3(%arg0: i32) -> (i32, i32) {
    %c0_i32 = arith.constant 0 : i32
    %c0_i32_0 = arith.constant 0 : i32
    %c0_i32_1 = arith.constant 0 : i32
    return %c0_i32, %c0_i32_0 : i32, i32
  }
  func.func @transform_4(%arg0: i32) -> (i32, i32) {
    %c0_i32 = arith.constant 0 : i32
    %c0_i32_0 = arith.constant 0 : i32
    %c0_i32_1 = arith.constant 0 : i32
    return %c0_i32, %c0_i32_0 : i32, i32
  }
  func.func @transform_5(%arg0: i32) -> (i32, i32) {
    %c0_i32 = arith.constant 0 : i32
    %c0_i32_0 = arith.constant 0 : i32
    %c0_i32_1 = arith.constant 0 : i32
    return %c0_i32, %c0_i32_0 : i32, i32
  }
  func.func @transform_6(%arg0: i32) -> (i32, i32, i32, i32) {
    %c0_i32 = arith.constant 0 : i32
    %c0_i32_0 = arith.constant 0 : i32
    %c0_i32_1 = arith.constant 0 : i32
    %c0_i32_2 = arith.constant 0 : i32
    return %arg0, %c0_i32, %c0_i32_0, %c0_i32_1 : i32, i32, i32, i32
  }
}

</mosaic_0001>

<bundles_post_ra>
// kernel: tpu_custom_call.1
= control target key start
LH: loop header
LB: loop body
LE: loop exit
PB: predicated region body
PF: predicated region fallthrough
CT: control target
= control target key end

     0   :  { %s8373_s0 = inlined_call_operand.hbm [shape: f32[2,16,16,128], index: 0, kind: input, shape index: {}]   ;;  %s8374_s1 = inlined_call_operand.hbm [shape: bf16[1152,128], index: 1, kind: input, shape index: {}]   ;;  %s8375_s2 = inlined_call_operand.vmem [shape: f32[1,128], index: 2, kind: input, shape index: {}]   ;;  %s8376_s3 = inlined_call_operand.hbm [shape: bf16[1152,128], index: 3, kind: input, shape index: {}]   ;;  %s8377_s4 = inlined_call_operand.vmem [shape: f32[1,128], index: 4, kind: input, shape index: {}]   ;;  %s8378_s5 = inlined_call_operand.<no memory space> [shape: f32[1,1], index: 5, kind: input, shape index: {}]   ;;  %s8379_s6 = inlined_call_operand.hbm [shape: f32[2,16,16,128], index: 6, kind: output, shape index: {}]  }
   0x1   :  { %11 = sst [smem:[#allocation5]] %s8378_s5 }
   0x2   :  { %12 = vsyncpa [#allocation7], 0 }
   0x3   :  { %14 = vsyncpa [#allocation7 + $0x1], 0 }
   0x4   :  { %15 = vsyncpa [#allocation10], 0 }
   0x5   :  { %16 = vsyncpa [#allocation8], 0 }
   0x6   :  { %18 = vsyncpa [#allocation8 + $0x1], 0  ;;  %s6348_s23 = smov 0   ;;  %s6350_s24 = smov 0  }
   0x7   :  { %s6352_s25 = smov 0   ;;  %s6354_s26 = smov 0  }
   0x8 LB: > { %s6369_s5 = sadd.s32 4294967295, %s6297_s26   ;;  %s4714_s27 = sadd.s32 4294967294, %s6297_s26   ;;  %s6297_s26 = sphi %s6354_s26, %s8403_s26   ;;  %s6293_s25 = sphi %s6352_s25, %s8402_s25   ;;  %s6289_s24 = sphi %s6350_s24, %s8401_s24   ;;  %s6285_s23 = sphi %s6348_s23, %s8400_s23  }
   0x9   : > { %p44_p0 = scmp.ne.s32.totalorder %s6289_s24, %s6285_s23  ;;  %p8380_p1 = scmp.eq.s32.totalorder %s6369_s5, 0 }
   0xa   : > { %p179_p3 = scmp.eq.s32.totalorder %s4714_s27, 1  ;;  %p4715_p5 = scmp.ge.s32.totalorder %s6297_s26, 1 }
   0xb   : > { %p6378_p4 = por %p8380_p1, %p44_p0  ;;  %p186_p7 = scmp.lt.s32.totalorder %s6297_s26, 3 }
   0xc   : > { %p6383_p6 = por %p179_p3, %p44_p0  ;;  %s6299_s7 = smov [#allocation9]  }
   0xd   : > { %s8383_s28 = scalar_select %p6378_p4, 1, 0 }
   0xe   : > { %s8384_s29 = scalar_select %p6383_p6, 1, 0 }
   0xf   : > { %p6388_p8 = pnand %p4715_p5, %p186_p7  ;;  %s198_s8 = sshll.u32 %s6299_s7, 4  ;;  %s6392_s8 = int_to_ptr.vmem [resolvable:$true] %s198_s8 }
  0x10   : > { %s6300_s10 = smov [#allocation11]   ;;  %s6141_s14 = scalar_lea.hbm %s8374_s1, 9216 }
  0x11   : > { %p5932_p9 = pneg %p6388_p8  ;;  %s214_s11 = sshll.u32 %s6300_s10, 4  ;;  %s6403_s11 = int_to_ptr.vmem [resolvable:$true] %s214_s11 }
  0x12   : > { %p6142_p12 = scmp.ne.s32.totalorder %s8374_s1, %s6141_s14  ;;  %p6148_p5 = scmp.lt.u32.totalorder %s6141_s14, %s8374_s1 }
  0x13   : > { %p6399_p11 = pnand %p5932_p9, %p8380_p1 }
  0x15   : > { %p6143_p13 = pneg %p6399_p11 }
  0x17   : > { %p6144_p0 = pnand %p6143_p13, %p6142_p12 }
  0x19   : > { %p6145_p3 = pneg %p6144_p0 }
  0x1b   : > { %p6150_p7 = pnand %p6148_p5, %p6145_p3 }
  0x1d   : > { %6153 = shalt.err (!%p6150_p7)
}
  0x1e   : > { %s6154_s19 = scalar_lea.vmem %s6392_s8, 9216  ;;  %p6162_p2 = scmp.lt.s32.totalorder %s6392_s8, %s6392_s8 }
  0x1f   : > { %p6155_p9 = scmp.ne.s32.totalorder %s6392_s8, %s6154_s19  ;;  %p6163_p12 = scmp.lt.s32.totalorder %s6154_s19, %s6154_s19 }
  0x21   : > { %p6157_p10 = pnand %p6155_p9, %p6143_p13  ;;  %p6164_p0 = por %p6163_p12, %p6162_p2 }
  0x23   : > { %p6158_p1 = pneg %p6157_p10 }
  0x25   : > { %p6165_p6 = pnand %p6164_p0, %p6158_p1 }
  0x27   : > { %6168 = shalt.err (!%p6165_p6)
}
  0x28   : > { %s6301_s20 = smov 64   ;;  %s6302_s21 = smov 4  }
  0x29   : > { %5935 = dma.hbm_to_vmem [thread:$0]  (!%p6399_p11), %s8374_s1, 9216, %s6392_s8, [#allocation10], %s6301_s20, %s6301_s20, %s6302_s21  }
  0x2a   : > { %s6169_s12 = scalar_lea.hbm %s8376_s3, 9216 }
  0x2b   : > { %p6170_p2 = scmp.ne.s32.totalorder %s8376_s3, %s6169_s12  ;;  %p6176_p10 = scmp.lt.u32.totalorder %s6169_s12, %s8376_s3 }
  0x2d   : > { %p6172_p1 = pnand %p6170_p2, %p6143_p13 }
  0x2f   : > { %p6173_p6 = pneg %p6172_p1 }
  0x31   : > { %p6178_p3 = pnand %p6176_p10, %p6173_p6 }
  0x33   : > { %6181 = shalt.err (!%p6178_p3)
}
  0x34   : > { %s6182_s8 = scalar_lea.vmem %s6403_s11, 9216  ;;  %p6190_p12 = scmp.lt.s32.totalorder %s6403_s11, %s6403_s11 }
  0x35   : > { %p6183_p5 = scmp.ne.s32.totalorder %s6403_s11, %s6182_s8  ;;  %p6191_p0 = scmp.lt.s32.totalorder %s6182_s8, %s6182_s8 }
  0x37   : > { %p6185_p7 = pnand %p6183_p5, %p6143_p13  ;;  %p6192_p2 = por %p6191_p0, %p6190_p12 }
  0x39   : > { %p6186_p9 = pneg %p6185_p7 }
  0x3b   : > { %p6193_p1 = pnand %p6192_p2, %p6186_p9 }
  0x3d   : > { %6196 = shalt.err (!%p6193_p1)
}
  0x3e   : > { %5938 = dma.hbm_to_vmem [thread:$0]  (!%p6399_p11), %s8376_s3, 9216, %s6403_s11, [#allocation10], %s6301_s20, %s6301_s20, %s6302_s21  }
  0x3f   : > { %s6458_s19 = sadd.s32 1, %s6297_s26   ;;  %s31_s9 = sadd.s32 1, %s6293_s25 }
  0x40   : > { %s28_s22 = ssub.s32 %s6297_s26, %s6458_s19  ;;  %p38_p13 = scmp.ne.s32.totalorder %s6293_s25, %s6289_s24 }
  0x41   : > { %p29_p6 = scmp.eq.s32.totalorder %s28_s22, 0  ;;  %p39_p10 = scmp.eq.s32.totalorder %s6297_s26, 0 }
  0x42   : > { %p8387_p3 = scmp.eq.s32.totalorder %s6369_s5, 1  ;;  %p5949_p7 = scmp.lt.s32.totalorder %s6297_s26, 2 }
  0x43   : > { %s6474_s7 = scalar_select %p29_p6, %s6293_s25, %s31_s9  }
  0x44   : > { %p6468_p5 = por %p8387_p3, %p38_p13  ;;  %p40_p9 = por %p39_p10, %p38_p13 }
  0x45   : > { %s234_s10 = sand.u32 1, %s6293_s25   ;;  %s4878_s11 = sshll.u32 %s6297_s26, 12 }
  0x46   : > { %s8388_s27 = scalar_select %p6468_p5, 1, 0 }
  0x47   : > { %s4719_s12 = sshll.u32 %s234_s10, 8  ;;  %s6481_s13 = scalar_lea.hbm %s8373_s0, %s4878_s11 }
  0x48   : > { %s238_s14 = scalar_lea.vmem [#allocation6], %s4719_s12  ;;  %p6485_p11 = pnand %p5949_p7, %p40_p9 }
  0x49   : > { %s245_s15 = sshll.u32 %s238_s14, 4  ;;  %s6489_s8 = scalar_lea.sflag [#allocation7], %s234_s10  ;;  %s6483_s15 = int_to_ptr.vmem [resolvable:$true] %s245_s15 }
  0x4a   : > { %s6197_s17 = scalar_lea.hbm %s6481_s13, 4096  ;;  %p6199_p0 = pneg %p6485_p11 }
  0x4b   : > { %p6198_p12 = scmp.ne.s32.totalorder %s6481_s13, %s6197_s17  ;;  %s6202_s22 = scalar_lea.hbm %s8373_s0, 8192 }
  0x4c   : > { %p6203_p13 = scmp.lt.u32.totalorder %s6481_s13, %s8373_s0  ;;  %p6204_p6 = scmp.lt.u32.totalorder %s6202_s22, %s6197_s17 }
  0x4d   : > { %p6200_p2 = pnand %p6199_p0, %p6198_p12  ;;  %p6206_p3 = scmp.lt.u32.totalorder %s6197_s17, %s6481_s13 }
  0x4e   : > { %p6205_p10 = por %p6204_p6, %p6203_p13 }
  0x4f   : > { %p6201_p1 = pneg %p6200_p2 }
  0x50   : > { %p6207_p7 = por %p6206_p3, %p6205_p10 }
  0x52   : > { %p6208_p9 = pnand %p6207_p7, %p6201_p1 }
  0x54   : > { %6211 = shalt.err (!%p6208_p9)
}
  0x55   : > { %s6212_s10 = scalar_lea.vmem %s6483_s15, 4096  ;;  %s6303_s20 = smov [#allocation6]  }
  0x56   : > { %p6213_p12 = scmp.ne.s32.totalorder %s6483_s15, %s6212_s10  ;;  %s6217_s21 = sshll.u32 %s6303_s20, 4  ;;  %s6218_s21 = int_to_ptr.vmem [resolvable:$false] %s6217_s21 }
  0x57   : > { %s6219_s14 = scalar_lea.vmem %s6218_s21, 8192  ;;  %p6220_p4 = scmp.lt.s32.totalorder %s6483_s15, %s6218_s21 }
  0x58   : > { %p6215_p2 = pnand %p6213_p12, %p6199_p0  ;;  %p6221_p13 = scmp.lt.s32.totalorder %s6219_s14, %s6212_s10 }
  0x5a   : > { %p6216_p5 = pneg %p6215_p2  ;;  %p6222_p6 = por %p6221_p13, %p6220_p4 }
  0x5c   : > { %p6223_p10 = pnand %p6222_p6, %p6216_p5 }
  0x5e   : > { %6226 = shalt.err (!%p6223_p10)
}
  0x5f   : > { %s6304_s17 = smov 128   ;;  %s6305_s18 = smov 8  }
  0x60   : > { %5942 = dma.hbm_to_vmem [thread:$0]  (!%p6485_p11), %s6481_s13, 4096, %s6483_s15, %s6489_s8, %s6304_s17, %s6304_s17, %s6305_s18  }
  0x61   : > { %257 = sbr.rel (%p6388_p8) target bundleno = 1212 (0x4bc), region = 44  ;;  %s6520_s9 = sand.u32 (!%p6388_p8), 1, %s6289_s24  }
  0x62   : > { %s4723_s22 = sshll.u32 (!%p6388_p8), %s6520_s9, 8  ;;  %s260_s12 = scalar_lea.sflag (!%p6388_p8), [#allocation7], %s6520_s9 }
  0x63   : > { %s6526_s11 = scalar_lea.vmem (!%p6388_p8), [#allocation6], %s4723_s22  ;;  %p8390_p4 = scmp.ne.s32.totalorder (!%p6388_p8), %s8383_s28, 0 }
  0x68   : > { %6272 = dma.done.wait (%p8390_p4), %s260_s12, 4096  }
  0x69   : > { %6274 = vsyncadd (%p8390_p4), %s260_s12, 4294963200  ;;  %p8391_p5 = scmp.eq.s32.totalorder %s6369_s5, 0 }
  0x6b   : > { %6276 = dma.done.wait (%p8391_p5), [#allocation10], 18432   ;;  %p8392_p8 = pmov %p8391_p5 }
  0x6c   : > { %v6306_v0 = vmov 0   ;;  %v5994_v1 = vld [vmem:[#allocation9 + $0x40] sm:$0xff]   ;;  %v5998_v5 = vld [vmem:[#allocation9 + $0x48] sm:$0xff]   ;;  %v6002_v9 = vld [vmem:[#allocation9 + $0x50] sm:$0xff]   ;;  %v408_v27 = vlaneseq  ;;  %vm477_vm0 = vsmask.f32 256 }
  0x6d   : > { %6278 = vsyncadd (%p8392_p8), [#allocation10], 4294948864  ;;  %302 = vst [vmem:[#allocation2] sm:$0xff] %v6306_v0  ;;  %875 = vmatprep.mubr.bf16.mxu0 %v6306_v0  ;;  %v5995_v2 = vld [vmem:[#allocation9] sm:$0xff]   ;;  %4880 = vmatprep.subr.bf16.mxu0 %v5994_v1  ;;  %v5999_v6 = vld [vmem:[#allocation9 + $0x8] sm:$0xff]   ;;  %vm476_vm2 = vcmask 1040384  }
  0x6e   : > { %v5996_v3 = vld [vmem:[#allocation9 + $0xc0] sm:$0xff]   ;;  %4881 = vmatpush3.bf16.msra.mxu0 %v5995_v2  ;;  %v6000_v7 = vld [vmem:[#allocation9 + $0xc8] sm:$0xff]   ;;  %v6003_v10 = vld [vmem:[#allocation9 + $0x10] sm:$0xff]   ;;  %v6538_v32 = vshrl.u32 %v408_v27, 7  ;;  %vm626_vm1 = vsmask.f32 7966 }
  0x6f   : > { %v5997_v4 = vld [vmem:[#allocation9 + $0x80] sm:$0xff]   ;;  %4992 = vmatprep.subr.bf16.mxu1 %v5996_v3  ;;  %4882 = vmatprep.subr.bf16.mxu0 %v5998_v5  ;;  %v6001_v8 = vld [vmem:[#allocation9 + $0x88] sm:$0xff]   ;;  %v6004_v11 = vld [vmem:[#allocation9 + $0xd0] sm:$0xff]   ;;  %vm625_vm5 = vcmask 1047559   ;;  %s301_s13 = sld [smem:[#allocation5]]  ;;  %s8226_s8 = scalar_lea.vmem [#allocation12], %s4723_s22 }
  0x70   : > { %4993 = vmatpush3.bf16.msra.mxu1 %v5997_v4  ;;  %v6005_v12 = vld [vmem:[#allocation9 + $0x90] sm:$0xff]   ;;  %v6006_v13 = vld [vmem:[#allocation9 + $0x58] sm:$0xff]   ;;  %v6010_v17 = vld [vmem:[#allocation9 + $0x60] sm:$0xff]   ;;  %vm410_vm3 = vcmp.lt.s32.totalorder %v6538_v32, 1  ;;  %vm559_vm4 = vcmp.lt.s32.totalorder %v6538_v32, 7  ;;  %s4879_s10 = sshll.u32 %s6369_s5, 12 }
  0x71   : > { %4994 = vmatprep.subr.bf16.mxu1 %v6000_v7  ;;  %v6007_v14 = vld [vmem:[#allocation9 + $0x18] sm:$0xff]   ;;  %v6011_v18 = vld [vmem:[#allocation9 + $0x20] sm:$0xff]   ;;  %v6014_v21 = vld [vmem:[#allocation9 + $0x68] sm:$0xff]   ;;  %s4622_s20 = sshll.u32 %s8226_s8, 4  ;;  %s8324_s17 = scalar_lea.hbm %s8379_s6, %s4879_s10  ;;  %s8326_s20 = int_to_ptr.vmem [resolvable:$true] %s4622_s20 }
  0x72   : > { %4883 = vmatpush3.bf16.msra.mxu0 %v5999_v6  ;;  %v6008_v15 = vld [vmem:[#allocation9 + $0xd8] sm:$0xff]   ;;  %v6012_v19 = vld [vmem:[#allocation9 + $0xe0] sm:$0xff]   ;;  %v6015_v22 = vld [vmem:[#allocation9 + $0x28] sm:$0xff]   ;;  %s4609_s5 = scalar_lea.sflag [#allocation8], %s6520_s9  ;;  %s6227_s18 = scalar_lea.vmem %s8326_s20, 4096 }
  0x73   : > { %4884 = vmatprep.subr.bf16.mxu0 %v6002_v9  ;;  %v6009_v16 = vld [vmem:[#allocation9 + $0x98] sm:$0xff]   ;;  %v6013_v20 = vld [vmem:[#allocation9 + $0xa0] sm:$0xff]   ;;  %v6016_v23 = vld [vmem:[#allocation9 + $0xe8] sm:$0xff]   ;;  %p6228_p11 = scmp.ne.s32.totalorder %s8326_s20, %s6227_s18  ;;  %p8397_p0 = scmp.ne.s32.totalorder %s8388_s27, 0 }
  0x74   : > { %4995 = vmatpush3.bf16.msra.mxu1 %v6001_v8  ;;  %v6017_v24 = vld [vmem:[#allocation9 + $0xa8] sm:$0xff]   ;;  %v6018_v25 = vld [vmem:[#allocation9 + $0x70] sm:$0xff]   ;;  %v6022_v30 = vld [vmem:[#allocation9 + $0x78] sm:$0xff]   ;;  %s6307_s22 = smov [#allocation12]  }
  0x75   : > { %4996 = vmatprep.subr.bf16.mxu1 %v6004_v11  ;;  %v6019_v26 = vld [vmem:[#allocation9 + $0x30] sm:$0xff]   ;;  %v6023_v31 = vld [vmem:[#allocation9 + $0x38] sm:$0xff]   ;;  %v6026_v35 = vld [vmem:[#allocation9 + $0x140] sm:$0xff]   ;;  %p6229_p1 = pnand %p6228_p11, %p8397_p0  ;;  %s6231_s12 = sshll.u32 %s6307_s22, 4  ;;  %s6232_s12 = int_to_ptr.vmem [resolvable:$false] %s6231_s12 }
  0x76   : > { %4885 = vmatpush3.bf16.msra.mxu0 %v6003_v10  ;;  %v6020_v28 = vld [vmem:[#allocation9 + $0xf0] sm:$0xff]   ;;  %v6024_v33 = vld [vmem:[#allocation9 + $0xf8] sm:$0xff]   ;;  %v311_v36 = vld [vmem:[%s6526_s11] sm:$0xff]  ;;  %p6234_p7 = scmp.lt.s32.totalorder %s8326_s20, %s6232_s12 }
  0x77   : > { %4886 = vmatprep.subr.bf16.mxu0 %v6006_v13  ;;  %v6021_v29 = vld [vmem:[#allocation9 + $0xb0] sm:$0xff]   ;;  %v6025_v34 = vld [vmem:[#allocation9 + $0xb8] sm:$0xff]   ;;  %v312_v37 = vld [vmem:[%s6526_s11 + $0x8] sm:$0xff]  ;;  %v376_v38 = vrot.slane %v311_v36, 7  ;;  %v527_v45 = vrot.slane %v311_v36, 1  ;;  %p6230_p3 = pneg %p6229_p1 }
  0x78   : > { %4997 = vmatpush3.bf16.msra.mxu1 %v6005_v12  ;;  %v392_v39 = vrot.slane %v312_v37, 7  ;;  %v6027_v40 = vld [vmem:[#allocation9 + $0x100] sm:$0xff]   ;;  %v6545_v41 = vpack.c.bf16 %v312_v37, %v311_v36  ;;  %v6548_v42 = vld [vmem:[%s6526_s11 + $0x10] sm:$0xff]  ;;  %v6551_v43 = vld [vmem:[%s6526_s11 + $0x18] sm:$0xff]  ;;  %v543_v46 = vrot.slane %v312_v37, 1 }
  0x79   : > { %4998 = vmatprep.subr.bf16.mxu1 %v6008_v15  ;;  %v377_v44 = vrot.slane %v6548_v42, 7  ;;  %v393_v49 = vrot.slane %v6551_v43, 7  ;;  %v6028_v50 = vld [vmem:[#allocation9 + $0x148] sm:$0xff]   ;;  %v6561_v51 = vld [vmem:[%s6526_s11 + $0x20] sm:$0xff]  ;;  %v6577_v62 = vld [vmem:[%s6526_s11 + $0x30] sm:$0xff]  ;;  %v528_v3 = vrot.slane %v6548_v42, 1 }
  0x7a   : > { %4887 = vmatpush3.bf16.msra.mxu0 %v6007_v14  ;;  %v411_v47 = vsel %vm410_vm3, %v376_v38, %v392_v39  ;;  %v427_v48 = vsel %vm410_vm3, %v392_v39, %v376_v38  ;;  %v560_v53 = vsel %vm559_vm4, %v527_v45, %v543_v46  ;;  %v576_v54 = vsel %vm559_vm4, %v543_v46, %v527_v45  ;;  %v6568_v55 = vld [vmem:[%s6526_s11 + $0x28] sm:$0xff]  ;;  %v6580_v63 = vld [vmem:[%s6526_s11 + $0x38] sm:$0xff]  ;;  %vm6584_vm6 = vmand %vm476_vm2, %vm477_vm0 }
  0x7b   : > { %4888 = vmatprep.subr.bf16.mxu0 %v6010_v17  ;;  %v443_v52 = vpack.c.bf16 %v411_v47, %v427_v48  ;;  %v378_v56 = vrot.slane %v6561_v51, 7  ;;  %v412_v57 = vsel %vm410_vm3, %v377_v44, %v393_v49  ;;  %v428_v58 = vsel %vm410_vm3, %v393_v49, %v377_v44  ;;  %v6029_v61 = vld [vmem:[#allocation9 + $0x108] sm:$0xff]   ;;  %v6030_v9 = vld [vmem:[#allocation9 + $0x150] sm:$0xff]   ;;  %v6597_v10 = vld [vmem:[%s6526_s11 + $0x40] sm:$0xff] }
  0x7c   : > { %4999 = vmatpush3.bf16.msra.mxu1 %v6009_v16  ;;  %v592_v59 = vpack.c.bf16 %v576_v54, %v560_v53  ;;  %v394_v60 = vrot.slane %v6568_v55, 7  ;;  %v444_v2 = vpack.c.bf16 %v412_v57, %v428_v58  ;;  %v544_v4 = vrot.slane %v6551_v43, 1  ;;  %v6600_v11 = vld [vmem:[%s6526_s11 + $0x48] sm:$0xff]  ;;  %v6031_v16 = vld [vmem:[#allocation9 + $0x110] sm:$0xff]   ;;  %vm6609_vm7 = vmand %vm625_vm5, %vm626_vm1 }
  0x7d   : > { %5000 = vmatprep.subr.bf16.mxu1 %v6012_v19  ;;  %460 = vst [vmem:[#allocation2 + $0x8] sm:$0xff] %v443_v52  ;;  %v379_v7 = vrot.slane %v6577_v62, 7  ;;  %v395_v8 = vrot.slane %v6580_v63, 7  ;;  %v529_v15 = vrot.slane %v6561_v51, 1  ;;  %v6637_v37 = vld [vmem:[%s6526_s11 + $0x60] sm:$0xff]  ;;  %v6640_v38 = vld [vmem:[%s6526_s11 + $0x68] sm:$0xff] }
  0x7e   : > { %4889 = vmatpush3.bf16.msra.mxu0 %v6011_v18  ;;  %609 = vst [vmem:[#allocation4 + $0x8] sm:$0xff] %v592_v59  ;;  %v413_v5 = vsel %vm410_vm3, %v378_v56, %v394_v60  ;;  %v429_v6 = vsel %vm410_vm3, %v394_v60, %v378_v56  ;;  %461 = vst [vmem:[#allocation2 + $0x10] sm:$0xff] %v444_v2  ;;  %v561_v13 = vsel %vm559_vm4, %v528_v3, %v544_v4  ;;  %v6034_v47 = vld [vmem:[#allocation9 + $0x160] sm:$0xff]   ;;  %v6656_v59 = vld [vmem:[%s6526_s11 + $0x70] sm:$0xff] }
  0x7f   : > { %4890 = vmatprep.subr.bf16.mxu0 %v6014_v21  ;;  %v445_v12 = vpack.c.bf16 %v413_v5, %v429_v6  ;;  %v577_v14 = vsel %vm559_vm4, %v544_v4, %v528_v3  ;;  %v414_v19 = vsel %vm410_vm3, %v379_v7, %v395_v8  ;;  %v545_v21 = vrot.slane %v6568_v55, 1  ;;  %v6659_v60 = vld [vmem:[%s6526_s11 + $0x78] sm:$0xff] }
  0x80   : > { %5001 = vmatpush3.bf16.msra.mxu1 %v6013_v20  ;;  %v593_v18 = vpack.c.bf16 %v577_v14, %v561_v13  ;;  %v430_v20 = vsel %vm410_vm3, %v395_v8, %v379_v7  ;;  %v531_v53 = vrot.slane %v6597_v10, 1  ;;  %v547_v57 = vrot.slane %v6600_v11, 1 }
  0x81   : > { %5002 = vmatprep.subr.bf16.mxu1 %v6016_v23  ;;  %462 = vst [vmem:[#allocation2 + $0x18] sm:$0xff] %v445_v12  ;;  %v380_v23 = vrot.slane %v6597_v10, 7  ;;  %v562_v27 = vsel %vm559_vm4, %v529_v15, %v545_v21  ;;  %v382_v58 = vrot.slane %v6637_v37, 7  ;;  %v398_v4 = vrot.slane %v6640_v38, 7  ;;  %v6035_v12 = vld [vmem:[#allocation9 + $0x120] sm:$0xff]  }
  0x82   : > { %4891 = vmatpush3.bf16.msra.mxu0 %v6015_v22  ;;  %v446_v22 = vpack.c.bf16 %v414_v19, %v430_v20  ;;  %610 = vst [vmem:[#allocation4 + $0x10] sm:$0xff] %v593_v18  ;;  %v564_v7 = vsel %vm559_vm4, %v531_v53, %v547_v57  ;;  %v580_v8 = vsel %vm559_vm4, %v547_v57, %v531_v53 }
  0x83   : > { %4892 = vmatprep.subr.bf16.mxu0 %v6018_v25  ;;  %v6621_v25 = vld [vmem:[%s6526_s11 + $0x50] sm:$0xff]  ;;  %v433_v18 = vsel %vm410_vm3, %v398_v4, %v382_v58  ;;  %v6681_v19 = vpack.c.bf16 %v6551_v43, %v6548_v42  ;;  %v383_v42 = vrot.slane %v6656_v59, 7  ;;  %v399_v43 = vrot.slane %v6659_v60, 7 }
  0x84   : > { %5003 = vmatpush3.bf16.msra.mxu1 %v6017_v24  ;;  %v396_v24 = vrot.slane %v6600_v11, 7  ;;  %463 = vst [vmem:[#allocation2 + $0x20] sm:$0xff] %v446_v22  ;;  %v479_v39 = vld [vmem:[#allocation2 + $0x8] sm:$0x1]  ;;  %v381_v46 = vrot.slane %v6621_v25, 7 }
  0x85   : > { %5004 = vmatprep.subr.bf16.mxu1 %v6020_v28  ;;  %v578_v28 = vsel %vm559_vm4, %v545_v21, %v529_v15  ;;  %v480_v48 = vsel %vm6584_vm6, 0, %v479_v39  ;;  %v628_v49 = vld [vmem:[#allocation4 + $0x8] sm:$0x80]  ;;  %v482_v54 = vld [vmem:[#allocation2 + $0x10] sm:$0x1]  ;;  %v596_v15 = vpack.c.bf16 %v580_v8, %v564_v7 }
  0x86   : > { %4893 = vmatpush3.bf16.msra.mxu0 %v6019_v26  ;;  %v6032_v26 = vld [vmem:[#allocation9 + $0x158] sm:$0xff]   ;;  %v431_v36 = vsel %vm410_vm3, %v396_v24, %v380_v23  ;;  %481 = vst [vmem:[#allocation2 + $0x8] sm:$0x1] %v480_v48  ;;  %v629_v56 = vsel %vm6609_vm7, 0, %v628_v49 }
  0x87   : > { %4894 = vmatprep.subr.bf16.mxu0 %v6022_v30  ;;  %v546_v30 = vrot.slane %v6580_v63, 1  ;;  %630 = vst [vmem:[#allocation4 + $0x8] sm:$0x80] %v629_v56  ;;  %613 = vst [vmem:[#allocation4 + $0x28] sm:$0xff] %v596_v15 }
  0x88   : > { %5005 = vmatpush3.bf16.msra.mxu1 %v6021_v29  ;;  %v530_v29 = vrot.slane %v6577_v62, 1  ;;  %v485_v5 = vld [vmem:[#allocation2 + $0x18] sm:$0x1] }
  0x89   : > { %5006 = vmatprep.subr.bf16.mxu1 %v6024_v33  ;;  %v6033_v33 = vld [vmem:[#allocation9 + $0x118] sm:$0xff]   ;;  %v486_v13 = vsel %vm6584_vm6, 0, %v485_v5  ;;  %v631_v14 = vld [vmem:[#allocation4 + $0x10] sm:$0x80] }
  0x8a   : > { %4895 = vmatpush3.bf16.msra.mxu0 %v6023_v31  ;;  %v6630_v31 = vld [vmem:[%s6526_s11 + $0x58] sm:$0xff]  ;;  %v563_v44 = vsel %vm559_vm4, %v530_v29, %v546_v30  ;;  %v579_v45 = vsel %vm559_vm4, %v546_v30, %v530_v29  ;;  %487 = vst [vmem:[#allocation2 + $0x18] sm:$0x1] %v486_v13  ;;  %v632_v20 = vsel %vm6609_vm7, 0, %v631_v14  ;;  %v6038_v13 = vld [vmem:[#allocation9 + $0x170] sm:$0xff]  }
  0x8b   : > { %5104 = vmatprep.subr.bf16.mxu0 %v6026_v35  ;;  %v415_v35 = vsel %vm410_vm3, %v380_v23, %v396_v24  ;;  %v397_v52 = vrot.slane %v6630_v31, 7  ;;  %v488_v21 = vld [vmem:[#allocation2 + $0x20] sm:$0x1]  ;;  %v548_v23 = vrot.slane %v6630_v31, 1  ;;  %633 = vst [vmem:[#allocation4 + $0x10] sm:$0x80] %v632_v20 }
  0x8c   : > { %5007 = vmatpush3.bf16.msra.mxu1 %v6025_v34  ;;  %v594_v34 = vpack.c.bf16 %v578_v28, %v562_v27  ;;  %v6687_v24 = vld [vmem:[%s6526_s11 + $0x80] sm:$0xff]  ;;  %v533_v27 = vrot.slane %v6637_v37, 1 }
  0x8d   : > { %876 = vmatmul.mubr.bf16.vlgmr.msra.gmra.mrb[0].mxu0 %v6306_v0  ;;  %v416_v2 = vsel %vm410_vm3, %v381_v46, %v397_v52  ;;  %v432_v3 = vsel %vm410_vm3, %v397_v52, %v381_v46  ;;  %v434_v46 = vsel %vm410_vm3, %v399_v43, %v383_v42 }
  0x8e   : > { %5105 = vmatpush3.bf16.msra.mxu0 %v6027_v40  ;;  %883 = vmatprep.mubr.bf16.mxu0 %v6545_v41  ;;  %v447_v40 = vpack.c.bf16 %v415_v35, %v431_v36  ;;  %611 = vst [vmem:[#allocation4 + $0x18] sm:$0xff] %v594_v34  ;;  %v448_v6 = vpack.c.bf16 %v416_v2, %v432_v3  ;;  %v6700_v34 = vld [vmem:[%s6526_s11 + $0x88] sm:$0xff]  ;;  %v640_v15 = vld [vmem:[#allocation4 + $0x28] sm:$0x80] }
  0x8f   : > { %5106 = vmatprep.subr.bf16.mxu0 %v6028_v50  ;;  %v595_v50 = vpack.c.bf16 %v579_v45, %v563_v44  ;;  %v6036_v35 = vld [vmem:[#allocation9 + $0x168] sm:$0xff]   ;;  %v418_v45 = vsel %vm410_vm3, %v383_v42, %v399_v43  ;;  %v400_v2 = vrot.slane %v6700_v34, 7  ;;  %v6728_v3 = vpack.c.bf16 %v6568_v55, %v6561_v51 }
  0x90   : > { %464 = vst [vmem:[#allocation2 + $0x28] sm:$0xff] %v447_v40  ;;  %465 = vst [vmem:[#allocation2 + $0x30] sm:$0xff] %v448_v6  ;;  %v1052_v36 = vld [vmem:[#allocation2 + $0x8] sm:$0xff] }
  0x91   : > { %612 = vst [vmem:[#allocation4 + $0x20] sm:$0xff] %v595_v50  ;;  %1228 = vmatprep.mubr.bf16.mxu1 %v1052_v36  ;;  %v450_v50 = vpack.c.bf16 %v418_v45, %v434_v46  ;;  %v6037_v6 = vld [vmem:[#allocation9 + $0x128] sm:$0xff]   ;;  %v6039_v45 = vld [vmem:[#allocation9 + $0x130] sm:$0xff]  }
  0x92   : > { %5107 = vmatpush3.bf16.msra.mxu0 %v6029_v61  ;;  %v483_v61 = vsel %vm6584_vm6, 0, %v482_v54  ;;  %v6718_v54 = vld [vmem:[%s6526_s11 + $0x98] sm:$0xff]  ;;  %1229 = vmatmul.mubr.bf16.vlgmr.msra.gmra.mrb[0].mxu1 %v6306_v0  ;;  %v534_v0 = vrot.slane %v6656_v59, 1 }
  0x93   : > { %5108 = vmatprep.subr.bf16.mxu0 %v6030_v9  ;;  %484 = vst [vmem:[#allocation2 + $0x10] sm:$0x1] %v483_v61  ;;  %v532_v9 = vrot.slane %v6621_v25, 1  ;;  %v384_v61 = vrot.slane %v6687_v24, 7  ;;  %467 = vst [vmem:[#allocation2 + $0x40] sm:$0xff] %v450_v50  ;;  %v401_v55 = vrot.slane %v6718_v54, 7 }
  0x95   : > { %v634_v28 = vld [vmem:[#allocation4 + $0x18] sm:$0x80]  ;;  %v565_v29 = vsel %vm559_vm4, %v532_v9, %v548_v23  ;;  %v581_v30 = vsel %vm559_vm4, %v548_v23, %v532_v9  ;;  %884 = vmatmul.mubr.bf16.gmra.mrb[4].mxu0 %v1052_v36  ;;  %v419_v8 = vsel %vm410_vm3, %v384_v61, %v400_v2  ;;  %v435_v51 = vsel %vm410_vm3, %v400_v2, %v384_v61  ;;  %v6770_v36 = vld [vmem:[%s6526_s11 + $0xb8] sm:$0xff] }
  0x96   : > { %5109 = vmatpush3.bf16.msra.mxu0 %v6031_v16  ;;  %v417_v16 = vsel %vm410_vm3, %v382_v58, %v398_v4  ;;  %v635_v39 = vsel %vm6609_vm7, 0, %v634_v28  ;;  %v597_v44 = vpack.c.bf16 %v581_v30, %v565_v29  ;;  %891 = vmatprep.mubr.bf16.mxu0 %v6681_v19  ;;  %v550_v4 = vrot.slane %v6659_v60, 1  ;;  %v6760_v28 = vld [vmem:[#allocation4 + $0x8] sm:$0xff] }
  0x97   : > { %5110 = vmatprep.subr.bf16.mxu0 %v6032_v26  ;;  %v449_v22 = vpack.c.bf16 %v417_v16, %v433_v18  ;;  %v489_v26 = vsel %vm6584_vm6, 0, %v488_v21  ;;  %v491_v40 = vld [vmem:[#allocation2 + $0x28] sm:$0x1]  ;;  %636 = vst [vmem:[#allocation4 + $0x18] sm:$0x80] %v635_v39  ;;  %v535_v9 = vrot.slane %v6687_v24, 1  ;;  %v451_v16 = vpack.c.bf16 %v419_v8, %v435_v51 }
  0x98   : > { %490 = vst [vmem:[#allocation2 + $0x20] sm:$0x1] %v489_v26  ;;  %v492_v48 = vsel %vm6584_vm6, 0, %v491_v40  ;;  %v637_v49 = vld [vmem:[#allocation4 + $0x20] sm:$0x80]  ;;  %614 = vst [vmem:[#allocation4 + $0x30] sm:$0xff] %v597_v44  ;;  %v567_v18 = vsel %vm559_vm4, %v534_v0, %v550_v4  ;;  %v583_v20 = vsel %vm559_vm4, %v550_v4, %v534_v0  ;;  %v6764_v29 = vpack.c.bf16 %v6580_v63, %v6577_v62 }
  0x99   : > { %466 = vst [vmem:[#allocation2 + $0x38] sm:$0xff] %v449_v22  ;;  %493 = vst [vmem:[#allocation2 + $0x28] sm:$0x1] %v492_v48  ;;  %v638_v57 = vsel %vm6609_vm7, 0, %v637_v49  ;;  %v494_v7 = vld [vmem:[#allocation2 + $0x30] sm:$0x1]  ;;  %v599_v26 = vpack.c.bf16 %v583_v20, %v567_v18 }
  0x9a   : > { %5111 = vmatpush3.bf16.msra.mxu0 %v6033_v33  ;;  %v549_v33 = vrot.slane %v6640_v38, 1  ;;  %v1053_v56 = vld [vmem:[#allocation2 + $0x10] sm:$0xff]  ;;  %639 = vst [vmem:[#allocation4 + $0x20] sm:$0x80] %v638_v57  ;;  %v495_v14 = vsel %vm6584_vm6, 0, %v494_v7  ;;  %v6749_v21 = vld [vmem:[%s6526_s11 + $0xa8] sm:$0xff] }
  0x9b   : > { %5112 = vmatprep.subr.bf16.mxu0 %v6034_v47  ;;  %v6709_v47 = vld [vmem:[%s6526_s11 + $0x90] sm:$0xff]  ;;  %1236 = vmatprep.mubr.bf16.mxu1 %v1053_v56  ;;  %496 = vst [vmem:[#allocation2 + $0x30] sm:$0x1] %v495_v14  ;;  %v641_v22 = vsel %vm6609_vm7, 0, %v640_v15  ;;  %468 = vst [vmem:[#allocation2 + $0x48] sm:$0xff] %v451_v16  ;;  %v6772_v39 = vld [vmem:[#allocation2 + $0x18] sm:$0xff] }
  0x9c   : > { %v566_v52 = vsel %vm559_vm4, %v533_v27, %v549_v33  ;;  %v582_v53 = vsel %vm559_vm4, %v549_v33, %v533_v27  ;;  %v385_v5 = vrot.slane %v6709_v47, 7  ;;  %v6758_v27 = vld [vmem:[%s6526_s11 + $0xb0] sm:$0xff]  ;;  %642 = vst [vmem:[#allocation4 + $0x28] sm:$0x80] %v641_v22  ;;  %616 = vst [vmem:[#allocation4 + $0x40] sm:$0xff] %v599_v26  ;;  %v402_v62 = vrot.slane %v6749_v21, 7  ;;  %1237 = vmatmul.mubr.bf16.gmra.mrb[4].mxu1 %v6760_v28 }
  0x9d   : > { %v598_v58 = vpack.c.bf16 %v582_v53, %v566_v52  ;;  %v536_v63 = vrot.slane %v6709_v47, 1  ;;  %v552_v44 = vrot.slane %v6718_v54, 1  ;;  %892 = vmatmul.mubr.bf16.gmra.mrb[8].mxu0 %v1053_v56  ;;  %v387_v52 = vrot.slane %v6758_v27, 7  ;;  %v6788_v53 = vld [vmem:[%s6526_s11 + $0xc0] sm:$0xff]  ;;  %v6799_v0 = vld [vmem:[%s6526_s11 + $0xc8] sm:$0xff]  ;;  %1244 = vmatprep.mubr.bf16.mxu1 %v6772_v39 }
  0x9e   : > { %5113 = vmatpush3.bf16.msra.mxu0 %v6035_v12  ;;  %v6740_v12 = vld [vmem:[%s6526_s11 + $0xa0] sm:$0xff]  ;;  %v420_v42 = vsel %vm410_vm3, %v385_v5, %v401_v55  ;;  %v436_v43 = vsel %vm410_vm3, %v401_v55, %v385_v5  ;;  %899 = vmatprep.mubr.bf16.mxu0 %v6728_v3  ;;  %v553_v16 = vrot.slane %v6749_v21, 1  ;;  %v6815_v18 = vpack.c.bf16 %v6770_v36, %v6758_v27 }
  0x9f   : > { %5114 = vmatprep.subr.bf16.mxu0 %v6036_v35  ;;  %615 = vst [vmem:[#allocation4 + $0x38] sm:$0xff] %v598_v58  ;;  %v452_v33 = vpack.c.bf16 %v420_v42, %v436_v43  ;;  %v551_v35 = vrot.slane %v6700_v34, 1  ;;  %v386_v40 = vrot.slane %v6740_v12, 7  ;;  %v643_v46 = vld [vmem:[#allocation4 + $0x30] sm:$0x80]  ;;  %v6784_v50 = vpack.c.bf16 %v6749_v21, %v6740_v12 }
  0xa0   : > { %v497_v23 = vld [vmem:[#allocation2 + $0x38] sm:$0x1]  ;;  %v644_v56 = vsel %vm6609_vm7, 0, %v643_v46  ;;  %v500_v57 = vld [vmem:[#allocation2 + $0x40] sm:$0x1]  ;;  %v569_v7 = vsel %vm559_vm4, %v536_v63, %v552_v44  ;;  %v585_v8 = vsel %vm559_vm4, %v552_v44, %v536_v63  ;;  %v537_v14 = vrot.slane %v6740_v12, 1 }
  0xa1   : > { %v498_v30 = vsel %vm6584_vm6, 0, %v497_v23  ;;  %469 = vst [vmem:[#allocation2 + $0x50] sm:$0xff] %v452_v33  ;;  %v568_v48 = vsel %vm559_vm4, %v535_v9, %v551_v35  ;;  %v584_v49 = vsel %vm559_vm4, %v551_v35, %v535_v9  ;;  %v421_v61 = vsel %vm410_vm3, %v386_v40, %v402_v62  ;;  %645 = vst [vmem:[#allocation4 + $0x30] sm:$0x80] %v644_v56  ;;  %v6040_v51 = vld [vmem:[#allocation9 + $0x1c0] sm:$0xff]  }
  0xa2   : > { %5115 = vmatpush3.bf16.msra.mxu0 %v6037_v6  ;;  %499 = vst [vmem:[#allocation2 + $0x38] sm:$0x1] %v498_v30  ;;  %v600_v58 = vpack.c.bf16 %v584_v49, %v568_v48  ;;  %v437_v2 = vsel %vm410_vm3, %v402_v62, %v386_v40  ;;  %v501_v4 = vsel %vm6584_vm6, 0, %v500_v57  ;;  %v601_v9 = vpack.c.bf16 %v585_v8, %v569_v7  ;;  %v6041_v15 = vld [vmem:[#allocation9 + $0x180] sm:$0xff]   ;;  %v503_v26 = vld [vmem:[#allocation2 + $0x48] sm:$0x1] }
  0xa3   : > { %5116 = vmatprep.subr.bf16.mxu0 %v6038_v13  ;;  %v453_v6 = vpack.c.bf16 %v421_v61, %v437_v2  ;;  %502 = vst [vmem:[#allocation2 + $0x40] sm:$0x1] %v501_v4  ;;  %v403_v13 = vrot.slane %v6770_v36, 7  ;;  %v388_v20 = vrot.slane %v6788_v53, 7  ;;  %v404_v22 = vrot.slane %v6799_v0, 7  ;;  %5216 = vmatprep.subr.bf16.mxu1 %v6040_v51  ;;  %v6819_v23 = vld [vmem:[#allocation4 + $0x10] sm:$0xff] }
  0xa4   : > { %617 = vst [vmem:[#allocation4 + $0x48] sm:$0xff] %v600_v58  ;;  %618 = vst [vmem:[#allocation4 + $0x50] sm:$0xff] %v601_v9  ;;  %v538_v21 = vrot.slane %v6758_v27, 1  ;;  %v554_v43 = vrot.slane %v6770_v36, 1  ;;  %5217 = vmatpush3.bf16.msra.mxu1 %v6041_v15  ;;  %v6042_v30 = vld [vmem:[#allocation9 + $0x1c8] sm:$0xff]   ;;  %v6827_v33 = vld [vmem:[#allocation2 + $0x20] sm:$0xff]  ;;  %v570_v63 = vsel %vm559_vm4, %v537_v14, %v553_v16  ;;  %v586_v44 = vsel %vm559_vm4, %v553_v16, %v537_v14 }
  0xa5   : > { %470 = vst [vmem:[#allocation2 + $0x58] sm:$0xff] %v453_v6  ;;  %v422_v12 = vsel %vm410_vm3, %v387_v52, %v403_v13  ;;  %v438_v42 = vsel %vm410_vm3, %v403_v13, %v387_v52  ;;  %v504_v35 = vsel %vm6584_vm6, 0, %v503_v26  ;;  %v649_v40 = vld [vmem:[#allocation4 + $0x40] sm:$0x80]  ;;  %v423_v46 = vsel %vm410_vm3, %v388_v20, %v404_v22  ;;  %5218 = vmatprep.subr.bf16.mxu1 %v6042_v30  ;;  %v6043_v49 = vld [vmem:[#allocation9 + $0x188] sm:$0xff]   ;;  %v6046_v30 = vld [vmem:[#allocation9 + $0x1d8] sm:$0xff]  }
  0xa6   : > { %v646_v5 = vld [vmem:[#allocation4 + $0x38] sm:$0x80]  ;;  %5117 = vmatpush3.bf16.msra.mxu0 %v6039_v45  ;;  %v454_v62 = vpack.c.bf16 %v422_v12, %v438_v42  ;;  %505 = vst [vmem:[#allocation2 + $0x48] sm:$0x1] %v504_v35  ;;  %v650_v27 = vsel %vm6609_vm7, 0, %v649_v40  ;;  %v602_v45 = vpack.c.bf16 %v586_v44, %v570_v63  ;;  %v439_v48 = vsel %vm410_vm3, %v404_v22, %v388_v20  ;;  %v337_v61 = vld [vmem:[%s6526_s11 + $0xd0] sm:$0xff] }
  0xa7   : > { %v647_v55 = vsel %vm6609_vm7, 0, %v646_v5  ;;  %900 = vmatmul.mubr.bf16.gmra.mrb[12].mxu0 %v6772_v39  ;;  %651 = vst [vmem:[#allocation4 + $0x40] sm:$0x80] %v650_v27  ;;  %v455_v56 = vpack.c.bf16 %v423_v46, %v439_v48  ;;  %v571_v57 = vsel %vm559_vm4, %v538_v21, %v554_v43  ;;  %v587_v58 = vsel %vm559_vm4, %v554_v43, %v538_v21  ;;  %v338_v5 = vld [vmem:[%s6526_s11 + $0xd8] sm:$0xff]  ;;  %v6044_v9 = vld [vmem:[#allocation9 + $0x1d0] sm:$0xff]   ;;  %v6879_v35 = vld [vmem:[#allocation4 + $0x18] sm:$0xff] }
  0xa8   : > { %648 = vst [vmem:[#allocation4 + $0x38] sm:$0x80] %v647_v55  ;;  %v506_v36 = vld [vmem:[#allocation2 + $0x50] sm:$0x1]  ;;  %471 = vst [vmem:[#allocation2 + $0x60] sm:$0xff] %v454_v62  ;;  %1245 = vmatmul.mubr.bf16.gmra.mrb[8].mxu1 %v6819_v23  ;;  %907 = vmatprep.mubr.bf16.mxu0 %v6764_v29  ;;  %v603_v2 = vpack.c.bf16 %v587_v58, %v571_v57  ;;  %v6853_v4 = vpack.c.bf16 %v6799_v0, %v6788_v53  ;;  %v389_v6 = vrot.slane %v337_v61, 7 }
  0xa9   : > { %v507_v52 = vsel %vm6584_vm6, 0, %v506_v36  ;;  %619 = vst [vmem:[#allocation4 + $0x58] sm:$0xff] %v602_v45  ;;  %v539_v7 = vrot.slane %v6788_v53, 1  ;;  %1252 = vmatprep.mubr.bf16.mxu1 %v6827_v33  ;;  %472 = vst [vmem:[#allocation2 + $0x68] sm:$0xff] %v455_v56  ;;  %5219 = vmatpush3.bf16.msra.mxu1 %v6043_v49  ;;  %v405_v51 = vrot.slane %v338_v5, 7  ;;  %v555_v55 = vrot.slane %v6799_v0, 1 }
  0xaa   : > { %508 = vst [vmem:[#allocation2 + $0x50] sm:$0x1] %v507_v52  ;;  %v6859_v13 = vpack.c.bf16 %v338_v5, %v337_v61  ;;  %620 = vst [vmem:[#allocation4 + $0x60] sm:$0xff] %v603_v2  ;;  %5220 = vmatprep.subr.bf16.mxu1 %v6044_v9  ;;  %v6045_v26 = vld [vmem:[#allocation9 + $0x190] sm:$0xff]   ;;  %v6873_v12 = vpack.c.bf16 %v6600_v11, %v6597_v10  ;;  %v540_v62 = vrot.slane %v337_v61, 1  ;;  %v6881_v63 = vld [vmem:[#allocation2 + $0x28] sm:$0xff] }
  0xab   : > { %v652_v8 = vld [vmem:[#allocation4 + $0x48] sm:$0x80]  ;;  %v655_v16 = vld [vmem:[#allocation4 + $0x50] sm:$0x80]  ;;  %v424_v20 = vsel %vm410_vm3, %v389_v6, %v405_v51  ;;  %v440_v22 = vsel %vm410_vm3, %v405_v51, %v389_v6  ;;  %v572_v0 = vsel %vm559_vm4, %v539_v7, %v555_v55  ;;  %v588_v43 = vsel %vm559_vm4, %v555_v55, %v539_v7  ;;  %v6901_v7 = vld [vmem:[#allocation4 + $0x20] sm:$0xff] }
  0xac   : > { %v653_v14 = vsel %vm6609_vm7, 0, %v652_v8  ;;  %v509_v15 = vld [vmem:[#allocation2 + $0x58] sm:$0x1]  ;;  %v656_v42 = vsel %vm6609_vm7, 0, %v655_v16  ;;  %v456_v21 = vpack.c.bf16 %v424_v20, %v440_v22  ;;  %v604_v40 = vpack.c.bf16 %v588_v43, %v572_v0  ;;  %v339_v58 = vld [vmem:[%s6526_s11 + $0xe0] sm:$0xff] }
  0xad   : > { %654 = vst [vmem:[#allocation4 + $0x48] sm:$0x80] %v653_v14  ;;  %v510_v53 = vsel %vm6584_vm6, 0, %v509_v15  ;;  %657 = vst [vmem:[#allocation4 + $0x50] sm:$0x80] %v656_v42  ;;  %5221 = vmatpush3.bf16.msra.mxu1 %v6045_v26  ;;  %v556_v10 = vrot.slane %v338_v5, 1  ;;  %v6909_v15 = vpack.c.bf16 %v6630_v31, %v6621_v25 }
  0xae   : > { %511 = vst [vmem:[#allocation2 + $0x58] sm:$0x1] %v510_v53  ;;  %473 = vst [vmem:[#allocation2 + $0x70] sm:$0xff] %v456_v21  ;;  %5222 = vmatprep.subr.bf16.mxu1 %v6046_v30  ;;  %v6047_v36 = vld [vmem:[#allocation9 + $0x198] sm:$0xff]   ;;  %v340_v5 = vld [vmem:[%s6526_s11 + $0xe8] sm:$0xff]  ;;  %v390_v6 = vrot.slane %v339_v58, 7 }
  0xaf   : > { %v512_v44 = vld [vmem:[#allocation2 + $0x60] sm:$0x1]  ;;  %908 = vmatmul.mubr.bf16.gmra.mrb[16].mxu0 %v6827_v33  ;;  %621 = vst [vmem:[#allocation4 + $0x68] sm:$0xff] %v604_v40  ;;  %v6048_v48 = vld [vmem:[#allocation9 + $0x178] sm:$0xff]   ;;  %v573_v49 = vsel %vm559_vm4, %v540_v62, %v556_v10  ;;  %v589_v52 = vsel %vm559_vm4, %v556_v10, %v540_v62  ;;  %v406_v8 = vrot.slane %v340_v5, 7  ;;  %v6903_v55 = vpack.c.bf16 %v340_v5, %v339_v58  ;;  %v6905_v14 = vld [vmem:[#allocation2 + $0x30] sm:$0xff] }
  0xb0   : > { %v513_v11 = vsel %vm6584_vm6, 0, %v512_v44  ;;  %v658_v27 = vld [vmem:[#allocation4 + $0x58] sm:$0x80]  ;;  %1253 = vmatmul.mubr.bf16.gmra.mrb[12].mxu1 %v6879_v35  ;;  %915 = vmatprep.mubr.bf16.mxu0 %v6873_v12  ;;  %v515_v46 = vld [vmem:[#allocation2 + $0x68] sm:$0x1]  ;;  %v605_v61 = vpack.c.bf16 %v589_v52, %v573_v49  ;;  %v6049_v51 = vld [vmem:[#allocation9 + $0x138] sm:$0xff]   ;;  %v6940_v49 = vpack.c.bf16 %v6640_v38, %v6637_v37 }
  0xb1   : > { %514 = vst [vmem:[#allocation2 + $0x60] sm:$0x1] %v513_v11  ;;  %v659_v45 = vsel %vm6609_vm7, 0, %v658_v27  ;;  %1260 = vmatprep.mubr.bf16.mxu1 %v6881_v63  ;;  %v516_v56 = vsel %vm6584_vm6, 0, %v515_v46  ;;  %v661_v57 = vld [vmem:[#allocation4 + $0x60] sm:$0x80]  ;;  %5223 = vmatpush3.bf16.msra.mxu1 %v6047_v36  ;;  %v425_v20 = vsel %vm410_vm3, %v390_v6, %v406_v8  ;;  %v441_v22 = vsel %vm410_vm3, %v406_v8, %v390_v6 }
  0xb2   : > { %660 = vst [vmem:[#allocation4 + $0x58] sm:$0x80] %v659_v45  ;;  %517 = vst [vmem:[#allocation2 + $0x68] sm:$0x1] %v516_v56  ;;  %v662_v2 = vsel %vm6609_vm7, 0, %v661_v57  ;;  %5118 = vmatprep.subr.bf16.mxu0 %v6048_v48  ;;  %v541_v9 = vrot.slane %v339_v58, 1  ;;  %v457_v21 = vpack.c.bf16 %v425_v20, %v441_v22 }
  0xb3   : > { %663 = vst [vmem:[#allocation4 + $0x60] sm:$0x80] %v662_v2  ;;  %622 = vst [vmem:[#allocation4 + $0x70] sm:$0xff] %v605_v61  ;;  %v557_v53 = vrot.slane %v340_v5, 1  ;;  %5119 = vmatpush3.bf16.msra.mxu0 %v6049_v51  ;;  %v6050_v0 = vld [vmem:[#allocation9 + $0x1e0] sm:$0xff]   ;;  %v6052_v62 = vld [vmem:[#allocation9 + $0x1e8] sm:$0xff]  }
  0xb4   : > { %v6051_v43 = vld [vmem:[#allocation9 + $0x1a0] sm:$0xff]   ;;  %5224 = vmatprep.subr.bf16.mxu1 %v6050_v0  ;;  %474 = vst [vmem:[#allocation2 + $0x78] sm:$0xff] %v457_v21  ;;  %v6053_v44 = vld [vmem:[#allocation9 + $0x1a8] sm:$0xff]   ;;  %v6928_v11 = vld [vmem:[%s6526_s11 + $0xf0] sm:$0xff] }
  0xb5   : > { %v518_v16 = vld [vmem:[#allocation2 + $0x70] sm:$0x1]  ;;  %v574_v25 = vsel %vm559_vm4, %v541_v9, %v557_v53  ;;  %v590_v31 = vsel %vm559_vm4, %v557_v53, %v541_v9  ;;  %5225 = vmatpush3.bf16.msra.mxu1 %v6051_v43  ;;  %v6930_v27 = vld [vmem:[#allocation4 + $0x28] sm:$0xff]  ;;  %v391_v46 = vrot.slane %v6928_v11, 7  ;;  %v6957_v9 = vld [vmem:[#allocation9 + $0x200] sm:$0xff]   ;;  %v6992_v43 = vpack.c.bf16 %v6718_v54, %v6709_v47 }
  0xb6   : > { %v519_v26 = vsel %vm6584_vm6, 0, %v518_v16  ;;  %v664_v42 = vld [vmem:[#allocation4 + $0x68] sm:$0x80]  ;;  %v606_v40 = vpack.c.bf16 %v590_v31, %v574_v25  ;;  %5226 = vmatprep.subr.bf16.mxu1 %v6052_v62  ;;  %v6054_v48 = vld [vmem:[#allocation9 + $0x1f0] sm:$0xff]   ;;  %5824 = vmatprep.subr.bf16.mxu0 %v6957_v9  ;;  %v6960_v53 = vld [vmem:[#allocation4 + $0x30] sm:$0xff]  ;;  %v6964_v16 = vpack.c.bf16 %v6659_v60, %v6656_v59  ;;  %v6980_v60 = vpack.c.bf16 %v6700_v34, %v6687_v24 }
  0xb7   : > { %916 = vmatmul.mubr.bf16.gmra.mrb[20].mxu0 %v6881_v63  ;;  %520 = vst [vmem:[#allocation2 + $0x70] sm:$0x1] %v519_v26  ;;  %v665_v30 = vsel %vm6609_vm7, 0, %v664_v42  ;;  %v6935_v45 = vld [vmem:[%s6526_s11 + $0xf8] sm:$0xff]  ;;  %v6055_v56 = vld [vmem:[#allocation9 + $0x1b0] sm:$0xff]   ;;  %v6966_v20 = vld [vmem:[#allocation2 + $0x40] sm:$0xff] }
  0xb8   : > { %1261 = vmatmul.mubr.bf16.gmra.mrb[16].mxu1 %v6901_v7  ;;  %923 = vmatprep.mubr.bf16.mxu0 %v6909_v15  ;;  %666 = vst [vmem:[#allocation4 + $0x68] sm:$0x80] %v665_v30  ;;  %623 = vst [vmem:[#allocation4 + $0x78] sm:$0xff] %v606_v40  ;;  %v407_v52 = vrot.slane %v6935_v45, 7  ;;  %v6943_v57 = vld [vmem:[#allocation2 + $0x38] sm:$0xff]  ;;  %v6974_v26 = vld [vmem:[#allocation4 + $0x38] sm:$0xff] }
  0xb9   : > { %1268 = vmatprep.mubr.bf16.mxu1 %v6905_v14  ;;  %5227 = vmatpush3.bf16.msra.mxu1 %v6053_v44  ;;  %v6056_v2 = vld [vmem:[#allocation9 + $0x1f8] sm:$0xff]   ;;  %v6976_v59 = vld [vmem:[#allocation2 + $0x48] sm:$0xff]  ;;  %v6986_v42 = vld [vmem:[#allocation4 + $0x40] sm:$0xff]  ;;  %v542_v62 = vrot.slane %v6928_v11, 1  ;;  %v558_v44 = vrot.slane %v6935_v45, 1 }
  0xba   : > { %v667_v10 = vld [vmem:[#allocation4 + $0x70] sm:$0x80]  ;;  %v426_v58 = vsel %vm410_vm3, %v391_v46, %v407_v52  ;;  %v442_v61 = vsel %vm410_vm3, %v407_v52, %v391_v46  ;;  %5228 = vmatprep.subr.bf16.mxu1 %v6054_v48  ;;  %v6057_v51 = vld [vmem:[#allocation9 + $0x1b8] sm:$0xff]   ;;  %v6988_v21 = vld [vmem:[#allocation2 + $0x50] sm:$0xff] }
  0xbb   : > { %v668_v36 = vsel %vm6609_vm7, 0, %v667_v10  ;;  %v521_v5 = vld [vmem:[#allocation2 + $0x78] sm:$0x1]  ;;  %v458_v37 = vpack.c.bf16 %v426_v58, %v442_v61  ;;  %v7006_v47 = vld [vmem:[#allocation4 + $0x50] sm:$0xff]  ;;  %v7014_v25 = vld [vmem:[#allocation4 + $0x58] sm:$0xff]  ;;  %v575_v10 = vsel %vm559_vm4, %v542_v62, %v558_v44 }
  0xbc   : > { %669 = vst [vmem:[#allocation4 + $0x70] sm:$0x80] %v668_v36  ;;  %v522_v38 = vsel %vm6584_vm6, 0, %v521_v5  ;;  %v6998_v24 = vld [vmem:[#allocation4 + $0x48] sm:$0xff]  ;;  %v7008_v54 = vld [vmem:[#allocation2 + $0x60] sm:$0xff]  ;;  %v7016_v31 = vld [vmem:[#allocation2 + $0x68] sm:$0xff]  ;;  %v591_v36 = vsel %vm559_vm4, %v558_v44, %v542_v62 }
  0xbd   : > { %523 = vst [vmem:[#allocation2 + $0x78] sm:$0x1] %v522_v38  ;;  %475 = vst [vmem:[#allocation2 + $0x80] sm:$0xff] %v458_v37  ;;  %5229 = vmatpush3.bf16.msra.mxu1 %v6055_v56  ;;  %v7000_v34 = vld [vmem:[#allocation2 + $0x58] sm:$0xff]  ;;  %v7022_v30 = vld [vmem:[#allocation4 + $0x60] sm:$0xff]  ;;  %v607_v46 = vpack.c.bf16 %v591_v36, %v575_v10 }
  0xbe   : > { %5230 = vmatprep.subr.bf16.mxu1 %v6056_v2  ;;  %v7024_v40 = vld [vmem:[#allocation2 + $0x70] sm:$0xff]  ;;  %v6059_v37 = vld [vmem:[#allocation9 + $0x208] sm:$0xff]  }
  0xbf   : > { %924 = vmatmul.mubr.bf16.gmra.mrb[24].mxu0 %v6905_v14  ;;  %v670_v6 = vld [vmem:[#allocation4 + $0x78] sm:$0x80]  ;;  %624 = vst [vmem:[#allocation4 + $0x80] sm:$0xff] %v607_v46  ;;  %v7036_v48 = vld [vmem:[#allocation4 + $0x68] sm:$0xff]  ;;  %v6060_v38 = vld [vmem:[#allocation9 + $0x210] sm:$0xff]  }
  0xc0   : > { %1269 = vmatmul.mubr.bf16.gmra.mrb[20].mxu1 %v6930_v27  ;;  %931 = vmatprep.mubr.bf16.mxu0 %v6940_v49  ;;  %v671_v8 = vsel %vm6609_vm7, 0, %v670_v6  ;;  %v1743_v6 = vld [vmem:[#allocation2 + $0x10] sm:$0xff] }
  0xc1   : > { %1276 = vmatprep.mubr.bf16.mxu1 %v6943_v57  ;;  %672 = vst [vmem:[#allocation4 + $0x78] sm:$0x80] %v671_v8  ;;  %5231 = vmatpush3.bf16.msra.mxu1 %v6057_v51  ;;  %v6063_v8 = vld [vmem:[#allocation9 + $0x228] sm:$0xff]  }
  0xc3   : > { %v7046_v61 = vld [vmem:[#allocation4 + $0x70] sm:$0xff] }
  0xc4   : > { %v524_v22 = vld [vmem:[#allocation2 + $0x80] sm:$0x1]  ;;  %v7038_v52 = vld [vmem:[#allocation2 + $0x78] sm:$0xff] }
  0xc5   : > { %v525_v0 = vsel %vm6584_vm6, 0, %v524_v22 }
  0xc6   : > { %526 = vst [vmem:[#allocation2 + $0x80] sm:$0x1] %v525_v0  ;;  %v673_v56 = vld [vmem:[#allocation4 + $0x80] sm:$0x80] }
  0xc7   : > { %932 = vmatmul.mubr.bf16.gmra.mrb[28].mxu0 %v6943_v57  ;;  %v674_v58 = vsel %vm6609_vm7, 0, %v673_v56 }
  0xc8   : > { %1277 = vmatmul.mubr.bf16.gmra.mrb[24].mxu1 %v6960_v53  ;;  %939 = vmatprep.mubr.bf16.mxu0 %v6964_v16  ;;  %675 = vst [vmem:[#allocation4 + $0x80] sm:$0x80] %v674_v58  ;;  %v7054_v5 = vld [vmem:[#allocation4 + $0x78] sm:$0xff] }
  0xc9   : > { %1284 = vmatprep.mubr.bf16.mxu1 %v6966_v20 }
  0xcd   : > { %v7048_v2 = vld [vmem:[#allocation2 + $0x80] sm:$0xff] }
  0xcf   : > { %940 = vmatmul.mubr.bf16.gmra.mrb[32].mxu0 %v6966_v20 }
  0xd0   : > { %1285 = vmatmul.mubr.bf16.gmra.mrb[28].mxu1 %v6974_v26  ;;  %947 = vmatprep.mubr.bf16.mxu0 %v6980_v60 }
  0xd1   : > { %1292 = vmatprep.mubr.bf16.mxu1 %v6976_v59 }
  0xd7   : > { %948 = vmatmul.mubr.bf16.gmra.mrb[36].mxu0 %v6976_v59 }
  0xd8   : > { %1293 = vmatmul.mubr.bf16.gmra.mrb[32].mxu1 %v6986_v42  ;;  %955 = vmatprep.mubr.bf16.mxu0 %v6992_v43 }
  0xd9   : > { %1300 = vmatprep.mubr.bf16.mxu1 %v6988_v21 }
  0xdf   : > { %956 = vmatmul.mubr.bf16.gmra.mrb[40].mxu0 %v6988_v21 }
  0xe0   : > { %1301 = vmatmul.mubr.bf16.gmra.mrb[36].mxu1 %v6998_v24  ;;  %963 = vmatprep.mubr.bf16.mxu0 %v6784_v50 }
  0xe1   : > { %1308 = vmatprep.mubr.bf16.mxu1 %v7000_v34 }
  0xe7   : > { %964 = vmatmul.mubr.bf16.gmra.mrb[44].mxu0 %v7000_v34 }
  0xe8   : > { %1309 = vmatmul.mubr.bf16.gmra.mrb[40].mxu1 %v7006_v47  ;;  %971 = vmatprep.mubr.bf16.mxu0 %v6815_v18 }
  0xe9   : > { %1316 = vmatprep.mubr.bf16.mxu1 %v7008_v54 }
  0xef   : > { %972 = vmatmul.mubr.bf16.gmra.mrb[48].mxu0 %v7008_v54 }
  0xf0   : > { %1317 = vmatmul.mubr.bf16.gmra.mrb[44].mxu1 %v7014_v25  ;;  %979 = vmatprep.mubr.bf16.mxu0 %v6853_v4 }
  0xf1   : > { %1324 = vmatprep.mubr.bf16.mxu1 %v7016_v31 }
  0xf7   : > { %980 = vmatmul.mubr.bf16.gmra.mrb[52].mxu0 %v7016_v31 }
  0xf8   : > { %1325 = vmatmul.mubr.bf16.gmra.mrb[48].mxu1 %v7022_v30  ;;  %987 = vmatprep.mubr.bf16.mxu0 %v6859_v13 }
  0xf9   : > { %1332 = vmatprep.mubr.bf16.mxu1 %v7024_v40 }
  0xff   : > { %988 = vmatmul.mubr.bf16.gmra.mrb[56].mxu0 %v7024_v40 }
 0x100   : > { %1333 = vmatmul.mubr.bf16.gmra.mrb[52].mxu1 %v7036_v48  ;;  %995 = vmatprep.mubr.bf16.mxu0 %v6903_v55 }
 0x101   : > { %1340 = vmatprep.mubr.bf16.mxu1 %v7038_v52 }
 0x107   : > { %996 = vmatmul.mubr.bf16.gmra.mrb[60].mxu0 %v7038_v52 }
 0x108   : > { %1341 = vmatmul.mubr.bf16.gmra.mrb[56].mxu1 %v7046_v61  ;;  %1581 = vmatprep.mubr.bf16.mxu0 %v6760_v28  ;;  %v6061_v28 = vld [vmem:[#allocation9 + $0x218] sm:$0xff]  }
 0x109   : > { %1348 = vmatprep.mubr.bf16.mxu1 %v7048_v2 }
 0x10f   : > { %1582 = vmatmul.mubr.bf16.vlgmr.msra.gmra.mrb[64].mxu0 %v6545_v41  ;;  %v6062_v41 = vld [vmem:[#allocation9 + $0x220] sm:$0xff]  }
 0x110   : > { %1349 = vmatmul.mubr.bf16.gmra.mrb[60].mxu1 %v7054_v5  ;;  %5825 = vmatpush3.bf16.msra.mxu0 %v6957_v9 }
 0x111   : > { %1936 = vmatprep.mubr.bf16.mxu1 %v6681_v19  ;;  %1589 = vmatprep.mubr.bf16.mxu0 %v6819_v23  ;;  %v6065_v23 = vld [vmem:[#allocation9 + $0x238] sm:$0xff]  }
 0x112   : > { %5826 = vmatprep.subr.bf16.mxu0 %v6059_v37 }
 0x114   : > { %5827 = vmatpush3.bf16.msra.mxu0 %v6059_v37 }
 0x115   : > { %5828 = vmatprep.subr.bf16.mxu0 %v6060_v38 }
 0x117   : > { %1590 = vmatmul.mubr.bf16.gmra.mrb[68].mxu0 %v6681_v19  ;;  %v6064_v19 = vld [vmem:[#allocation9 + $0x230] sm:$0xff]  }
 0x118   : > { %1937 = vmatmul.mubr.bf16.vlgmr.msra.gmra.mrb[64].mxu1 %v1743_v6  ;;  %1597 = vmatprep.mubr.bf16.mxu0 %v6879_v35 }
 0x119   : > { %1944 = vmatprep.mubr.bf16.mxu1 %v6728_v3  ;;  %5829 = vmatpush3.bf16.msra.mxu0 %v6060_v38 }
 0x11a   : > { %5830 = vmatprep.subr.bf16.mxu0 %v6061_v28 }
 0x11d   : > { %5831 = vmatpush3.bf16.msra.mxu0 %v6061_v28 }
 0x11e   : > { %5832 = vmatprep.subr.bf16.mxu0 %v6062_v41 }
 0x11f   : > { %1598 = vmatmul.mubr.bf16.gmra.mrb[72].mxu0 %v6728_v3 }
 0x120   : > { %1945 = vmatmul.mubr.bf16.gmra.mrb[68].mxu1 %v6772_v39  ;;  %1605 = vmatprep.mubr.bf16.mxu0 %v6901_v7 }
 0x121   : > { %1952 = vmatprep.mubr.bf16.mxu1 %v6764_v29  ;;  %5833 = vmatpush3.bf16.msra.mxu0 %v6062_v41 }
 0x122   : > { %5834 = vmatprep.subr.bf16.mxu0 %v6063_v8 }
 0x125   : > { %5835 = vmatpush3.bf16.msra.mxu0 %v6063_v8 }
 0x126   : > { %5836 = vmatprep.subr.bf16.mxu0 %v6064_v19 }
 0x127   : > { %1606 = vmatmul.mubr.bf16.gmra.mrb[76].mxu0 %v6764_v29 }
 0x128   : > { %1953 = vmatmul.mubr.bf16.gmra.mrb[72].mxu1 %v6827_v33  ;;  %1613 = vmatprep.mubr.bf16.mxu0 %v6930_v27 }
 0x129   : > { %1960 = vmatprep.mubr.bf16.mxu1 %v6873_v12  ;;  %5837 = vmatpush3.bf16.msra.mxu0 %v6064_v19 }
 0x12a   : > { %5838 = vmatprep.subr.bf16.mxu0 %v6065_v23 }
 0x12d   : > { %5839 = vmatpush3.bf16.msra.mxu0 %v6065_v23 }
 0x12f   : > { %1614 = vmatmul.mubr.bf16.gmra.mrb[80].mxu0 %v6873_v12 }
 0x130   : > { %1961 = vmatmul.mubr.bf16.gmra.mrb[76].mxu1 %v6881_v63  ;;  %1621 = vmatprep.mubr.bf16.mxu0 %v6960_v53  ;;  %v7105_v63 = vld [vmem:[%s8375_s2] ss:$0 sm:$0xff] }
 0x131   : > { %1968 = vmatprep.mubr.bf16.mxu1 %v6909_v15 }
 0x137   : > { %1622 = vmatmul.mubr.bf16.gmra.mrb[84].mxu0 %v6909_v15 }
 0x138   : > { %1969 = vmatmul.mubr.bf16.gmra.mrb[80].mxu1 %v6905_v14  ;;  %1629 = vmatprep.mubr.bf16.mxu0 %v6974_v26 }
 0x139   : > { %1976 = vmatprep.mubr.bf16.mxu1 %v6940_v49 }
 0x13f   : > { %1630 = vmatmul.mubr.bf16.gmra.mrb[88].mxu0 %v6940_v49 }
 0x140   : > { %1977 = vmatmul.mubr.bf16.gmra.mrb[84].mxu1 %v6943_v57  ;;  %1637 = vmatprep.mubr.bf16.mxu0 %v6986_v42 }
 0x141   : > { %1984 = vmatprep.mubr.bf16.mxu1 %v6964_v16 }
 0x147   : > { %1638 = vmatmul.mubr.bf16.gmra.mrb[92].mxu0 %v6964_v16 }
 0x148   : > { %1985 = vmatmul.mubr.bf16.gmra.mrb[88].mxu1 %v6966_v20  ;;  %1645 = vmatprep.mubr.bf16.mxu0 %v6998_v24 }
 0x149   : > { %1992 = vmatprep.mubr.bf16.mxu1 %v6980_v60 }
 0x14f   : > { %1646 = vmatmul.mubr.bf16.gmra.mrb[96].mxu0 %v6980_v60 }
 0x150   : > { %1993 = vmatmul.mubr.bf16.gmra.mrb[92].mxu1 %v6976_v59  ;;  %1653 = vmatprep.mubr.bf16.mxu0 %v7006_v47 }
 0x151   : > { %2000 = vmatprep.mubr.bf16.mxu1 %v6992_v43 }
 0x157   : > { %1654 = vmatmul.mubr.bf16.gmra.mrb[100].mxu0 %v6992_v43 }
 0x158   : > { %2001 = vmatmul.mubr.bf16.gmra.mrb[96].mxu1 %v6988_v21  ;;  %1661 = vmatprep.mubr.bf16.mxu0 %v7014_v25 }
 0x159   : > { %2008 = vmatprep.mubr.bf16.mxu1 %v6784_v50 }
 0x15f   : > { %1662 = vmatmul.mubr.bf16.gmra.mrb[104].mxu0 %v6784_v50 }
 0x160   : > { %v4896_v3 = vpop.f32.mrb[0].mxu0  ;;  %2009 = vmatmul.mubr.bf16.gmra.mrb[100].mxu1 %v7000_v34  ;;  %1669 = vmatprep.mubr.bf16.mxu0 %v7022_v30 }
 0x161   : > { %v4897_v29 = vpop.f32.mrb[1].mxu0  ;;  %2016 = vmatprep.mubr.bf16.mxu1 %v6815_v18 }
 0x162   : > { %v4898_v39 = vadd.f32 %v4897_v29, %v4896_v3  ;;  %v4899_v33 = vpop.f32.mrb[2].mxu0  ;;  %v7133_v3 = vld [vmem:[#allocation4 + $0x80] sm:$0xff] }
 0x163   : > { %v4900_v12 = vpop.f32.mrb[3].mxu0 }
 0x164   : > { %v4901_v35 = vadd.f32 %v4900_v12, %v4899_v33  ;;  %v1004_v7 = vadd.f32 %v4898_v39, %v7105_v63 }
 0x165   : > { %v5008_v14 = vpop.f32.mrb[0].mxu1 }
 0x166   : > { %v5009_v27 = vpop.f32.mrb[1].mxu1 }
 0x167   : > { %1670 = vmatmul.mubr.bf16.gmra.mrb[108].mxu0 %v6815_v18  ;;  %v1005_v18 = vadd.f32 %v4901_v35, %v7105_v63  ;;  %v5010_v51 = vadd.f32 %v5009_v27, %v5008_v14  ;;  %v5011_v9 = vpop.f32.mrb[2].mxu1  ;;  %v6066_v14 = vld [vmem:[#allocation11 + $0x40] sm:$0xff]  }
 0x168   : > { %2017 = vmatmul.mubr.bf16.gmra.mrb[104].mxu1 %v7008_v54  ;;  %1677 = vmatprep.mubr.bf16.mxu0 %v7036_v48  ;;  %v4902_v50 = vpop.f32.mrb[4].mxu0  ;;  %v5012_v16 = vpop.f32.mrb[3].mxu1 }
 0x169   : > { %2024 = vmatprep.mubr.bf16.mxu1 %v6853_v4  ;;  %v4903_v15 = vpop.f32.mrb[5].mxu0  ;;  %v5013_v22 = vadd.f32 %v5012_v16, %v5011_v9  ;;  %v7112_v0 = vadd.f32 %v5010_v51, %v1004_v7  ;;  %5352 = vmatprep.subr.bf16.mxu1 %v6066_v14  ;;  %v6067_v9 = vld [vmem:[#allocation11] sm:$0xff]   ;;  %v6069_v14 = vld [vmem:[#allocation11 + $0x8] sm:$0xff]  }
 0x16a   : > { %v4904_v49 = vadd.f32 %v4903_v15, %v4902_v50  ;;  %v4905_v57 = vpop.f32.mrb[6].mxu0  ;;  %5353 = vmatpush3.bf16.msra.mxu1 %v6067_v9 }
 0x16b   : > { %v4906_v53 = vpop.f32.mrb[7].mxu0  ;;  %v7117_v26 = vadd.f32 %v5013_v22, %v1005_v18 }
 0x16c   : > { %v4907_v20 = vadd.f32 %v4906_v53, %v4905_v57  ;;  %v1006_v60 = vadd.f32 %v4904_v49, %v7105_v63 }
 0x16f   : > { %1678 = vmatmul.mubr.bf16.gmra.mrb[112].mxu0 %v6853_v4  ;;  %v5014_v42 = vpop.f32.mrb[4].mxu1  ;;  %v1007_v4 = vadd.f32 %v4907_v20, %v7105_v63 }
 0x170   : > { %2025 = vmatmul.mubr.bf16.gmra.mrb[108].mxu1 %v7016_v31  ;;  %1685 = vmatprep.mubr.bf16.mxu0 %v7046_v61  ;;  %v4908_v59 = vpop.f32.mrb[8].mxu0  ;;  %v5015_v43 = vpop.f32.mrb[5].mxu1 }
 0x171   : > { %2032 = vmatprep.mubr.bf16.mxu1 %v6859_v13  ;;  %v4909_v21 = vpop.f32.mrb[9].mxu0  ;;  %v5016_v47 = vadd.f32 %v5015_v43, %v5014_v42  ;;  %v5017_v54 = vpop.f32.mrb[6].mxu1 }
 0x172   : > { %v4910_v24 = vadd.f32 %v4909_v21, %v4908_v59  ;;  %v4911_v34 = vpop.f32.mrb[10].mxu0  ;;  %v5018_v31 = vpop.f32.mrb[7].mxu1  ;;  %v7147_v59 = vld [vmem:[#allocation2] sm:$0xff] }
 0x173   : > { %v4912_v62 = vpop.f32.mrb[11].mxu0  ;;  %v5019_v10 = vadd.f32 %v5018_v31, %v5017_v54  ;;  %v7122_v36 = vadd.f32 %v5016_v47, %v1006_v60  ;;  %v2099_v54 = vld [vmem:[#allocation4 + $0x18] sm:$0xff] }
 0x174   : > { %v4913_v44 = vadd.f32 %v4912_v62, %v4911_v34  ;;  %v1008_v58 = vadd.f32 %v4910_v24, %v7105_v63 }
 0x175   : > { %v7127_v46 = vadd.f32 %v5019_v10, %v1007_v4  ;;  %v2100_v10 = vld [vmem:[#allocation4 + $0x20] sm:$0xff] }
 0x177   : > { %1686 = vmatmul.mubr.bf16.gmra.mrb[116].mxu0 %v6859_v13  ;;  %v1009_v13 = vadd.f32 %v4913_v44, %v7105_v63 }
 0x178   : > { %2033 = vmatmul.mubr.bf16.gmra.mrb[112].mxu1 %v7024_v40  ;;  %1693 = vmatprep.mubr.bf16.mxu0 %v7054_v5  ;;  %v358_v40 = vpack.c.bf16 %v6935_v45, %v6928_v11 }
 0x179   : > { %2040 = vmatprep.mubr.bf16.mxu1 %v6903_v55 }
 0x17a   : > { %v4914_v56 = vpop.f32.mrb[12].mxu0 }
 0x17b   : > { %v5020_v37 = vpop.f32.mrb[8].mxu1  ;;  %v4915_v38 = vpop.f32.mrb[13].mxu0 }
 0x17c   : > { %v5021_v6 = vpop.f32.mrb[9].mxu1  ;;  %v4916_v28 = vadd.f32 %v4915_v38, %v4914_v56  ;;  %v4917_v41 = vpop.f32.mrb[14].mxu0 }
 0x17d   : > { %v5022_v8 = vadd.f32 %v5021_v6, %v5020_v37  ;;  %v5023_v19 = vpop.f32.mrb[10].mxu1  ;;  %v4918_v23 = vpop.f32.mrb[15].mxu0 }
 0x17e   : > { %v5024_v29 = vpop.f32.mrb[11].mxu1  ;;  %v4919_v39 = vadd.f32 %v4918_v23, %v4917_v41  ;;  %v1010_v7 = vadd.f32 %v4916_v28, %v7105_v63 }
 0x17f   : > { %v5025_v33 = vadd.f32 %v5024_v29, %v5023_v19  ;;  %1694 = vmatmul.mubr.bf16.gmra.mrb[120].mxu0 %v6903_v55  ;;  %v7136_v12 = vadd.f32 %v5022_v8, %v1008_v58  ;;  %v6068_v19 = vld [vmem:[#allocation11 + $0x48] sm:$0xff]  }
 0x180   : > { %2041 = vmatmul.mubr.bf16.gmra.mrb[116].mxu1 %v7038_v52  ;;  %1701 = vmatprep.mubr.bf16.mxu0 %v7133_v3  ;;  %v1011_v55 = vadd.f32 %v4919_v39, %v7105_v63  ;;  %v2098_v52 = vld [vmem:[#allocation4 + $0x10] sm:$0xff]  ;;  %v2101_v39 = vld [vmem:[#allocation4 + $0x28] sm:$0xff] }
 0x181   : > { %2048 = vmatprep.mubr.bf16.mxu1 %v358_v40  ;;  %v7140_v35 = vadd.f32 %v5025_v33, %v1009_v13  ;;  %5354 = vmatprep.subr.bf16.mxu1 %v6068_v19 }
 0x182   : > { %v4920_v50 = vpop.f32.mrb[16].mxu0  ;;  %5355 = vmatpush3.bf16.msra.mxu1 %v6069_v14 }
 0x183   : > { %v5026_v11 = vpop.f32.mrb[12].mxu1  ;;  %v4921_v45 = vpop.f32.mrb[17].mxu0 }
 0x184   : > { %v5027_v15 = vpop.f32.mrb[13].mxu1  ;;  %v4922_v27 = vadd.f32 %v4921_v45, %v4920_v50  ;;  %v4923_v49 = vpop.f32.mrb[18].mxu0  ;;  %v2102_v45 = vld [vmem:[#allocation4 + $0x30] sm:$0xff] }
 0x185   : > { %v5028_v57 = vadd.f32 %v5027_v15, %v5026_v11  ;;  %v5029_v18 = vpop.f32.mrb[14].mxu1  ;;  %v4924_v51 = vpop.f32.mrb[19].mxu0 }
 0x186   : > { %v5030_v53 = vpop.f32.mrb[15].mxu1  ;;  %v4925_v16 = vadd.f32 %v4924_v51, %v4923_v49  ;;  %v1012_v21 = vadd.f32 %v4922_v27, %v7105_v63 }
 0x187   : > { %v5031_v20 = vadd.f32 %v5030_v53, %v5029_v18  ;;  %1702 = vmatmul.mubr.bf16.gmra.mrb[124].mxu0 %v358_v40  ;;  %v7144_v22 = vadd.f32 %v5028_v57, %v1010_v7 }
 0x188   : > { %2049 = vmatmul.mubr.bf16.gmra.mrb[120].mxu1 %v7048_v2  ;;  %5840 = vmatprep.mubr.bf16.mxu0 %v2098_v52  ;;  %v1013_v62 = vadd.f32 %v4925_v16, %v7105_v63 }
 0x189   : > { %2056 = vmatprep.mubr.bf16.mxu1 %v7147_v59  ;;  %v7150_v60 = vadd.f32 %v5031_v20, %v1011_v55 }
 0x18a   : > { %v4926_v42 = vpop.f32.mrb[20].mxu0 }
 0x18b   : > { %v5032_v43 = vpop.f32.mrb[16].mxu1  ;;  %v4927_v24 = vpop.f32.mrb[21].mxu0 }
 0x18c   : > { %v5033_v34 = vpop.f32.mrb[17].mxu1  ;;  %v4928_v4 = vadd.f32 %v4927_v24, %v4926_v42  ;;  %v4929_v47 = vpop.f32.mrb[22].mxu0  ;;  %v2103_v42 = vld [vmem:[#allocation4 + $0x38] sm:$0xff] }
 0x18d   : > { %v5034_v31 = vadd.f32 %v5033_v34, %v5032_v43  ;;  %v5035_v2 = vpop.f32.mrb[18].mxu1  ;;  %v4930_v44 = vpop.f32.mrb[23].mxu0 }
 0x18e   : > { %v5036_v56 = vpop.f32.mrb[19].mxu1  ;;  %v4931_v58 = vadd.f32 %v4930_v44, %v4929_v47  ;;  %v1014_v41 = vadd.f32 %v4928_v4, %v7105_v63  ;;  %v2104_v4 = vld [vmem:[#allocation4 + $0x40] sm:$0xff] }
 0x18f   : > { %v5037_v37 = vadd.f32 %v5036_v56, %v5035_v2  ;;  %5841 = vmatmul.mubr.bf16.vlgmr.msra.gmra.mrb[128].mxu0 %v2099_v54  ;;  %v7154_v38 = vadd.f32 %v5034_v31, %v1012_v21 }
 0x190   : > { %2057 = vmatmul.mubr.bf16.gmra.mrb[124].mxu1 %v7147_v59  ;;  %5844 = vmatprep.mubr.bf16.mxu0 %v2100_v10  ;;  %v1015_v33 = vadd.f32 %v4931_v58, %v7105_v63 }
 0x191   : > { %v7157_v6 = vadd.f32 %v5037_v37, %v1013_v62  ;;  %3019 = vmatprep.mubr.bf16.mxu1 %v7147_v59  ;;  %v6070_v37 = vld [vmem:[#allocation11 + $0x50] sm:$0xff]  }
 0x192   : > { %v4932_v28 = vpop.f32.mrb[24].mxu0  ;;  %5356 = vmatprep.subr.bf16.mxu1 %v6070_v37 }
 0x193   : > { %v5038_v13 = vpop.f32.mrb[20].mxu1  ;;  %v4933_v8 = vpop.f32.mrb[25].mxu0 }
 0x194   : > { %v5039_v23 = vpop.f32.mrb[21].mxu1  ;;  %v4934_v40 = vadd.f32 %v4933_v8, %v4932_v28  ;;  %v4935_v29 = vpop.f32.mrb[26].mxu0  ;;  %v2105_v8 = vld [vmem:[#allocation4 + $0x48] sm:$0xff] }
 0x195   : > { %v5040_v50 = vadd.f32 %v5039_v23, %v5038_v13  ;;  %v5041_v7 = vpop.f32.mrb[22].mxu1  ;;  %v4936_v11 = vpop.f32.mrb[27].mxu0 }
 0x196   : > { %v5042_v15 = vpop.f32.mrb[23].mxu1  ;;  %v4937_v27 = vadd.f32 %v4936_v11, %v4935_v29  ;;  %v1016_v51 = vadd.f32 %v4934_v40, %v7105_v63 }
 0x197   : > { %v5043_v49 = vadd.f32 %v5042_v15, %v5041_v7  ;;  %5845 = vmatmul.mubr.bf16.gmra.mrb[132].mxu0 %v2101_v39  ;;  %v7162_v55 = vadd.f32 %v5040_v50, %v1014_v41  ;;  %v2106_v39 = vld [vmem:[#allocation4 + $0x50] sm:$0xff] }
 0x198   : > { %5848 = vmatprep.mubr.bf16.mxu0 %v2102_v45  ;;  %v1017_v21 = vadd.f32 %v4937_v27, %v7105_v63 }
 0x199   : > { %v7164_v57 = vadd.f32 %v5043_v49, %v1015_v33  ;;  %v6071_v33 = vld [vmem:[#allocation11 + $0x10] sm:$0xff]  }
 0x19a   : > { %v4938_v18 = vpop.f32.mrb[28].mxu0  ;;  %5357 = vmatpush3.bf16.msra.mxu1 %v6071_v33 }
 0x19b   : > { %v5044_v52 = vpop.f32.mrb[24].mxu1  ;;  %v4939_v9 = vpop.f32.mrb[29].mxu0 }
 0x19c   : > { %v5045_v53 = vpop.f32.mrb[25].mxu1  ;;  %v4940_v16 = vadd.f32 %v4939_v9, %v4938_v18  ;;  %v4941_v20 = vpop.f32.mrb[30].mxu0 }
 0x19d   : > { %v5046_v43 = vadd.f32 %v5045_v53, %v5044_v52  ;;  %v5047_v24 = vpop.f32.mrb[26].mxu1  ;;  %v4942_v34 = vpop.f32.mrb[31].mxu0 }
 0x19e   : > { %v5048_v47 = vpop.f32.mrb[27].mxu1  ;;  %v4943_v54 = vadd.f32 %v4942_v34, %v4941_v20  ;;  %v1018_v10 = vadd.f32 %v4940_v16, %v7105_v63 }
 0x19f   : > { %v5049_v62 = vadd.f32 %v5048_v47, %v5047_v24  ;;  %5849 = vmatmul.mubr.bf16.gmra.mrb[136].mxu0 %v2103_v42  ;;  %v7168_v31 = vadd.f32 %v5046_v43, %v1016_v51 }
 0x1a0   : > { %5852 = vmatprep.mubr.bf16.mxu0 %v2104_v4  ;;  %v1019_v19 = vadd.f32 %v4943_v54, %v7105_v63 }
 0x1a1   : > { %v7170_v2 = vadd.f32 %v5049_v62, %v1017_v21 }
 0x1a2   : > { %v4944_v44 = vpop.f32.mrb[32].mxu0 }
 0x1a3   : > { %v5050_v56 = vpop.f32.mrb[28].mxu1  ;;  %v4945_v58 = vpop.f32.mrb[33].mxu0 }
 0x1a4   : > { %v5051_v28 = vpop.f32.mrb[29].mxu1  ;;  %v4946_v41 = vadd.f32 %v4945_v58, %v4944_v44  ;;  %v4947_v13 = vpop.f32.mrb[34].mxu0 }
 0x1a5   : > { %v5052_v23 = vadd.f32 %v5051_v28, %v5050_v56  ;;  %v5053_v40 = vpop.f32.mrb[30].mxu1  ;;  %v4948_v29 = vpop.f32.mrb[35].mxu0 }
 0x1a6   : > { %v5054_v50 = vpop.f32.mrb[31].mxu1  ;;  %v4949_v7 = vadd.f32 %v4948_v29, %v4947_v13  ;;  %v1020_v27 = vadd.f32 %v4946_v41, %v7105_v63 }
 0x1a7   : > { %v5055_v11 = vadd.f32 %v5054_v50, %v5053_v40  ;;  %5853 = vmatmul.mubr.bf16.gmra.mrb[140].mxu0 %v2105_v8  ;;  %v7174_v45 = vadd.f32 %v5052_v23, %v1018_v10  ;;  %v6072_v10 = vld [vmem:[#allocation11 + $0x58] sm:$0xff]  }
 0x1a8   : > { %5856 = vmatprep.mubr.bf16.mxu0 %v2106_v39  ;;  %v1021_v53 = vadd.f32 %v4949_v7, %v7105_v63  ;;  %5358 = vmatprep.subr.bf16.mxu1 %v6072_v10 }
 0x1a9   : > { %v7176_v14 = vadd.f32 %v5055_v11, %v1019_v19 }
 0x1aa   : > { %v4950_v15 = vpop.f32.mrb[36].mxu0 }
 0x1ab   : > { %v5056_v49 = vpop.f32.mrb[32].mxu1  ;;  %v4951_v18 = vpop.f32.mrb[37].mxu0 }
 0x1ac   : > { %v5057_v51 = vpop.f32.mrb[33].mxu1  ;;  %v4952_v52 = vadd.f32 %v4951_v18, %v4950_v15  ;;  %v4953_v9 = vpop.f32.mrb[38].mxu0 }
 0x1ad   : > { %v5058_v16 = vadd.f32 %v5057_v51, %v5056_v49  ;;  %v5059_v20 = vpop.f32.mrb[34].mxu1  ;;  %v4954_v42 = vpop.f32.mrb[39].mxu0 }
 0x1ae   : > { %v5060_v21 = vpop.f32.mrb[35].mxu1  ;;  %v4955_v43 = vadd.f32 %v4954_v42, %v4953_v9  ;;  %v1022_v54 = vadd.f32 %v4952_v52, %v7105_v63 }
 0x1af   : > { %v7180_v24 = vadd.f32 %v5058_v16, %v1020_v27  ;;  %v5061_v34 = vadd.f32 %v5060_v21, %v5059_v20  ;;  %5857 = vmatmul.mubr.bf16.gmra.mrb[144].mxu0 %v7014_v25  ;;  %v6073_v25 = vld [vmem:[#allocation11 + $0x18] sm:$0xff]  }
 0x1b0   : > { %5860 = vmatprep.mubr.bf16.mxu0 %v7022_v30  ;;  %v1023_v28 = vadd.f32 %v4955_v43, %v7105_v63  ;;  %5359 = vmatpush3.bf16.msra.mxu1 %v6073_v25 }
 0x1b1   : > { %v7184_v4 = vadd.f32 %v5061_v34, %v1021_v53  ;;  %v6074_v34 = vld [vmem:[#allocation11 + $0x60] sm:$0xff]  }
 0x1b2   : > { %v4956_v47 = vpop.f32.mrb[40].mxu0  ;;  %5360 = vmatprep.subr.bf16.mxu1 %v6074_v34 }
 0x1b3   : > { %v5062_v62 = vpop.f32.mrb[36].mxu1  ;;  %v4957_v44 = vpop.f32.mrb[41].mxu0 }
 0x1b4   : > { %v5063_v56 = vpop.f32.mrb[37].mxu1  ;;  %v4958_v58 = vadd.f32 %v4957_v44, %v4956_v47  ;;  %v4959_v37 = vpop.f32.mrb[42].mxu0 }
 0x1b5   : > { %v5064_v41 = vadd.f32 %v5063_v56, %v5062_v62  ;;  %v5065_v13 = vpop.f32.mrb[38].mxu1  ;;  %v4960_v8 = vpop.f32.mrb[43].mxu0 }
 0x1b6   : > { %v5066_v19 = vpop.f32.mrb[39].mxu1  ;;  %v4961_v30 = vadd.f32 %v4960_v8, %v4959_v37  ;;  %v1024_v33 = vadd.f32 %v4958_v58, %v7105_v63 }
 0x1b7   : > { %v7188_v23 = vadd.f32 %v5064_v41, %v1022_v54  ;;  %v5067_v40 = vadd.f32 %v5066_v19, %v5065_v13  ;;  %5861 = vmatmul.mubr.bf16.gmra.mrb[148].mxu0 %v7036_v48 }
 0x1b8   : > { %5864 = vmatprep.mubr.bf16.mxu0 %v7046_v61  ;;  %v1025_v49 = vadd.f32 %v4961_v30, %v7105_v63 }
 0x1b9   : > { %v7192_v29 = vadd.f32 %v5067_v40, %v1023_v28 }
 0x1ba   : > { %v4962_v39 = vpop.f32.mrb[44].mxu0 }
 0x1bb   : > { %v5068_v50 = vpop.f32.mrb[40].mxu1  ;;  %v4963_v7 = vpop.f32.mrb[45].mxu0 }
 0x1bc   : > { %v5069_v11 = vpop.f32.mrb[41].mxu1  ;;  %v4964_v15 = vadd.f32 %v4963_v7, %v4962_v39  ;;  %v4965_v27 = vpop.f32.mrb[46].mxu0 }
 0x1bd   : > { %v5070_v18 = vadd.f32 %v5069_v11, %v5068_v50  ;;  %v5071_v51 = vpop.f32.mrb[42].mxu1  ;;  %v4966_v52 = vpop.f32.mrb[47].mxu0 }
 0x1be   : > { %v5072_v9 = vpop.f32.mrb[43].mxu1  ;;  %v4967_v48 = vadd.f32 %v4966_v52, %v4965_v27  ;;  %v1026_v42 = vadd.f32 %v4964_v15, %v7105_v63 }
 0x1bf   : > { %v7196_v53 = vadd.f32 %v5070_v18, %v1024_v33  ;;  %v5073_v61 = vadd.f32 %v5072_v9, %v5071_v51  ;;  %5865 = vmatmul.mubr.bf16.gmra.mrb[152].mxu0 %v7054_v5  ;;  %v6075_v5 = vld [vmem:[#allocation11 + $0x20] sm:$0xff]  }
 0x1c0   : > { %5868 = vmatprep.mubr.bf16.mxu0 %v7133_v3  ;;  %v1027_v44 = vadd.f32 %v4967_v48, %v7105_v63  ;;  %5361 = vmatpush3.bf16.msra.mxu1 %v6075_v5 }
 0x1c1   : > { %v7200_v16 = vadd.f32 %v5073_v61, %v1025_v49 }
 0x1c2   : > { %v4968_v20 = vpop.f32.mrb[48].mxu0 }
 0x1c3   : > { %v5074_v21 = vpop.f32.mrb[44].mxu1  ;;  %v4969_v43 = vpop.f32.mrb[49].mxu0 }
 0x1c4   : > { %v5075_v47 = vpop.f32.mrb[45].mxu1  ;;  %v4970_v54 = vadd.f32 %v4969_v43, %v4968_v20  ;;  %v4971_v62 = vpop.f32.mrb[50].mxu0 }
 0x1c5   : > { %v5076_v10 = vadd.f32 %v5075_v47, %v5074_v21  ;;  %v5077_v56 = vpop.f32.mrb[46].mxu1  ;;  %v4972_v58 = vpop.f32.mrb[51].mxu0 }
 0x1c6   : > { %v5078_v37 = vpop.f32.mrb[47].mxu1  ;;  %v4973_v3 = vadd.f32 %v4972_v58, %v4971_v62  ;;  %v1028_v25 = vadd.f32 %v4970_v54, %v7105_v63 }
 0x1c7   : > { %v7204_v28 = vadd.f32 %v5076_v10, %v1026_v42  ;;  %v5079_v41 = vadd.f32 %v5078_v37, %v5077_v56  ;;  %5869 = vmatmul.mubr.bf16.gmra.mrb[156].mxu0 %v7147_v59  ;;  %v6076_v42 = vld [vmem:[#allocation11 + $0x68] sm:$0xff]  }
 0x1c8   : > { %v1029_v50 = vadd.f32 %v4973_v3, %v7105_v63  ;;  %5362 = vmatprep.subr.bf16.mxu1 %v6076_v42  ;;  %v6077_v10 = vld [vmem:[#allocation11 + $0x28] sm:$0xff]  }
 0x1c9   : > { %v7207_v13 = vadd.f32 %v5079_v41, %v1027_v44  ;;  %5363 = vmatpush3.bf16.msra.mxu1 %v6077_v10 }
 0x1ca   : > { %v4974_v8 = vpop.f32.mrb[52].mxu0 }
 0x1cb   : > { %v5080_v19 = vpop.f32.mrb[48].mxu1  ;;  %v4975_v30 = vpop.f32.mrb[53].mxu0 }
 0x1cc   : > { %v5081_v40 = vpop.f32.mrb[49].mxu1  ;;  %v4976_v39 = vadd.f32 %v4975_v30, %v4974_v8  ;;  %v4977_v33 = vpop.f32.mrb[54].mxu0 }
 0x1cd   : > { %v5082_v7 = vadd.f32 %v5081_v40, %v5080_v19  ;;  %v5083_v11 = vpop.f32.mrb[50].mxu1  ;;  %v4978_v15 = vpop.f32.mrb[55].mxu0 }
 0x1ce   : > { %v5084_v27 = vpop.f32.mrb[51].mxu1  ;;  %v4979_v49 = vadd.f32 %v4978_v15, %v4977_v33  ;;  %v1030_v48 = vadd.f32 %v4976_v39, %v7105_v63 }
 0x1cf   : > { %v7211_v18 = vadd.f32 %v5082_v7, %v1028_v25  ;;  %v5085_v51 = vadd.f32 %v5084_v27, %v5083_v11 }
 0x1d0   : > { %v1031_v47 = vadd.f32 %v4979_v49, %v7105_v63 }
 0x1d1   : > { %v7213_v52 = vadd.f32 %v5085_v51, %v1029_v50 }
 0x1d2   : > { %v4980_v9 = vpop.f32.mrb[56].mxu0 }
 0x1d3   : > { %v5086_v61 = vpop.f32.mrb[52].mxu1  ;;  %v4981_v20 = vpop.f32.mrb[57].mxu0 }
 0x1d4   : > { %v5087_v21 = vpop.f32.mrb[53].mxu1  ;;  %v4982_v43 = vadd.f32 %v4981_v20, %v4980_v9  ;;  %v4983_v34 = vpop.f32.mrb[58].mxu0 }
 0x1d5   : > { %v5088_v54 = vadd.f32 %v5087_v21, %v5086_v61  ;;  %v5089_v62 = vpop.f32.mrb[54].mxu1  ;;  %v4984_v44 = vpop.f32.mrb[59].mxu0  ;;  %v6078_v21 = vld [vmem:[#allocation11 + $0x70] sm:$0xff]  }
 0x1d6   : > { %v5090_v56 = vpop.f32.mrb[55].mxu1  ;;  %v4985_v58 = vadd.f32 %v4984_v44, %v4983_v34  ;;  %v1032_v8 = vadd.f32 %v4982_v43, %v7105_v63  ;;  %5364 = vmatprep.subr.bf16.mxu1 %v6078_v21 }
 0x1d7   : > { %v7217_v5 = vadd.f32 %v5088_v54, %v1030_v48  ;;  %v5091_v37 = vadd.f32 %v5090_v56, %v5089_v62  ;;  %v6079_v56 = vld [vmem:[#allocation11 + $0x30] sm:$0xff]  }
 0x1d8   : > { %v1033_v33 = vadd.f32 %v4985_v58, %v7105_v63  ;;  %5365 = vmatpush3.bf16.msra.mxu1 %v6079_v56 }
 0x1d9   : > { %v7219_v3 = vadd.f32 %v5091_v37, %v1031_v47 }
 0x1da   : > { %v4986_v41 = vpop.f32.mrb[60].mxu0 }
 0x1db   : > { %v5092_v25 = vpop.f32.mrb[56].mxu1  ;;  %v4987_v19 = vpop.f32.mrb[61].mxu0 }
 0x1dc   : > { %v5093_v30 = vpop.f32.mrb[57].mxu1  ;;  %v4988_v40 = vadd.f32 %v4987_v19, %v4986_v41  ;;  %v4989_v39 = vpop.f32.mrb[62].mxu0 }
 0x1dd   : > { %v5094_v50 = vadd.f32 %v5093_v30, %v5092_v25  ;;  %v5095_v7 = vpop.f32.mrb[58].mxu1  ;;  %v4990_v11 = vpop.f32.mrb[63].mxu0 }
 0x1de   : > { %v5096_v15 = vpop.f32.mrb[59].mxu1  ;;  %v4991_v27 = vadd.f32 %v4990_v11, %v4989_v39  ;;  %v1034_v61 = vadd.f32 %v4988_v40, %v7105_v63  ;;  %v6080_v39 = vld [vmem:[#allocation11 + $0xc0] sm:$0xff]  }
 0x1df   : > { %v7223_v49 = vadd.f32 %v5094_v50, %v1032_v8  ;;  %v5097_v51 = vadd.f32 %v5096_v15, %v5095_v7  ;;  %v6081_v50 = vld [vmem:[#allocation11 + $0x80] sm:$0xff]   ;;  %5464 = vmatprep.subr.bf16.mxu0 %v6080_v39 }
 0x1e0   : > { %v1035_v54 = vadd.f32 %v4991_v27, %v7105_v63  ;;  %5465 = vmatpush3.bf16.msra.mxu0 %v6081_v50  ;;  %v6088_v50 = vld [vmem:[#allocation11 + $0xd8] sm:$0xff]  }
 0x1e1   : > { %v7225_v9 = vadd.f32 %v5097_v51, %v1033_v33 }
 0x1e2   : > { %v5120_v48 = vpop.f32.mrb[64].mxu0 }
 0x1e3   : > { %v5098_v20 = vpop.f32.mrb[60].mxu1  ;;  %v5121_v42 = vpop.f32.mrb[65].mxu0 }
 0x1e4   : > { %v5099_v43 = vpop.f32.mrb[61].mxu1  ;;  %v5122_v34 = vadd.f32 %v5121_v42, %v5120_v48  ;;  %v5123_v47 = vpop.f32.mrb[66].mxu0 }
 0x1e5   : > { %v5100_v62 = vadd.f32 %v5099_v43, %v5098_v20  ;;  %v5101_v44 = vpop.f32.mrb[62].mxu1  ;;  %v5124_v10 = vpop.f32.mrb[67].mxu0  ;;  %v6083_v43 = vld [vmem:[#allocation11 + $0x88] sm:$0xff]  }
 0x1e6   : > { %v5102_v58 = vpop.f32.mrb[63].mxu1  ;;  %v1710_v37 = vadd.f32 %v5122_v34, %v7112_v0  ;;  %v5125_v41 = vadd.f32 %v5124_v10, %v5123_v47  ;;  %v6084_v47 = vld [vmem:[#allocation11 + $0x78] sm:$0xff]   ;;  %v6086_v10 = vld [vmem:[#allocation11 + $0xd0] sm:$0xff]  }
 0x1e7   : > { %v7230_v8 = vadd.f32 %v5100_v62, %v1034_v61  ;;  %v5103_v25 = vadd.f32 %v5102_v58, %v5101_v44  ;;  %v6085_v62 = vld [vmem:[#allocation11 + $0x38] sm:$0xff]   ;;  %5366 = vmatprep.subr.bf16.mxu1 %v6084_v47  ;;  %v6091_v47 = vld [vmem:[#allocation11 + $0xa0] sm:$0xff]  }
 0x1e8   : > { %v1711_v19 = vadd.f32 %v5125_v41, %v7117_v26  ;;  %v6082_v26 = vld [vmem:[#allocation11 + $0xc8] sm:$0xff]   ;;  %5367 = vmatpush3.bf16.msra.mxu1 %v6085_v62 }
 0x1e9   : > { %v7233_v30 = vadd.f32 %v5103_v25, %v1035_v54  ;;  %5466 = vmatprep.subr.bf16.mxu0 %v6082_v26  ;;  %v6090_v26 = vld [vmem:[#allocation11 + $0xe0] sm:$0xff]  }
 0x1ea   : > { %v5126_v40 = vpop.f32.mrb[68].mxu0  ;;  %5467 = vmatpush3.bf16.msra.mxu0 %v6083_v43 }
 0x1eb   : > { %v5232_v63 = vpop.f32.mrb[64].mxu1  ;;  %v5127_v33 = vpop.f32.mrb[69].mxu0  ;;  %5468 = vmatprep.subr.bf16.mxu0 %v6086_v10  ;;  %3020 = vmatmul.mubr.bf16.vlgmr.msra.gmra.mrb[128].mxu1 %v7147_v59 }
 0x1ec   : > { %v5233_v7 = vpop.f32.mrb[65].mxu1  ;;  %v5128_v11 = vadd.f32 %v5127_v33, %v5126_v40  ;;  %v5129_v15 = vpop.f32.mrb[70].mxu0 }
 0x1ed   : > { %v5234_v27 = vadd.f32 %v5233_v7, %v5232_v63  ;;  %v5235_v0 = vpop.f32.mrb[66].mxu1  ;;  %v5130_v51 = vpop.f32.mrb[71].mxu0 }
 0x1ee   : > { %v5236_v48 = vpop.f32.mrb[67].mxu1  ;;  %v1712_v61 = vadd.f32 %v5128_v11, %v7122_v36  ;;  %v5131_v20 = vadd.f32 %v5130_v51, %v5129_v15  ;;  %v6087_v36 = vld [vmem:[#allocation11 + $0x90] sm:$0xff]   ;;  %v6089_v15 = vld [vmem:[#allocation11 + $0x98] sm:$0xff]  }
 0x1ef   : > { %v5237_v42 = vadd.f32 %v5236_v48, %v5235_v0  ;;  %v7236_v21 = vadd.f32 %v5234_v27, %v1710_v37  ;;  %5469 = vmatpush3.bf16.msra.mxu0 %v6087_v36 }
 0x1f0   : > { %v1713_v34 = vadd.f32 %v5131_v20, %v7127_v46  ;;  %5470 = vmatprep.subr.bf16.mxu0 %v6088_v50 }
 0x1f1   : > { %v7239_v54 = vadd.f32 %v5237_v42, %v1711_v19 }
 0x1f2   : > { %v5132_v44 = vpop.f32.mrb[72].mxu0 }
 0x1f3   : > { %v5238_v56 = vpop.f32.mrb[68].mxu1  ;;  %v5133_v58 = vpop.f32.mrb[73].mxu0  ;;  %5471 = vmatpush3.bf16.msra.mxu0 %v6089_v15 }
 0x1f4   : > { %v5239_v41 = vpop.f32.mrb[69].mxu1  ;;  %v5134_v25 = vadd.f32 %v5133_v58, %v5132_v44  ;;  %v5135_v37 = vpop.f32.mrb[74].mxu0  ;;  %5472 = vmatprep.subr.bf16.mxu0 %v6090_v26  ;;  %v6092_v58 = vld [vmem:[#allocation11 + $0xe8] sm:$0xff]  }
 0x1f5   : > { %v5240_v40 = vadd.f32 %v5239_v41, %v5238_v56  ;;  %v5241_v39 = vpop.f32.mrb[70].mxu1  ;;  %v5136_v46 = vpop.f32.mrb[75].mxu0  ;;  %v6093_v41 = vld [vmem:[#allocation11 + $0xa8] sm:$0xff]  }
 0x1f6   : > { %v5242_v63 = vpop.f32.mrb[71].mxu1  ;;  %v1714_v19 = vadd.f32 %v5134_v25, %v7136_v12  ;;  %v5137_v33 = vadd.f32 %v5136_v46, %v5135_v37 }
 0x1f7   : > { %v5243_v7 = vadd.f32 %v5242_v63, %v5241_v39  ;;  %v7243_v11 = vadd.f32 %v5240_v40, %v1712_v61  ;;  %5473 = vmatpush3.bf16.msra.mxu0 %v6091_v47 }
 0x1f8   : > { %v1715_v27 = vadd.f32 %v5137_v33, %v7140_v35  ;;  %5474 = vmatprep.subr.bf16.mxu0 %v6092_v58 }
 0x1f9   : > { %v7246_v0 = vadd.f32 %v5243_v7, %v1713_v34 }
 0x1fa   : > { %v5138_v51 = vpop.f32.mrb[76].mxu0 }
 0x1fb   : > { %v5244_v48 = vpop.f32.mrb[72].mxu1  ;;  %v5139_v20 = vpop.f32.mrb[77].mxu0  ;;  %5475 = vmatpush3.bf16.msra.mxu0 %v6093_v41 }
 0x1fc   : > { %v5245_v42 = vpop.f32.mrb[73].mxu1  ;;  %v5140_v12 = vadd.f32 %v5139_v20, %v5138_v51  ;;  %v5141_v43 = vpop.f32.mrb[78].mxu0 }
 0x1fd   : > { %v5246_v59 = vadd.f32 %v5245_v42, %v5244_v48  ;;  %v5247_v62 = vpop.f32.mrb[74].mxu1  ;;  %v5142_v44 = vpop.f32.mrb[79].mxu0  ;;  %v6098_v42 = vld [vmem:[#allocation11 + $0xf8] sm:$0xff]  }
 0x1fe   : > { %v5248_v61 = vpop.f32.mrb[75].mxu1  ;;  %v1716_v10 = vadd.f32 %v5140_v12, %v7144_v22  ;;  %v5143_v35 = vadd.f32 %v5142_v44, %v5141_v43  ;;  %v6095_v22 = vld [vmem:[#allocation11 + $0xf0] sm:$0xff]   ;;  %v6099_v43 = vld [vmem:[#allocation11 + $0xb8] sm:$0xff]  }
 0x1ff   : > { %v5249_v34 = vadd.f32 %v5248_v61, %v5247_v62  ;;  %v7249_v56 = vadd.f32 %v5246_v59, %v1714_v19  ;;  %v6097_v19 = vld [vmem:[#allocation11 + $0xb0] sm:$0xff]   ;;  %5476 = vmatprep.subr.bf16.mxu0 %v6095_v22 }
 0x200   : > { %v1717_v36 = vadd.f32 %v5143_v35, %v7150_v60  ;;  %5477 = vmatpush3.bf16.msra.mxu0 %v6097_v19  ;;  %v6096_v19 = vld [vmem:[#allocation11 + $0x100] sm:$0xff]  }
 0x201   : > { %v7252_v25 = vadd.f32 %v5249_v34, %v1715_v27  ;;  %5478 = vmatprep.subr.bf16.mxu0 %v6098_v42 }
 0x202   : > { %v5144_v37 = vpop.f32.mrb[80].mxu0 }
 0x203   : > { %v5250_v40 = vpop.f32.mrb[76].mxu1  ;;  %v5145_v39 = vpop.f32.mrb[81].mxu0 }
 0x204   : > { %v5251_v46 = vpop.f32.mrb[77].mxu1  ;;  %v5146_v63 = vadd.f32 %v5145_v39, %v5144_v37  ;;  %v5147_v33 = vpop.f32.mrb[82].mxu0  ;;  %5479 = vmatpush3.bf16.msra.mxu0 %v6099_v43 }
 0x205   : > { %v5252_v50 = vadd.f32 %v5251_v46, %v5250_v40  ;;  %v5253_v7 = vpop.f32.mrb[78].mxu1  ;;  %v5148_v15 = vpop.f32.mrb[83].mxu0  ;;  %v6094_v46 = vld [vmem:[#allocation11 + $0x140] sm:$0xff]  }
 0x206   : > { %v5254_v51 = vpop.f32.mrb[79].mxu1  ;;  %v1718_v48 = vadd.f32 %v5146_v63, %v7154_v38  ;;  %v5149_v60 = vadd.f32 %v5148_v15, %v5147_v33  ;;  %5576 = vmatprep.subr.bf16.mxu1 %v6094_v46 }
 0x207   : > { %v5255_v27 = vadd.f32 %v5254_v51, %v5253_v7  ;;  %v7255_v20 = vadd.f32 %v5252_v50, %v1716_v10  ;;  %5577 = vmatpush3.bf16.msra.mxu1 %v6096_v19 }
 0x208   : > { %v1719_v26 = vadd.f32 %v5149_v60, %v7157_v6 }
 0x209   : > { %v7258_v12 = vadd.f32 %v5255_v27, %v1717_v36 }
 0x20a   : > { %v5150_v47 = vpop.f32.mrb[84].mxu0 }
 0x20b   : > { %v5256_v59 = vpop.f32.mrb[80].mxu1  ;;  %v5151_v62 = vpop.f32.mrb[85].mxu0 }
 0x20c   : > { %v5257_v44 = vpop.f32.mrb[81].mxu1  ;;  %v5152_v61 = vadd.f32 %v5151_v62, %v5150_v47  ;;  %v5153_v38 = vpop.f32.mrb[86].mxu0 }
 0x20d   : > { %v5258_v35 = vadd.f32 %v5257_v44, %v5256_v59  ;;  %v5259_v34 = vpop.f32.mrb[82].mxu1  ;;  %v5154_v58 = vpop.f32.mrb[87].mxu0 }
 0x20e   : > { %v5260_v10 = vpop.f32.mrb[83].mxu1  ;;  %v1720_v41 = vadd.f32 %v5152_v61, %v7162_v55  ;;  %v5155_v37 = vadd.f32 %v5154_v58, %v5153_v38 }
 0x20f   : > { %v5261_v6 = vadd.f32 %v5260_v10, %v5259_v34  ;;  %v7261_v40 = vadd.f32 %v5258_v35, %v1718_v48 }
 0x210   : > { %v1721_v36 = vadd.f32 %v5155_v37, %v7164_v57 }
 0x211   : > { %v7264_v39 = vadd.f32 %v5261_v6, %v1719_v26 }
 0x212   : > { %v5156_v63 = vpop.f32.mrb[88].mxu0 }
 0x213   : > { %v5262_v33 = vpop.f32.mrb[84].mxu1  ;;  %v5157_v22 = vpop.f32.mrb[89].mxu0 }
 0x214   : > { %v5263_v50 = vpop.f32.mrb[85].mxu1  ;;  %v5158_v7 = vadd.f32 %v5157_v22, %v5156_v63  ;;  %v5159_v15 = vpop.f32.mrb[90].mxu0 }
 0x215   : > { %v5264_v51 = vadd.f32 %v5263_v50, %v5262_v33  ;;  %v5265_v60 = vpop.f32.mrb[86].mxu1  ;;  %v5160_v55 = vpop.f32.mrb[91].mxu0 }
 0x216   : > { %v5266_v27 = vpop.f32.mrb[87].mxu1  ;;  %v1722_v48 = vadd.f32 %v5158_v7, %v7168_v31  ;;  %v5161_v42 = vadd.f32 %v5160_v55, %v5159_v15 }
 0x217   : > { %v5267_v57 = vadd.f32 %v5266_v27, %v5265_v60  ;;  %v7267_v26 = vadd.f32 %v5264_v51, %v1720_v41 }
 0x218   : > { %v1723_v43 = vadd.f32 %v5161_v42, %v7170_v2 }
 0x219   : > { %v7270_v47 = vadd.f32 %v5267_v57, %v1721_v36  ;;  %v6100_v57 = vld [vmem:[#allocation11 + $0x148] sm:$0xff]  }
 0x21a   : > { %v5162_v59 = vpop.f32.mrb[92].mxu0  ;;  %5578 = vmatprep.subr.bf16.mxu1 %v6100_v57 }
 0x21b   : > { %v5268_v62 = vpop.f32.mrb[88].mxu1  ;;  %v5163_v44 = vpop.f32.mrb[93].mxu0 }
 0x21c   : > { %v5269_v61 = vpop.f32.mrb[89].mxu1  ;;  %v5164_v38 = vadd.f32 %v5163_v44, %v5162_v59  ;;  %v5165_v35 = vpop.f32.mrb[94].mxu0 }
 0x21d   : > { %v5270_v34 = vadd.f32 %v5269_v61, %v5268_v62  ;;  %v5271_v58 = vpop.f32.mrb[90].mxu1  ;;  %v5166_v10 = vpop.f32.mrb[95].mxu0  ;;  %v6101_v62 = vld [vmem:[#allocation11 + $0x108] sm:$0xff]  }
 0x21e   : > { %v5272_v37 = vpop.f32.mrb[91].mxu1  ;;  %v1724_v31 = vadd.f32 %v5164_v38, %v7174_v45  ;;  %v5167_v6 = vadd.f32 %v5166_v10, %v5165_v35  ;;  %5579 = vmatpush3.bf16.msra.mxu1 %v6101_v62 }
 0x21f   : > { %v5273_v46 = vadd.f32 %v5272_v37, %v5271_v58  ;;  %v7273_v41 = vadd.f32 %v5270_v34, %v1722_v48 }
 0x220   : > { %v1725_v2 = vadd.f32 %v5167_v6, %v7176_v14 }
 0x221   : > { %v7276_v36 = vadd.f32 %v5273_v46, %v1723_v43 }
 0x222   : > { %v5168_v63 = vpop.f32.mrb[96].mxu0 }
 0x223   : > { %v5274_v33 = vpop.f32.mrb[92].mxu1  ;;  %v5169_v22 = vpop.f32.mrb[97].mxu0 }
 0x224   : > { %v5275_v50 = vpop.f32.mrb[93].mxu1  ;;  %v5170_v7 = vadd.f32 %v5169_v22, %v5168_v63  ;;  %v5171_v15 = vpop.f32.mrb[98].mxu0 }
 0x225   : > { %v5276_v19 = vadd.f32 %v5275_v50, %v5274_v33  ;;  %v5277_v51 = vpop.f32.mrb[94].mxu1  ;;  %v5172_v60 = vpop.f32.mrb[99].mxu0 }
 0x226   : > { %v5278_v55 = vpop.f32.mrb[95].mxu1  ;;  %v1726_v45 = vadd.f32 %v5170_v7, %v7180_v24  ;;  %v5173_v27 = vadd.f32 %v5172_v60, %v5171_v15 }
 0x227   : > { %v5279_v42 = vadd.f32 %v5278_v55, %v5277_v51  ;;  %v7279_v48 = vadd.f32 %v5276_v19, %v1724_v31 }
 0x228   : > { %v1727_v14 = vadd.f32 %v5173_v27, %v7184_v4 }
 0x229   : > { %v7282_v43 = vadd.f32 %v5279_v42, %v1725_v2 }
 0x22a   : > { %v5174_v59 = vpop.f32.mrb[100].mxu0 }
 0x22b   : > { %v5280_v44 = vpop.f32.mrb[96].mxu1  ;;  %v5175_v61 = vpop.f32.mrb[101].mxu0 }
 0x22c   : > { %v5281_v38 = vpop.f32.mrb[97].mxu1  ;;  %v5176_v35 = vadd.f32 %v5175_v61, %v5174_v59  ;;  %v5177_v34 = vpop.f32.mrb[102].mxu0  ;;  %v6102_v61 = vld [vmem:[#allocation11 + $0x150] sm:$0xff]  }
 0x22d   : > { %v5282_v58 = vadd.f32 %v5281_v38, %v5280_v44  ;;  %v5283_v24 = vpop.f32.mrb[98].mxu1  ;;  %v5178_v10 = vpop.f32.mrb[103].mxu0  ;;  %5580 = vmatprep.subr.bf16.mxu1 %v6102_v61 }
 0x22e   : > { %v5284_v37 = vpop.f32.mrb[99].mxu1  ;;  %v1728_v31 = vadd.f32 %v5176_v35, %v7188_v23  ;;  %v5179_v6 = vadd.f32 %v5178_v10, %v5177_v34 }
 0x22f   : > { %v5285_v46 = vadd.f32 %v5284_v37, %v5283_v24  ;;  %v7285_v4 = vadd.f32 %v5282_v58, %v1726_v45 }
 0x230   : > { %v1729_v2 = vadd.f32 %v5179_v6, %v7192_v29 }
 0x231   : > { %v7288_v63 = vadd.f32 %v5285_v46, %v1727_v14 }
 0x232   : > { %v5180_v33 = vpop.f32.mrb[104].mxu0 }
 0x233   : > { %v5286_v22 = vpop.f32.mrb[100].mxu1  ;;  %v5181_v50 = vpop.f32.mrb[105].mxu0 }
 0x234   : > { %v5287_v7 = vpop.f32.mrb[101].mxu1  ;;  %v5182_v15 = vadd.f32 %v5181_v50, %v5180_v33  ;;  %v5183_v19 = vpop.f32.mrb[106].mxu0 }
 0x235   : > { %v5288_v51 = vadd.f32 %v5287_v7, %v5286_v22  ;;  %v5289_v60 = vpop.f32.mrb[102].mxu1  ;;  %v5184_v55 = vpop.f32.mrb[107].mxu0 }
 0x236   : > { %v5290_v27 = vpop.f32.mrb[103].mxu1  ;;  %v1730_v23 = vadd.f32 %v5182_v15, %v7196_v53  ;;  %v5185_v42 = vadd.f32 %v5184_v55, %v5183_v19 }
 0x237   : > { %v5291_v57 = vadd.f32 %v5290_v27, %v5289_v60  ;;  %v7291_v45 = vadd.f32 %v5288_v51, %v1728_v31 }
 0x238   : > { %v1731_v29 = vadd.f32 %v5185_v42, %v7200_v16 }
 0x239   : > { %v7294_v14 = vadd.f32 %v5291_v57, %v1729_v2  ;;  %v6103_v2 = vld [vmem:[#allocation11 + $0x110] sm:$0xff]   ;;  %v6104_v57 = vld [vmem:[#allocation11 + $0x158] sm:$0xff]  }
 0x23a   : > { %v5186_v59 = vpop.f32.mrb[108].mxu0  ;;  %5581 = vmatpush3.bf16.msra.mxu1 %v6103_v2 }
 0x23b   : > { %v5292_v62 = vpop.f32.mrb[104].mxu1  ;;  %v5187_v44 = vpop.f32.mrb[109].mxu0  ;;  %5582 = vmatprep.subr.bf16.mxu1 %v6104_v57 }
 0x23c   : > { %v5293_v38 = vpop.f32.mrb[105].mxu1  ;;  %v5188_v35 = vadd.f32 %v5187_v44, %v5186_v59  ;;  %v5189_v34 = vpop.f32.mrb[110].mxu0 }
 0x23d   : > { %v5294_v58 = vadd.f32 %v5293_v38, %v5292_v62  ;;  %v5295_v24 = vpop.f32.mrb[106].mxu1  ;;  %v5190_v10 = vpop.f32.mrb[111].mxu0 }
 0x23e   : > { %v5296_v53 = vpop.f32.mrb[107].mxu1  ;;  %v1732_v37 = vadd.f32 %v5188_v35, %v7204_v28  ;;  %v5191_v31 = vadd.f32 %v5190_v10, %v5189_v34 }
 0x23f   : > { %v5297_v6 = vadd.f32 %v5296_v53, %v5295_v24  ;;  %v7297_v46 = vadd.f32 %v5294_v58, %v1730_v23 }
 0x240   : > { %v1733_v16 = vadd.f32 %v5191_v31, %v7207_v13 }
 0x241   : > { %v7300_v33 = vadd.f32 %v5297_v6, %v1731_v29 }
 0x242   : > { %v5192_v22 = vpop.f32.mrb[112].mxu0 }
 0x243   : > { %v5298_v50 = vpop.f32.mrb[108].mxu1  ;;  %v5193_v7 = vpop.f32.mrb[113].mxu0 }
 0x244   : > { %v5299_v15 = vpop.f32.mrb[109].mxu1  ;;  %v5194_v19 = vadd.f32 %v5193_v7, %v5192_v22  ;;  %v5195_v51 = vpop.f32.mrb[114].mxu0 }
 0x245   : > { %v5300_v60 = vadd.f32 %v5299_v15, %v5298_v50  ;;  %v5301_v55 = vpop.f32.mrb[110].mxu1  ;;  %v5196_v27 = vpop.f32.mrb[115].mxu0 }
 0x246   : > { %v5302_v28 = vpop.f32.mrb[111].mxu1  ;;  %v1734_v42 = vadd.f32 %v5194_v19, %v7211_v18  ;;  %v5197_v23 = vadd.f32 %v5196_v27, %v5195_v51  ;;  %v6105_v18 = vld [vmem:[#allocation11 + $0x118] sm:$0xff]  }
 0x247   : > { %v5303_v59 = vadd.f32 %v5302_v28, %v5301_v55  ;;  %v7303_v13 = vadd.f32 %v5300_v60, %v1732_v37  ;;  %5583 = vmatpush3.bf16.msra.mxu1 %v6105_v18 }
 0x248   : > { %v1735_v29 = vadd.f32 %v5197_v23, %v7213_v52 }
 0x249   : > { %v7306_v62 = vadd.f32 %v5303_v59, %v1733_v16  ;;  %v6108_v59 = vld [vmem:[#allocation11 + $0x160] sm:$0xff]  }
 0x24a   : > { %v5198_v44 = vpop.f32.mrb[116].mxu0  ;;  %5584 = vmatprep.subr.bf16.mxu1 %v6108_v59 }
 0x24b   : > { %v5304_v61 = vpop.f32.mrb[112].mxu1  ;;  %v5199_v38 = vpop.f32.mrb[117].mxu0 }
 0x24c   : > { %v5305_v35 = vpop.f32.mrb[113].mxu1  ;;  %v5200_v34 = vadd.f32 %v5199_v38, %v5198_v44  ;;  %v5201_v58 = vpop.f32.mrb[118].mxu0 }
 0x24d   : > { %v5306_v24 = vadd.f32 %v5305_v35, %v5304_v61  ;;  %v5307_v10 = vpop.f32.mrb[114].mxu1  ;;  %v5202_v53 = vpop.f32.mrb[119].mxu0 }
 0x24e   : > { %v5308_v31 = vpop.f32.mrb[115].mxu1  ;;  %v1736_v6 = vadd.f32 %v5200_v34, %v7217_v5  ;;  %v5203_v37 = vadd.f32 %v5202_v53, %v5201_v58 }
 0x24f   : > { %v5309_v2 = vadd.f32 %v5308_v31, %v5307_v10  ;;  %v7309_v22 = vadd.f32 %v5306_v24, %v1734_v42  ;;  %v6106_v42 = vld [vmem:[#allocation11 + $0x1c0] sm:$0xff]  }
 0x250   : > { %v1737_v52 = vadd.f32 %v5203_v37, %v7219_v3  ;;  %5688 = vmatprep.subr.bf16.mxu0 %v6106_v42  ;;  %v6109_v31 = vld [vmem:[#allocation11 + $0x120] sm:$0xff]  }
 0x251   : > { %v7312_v16 = vadd.f32 %v5309_v2, %v1735_v29  ;;  %5585 = vmatpush3.bf16.msra.mxu1 %v6109_v31 }
 0x252   : > { %v5204_v50 = vpop.f32.mrb[120].mxu0 }
 0x253   : > { %v5310_v7 = vpop.f32.mrb[116].mxu1  ;;  %v5205_v15 = vpop.f32.mrb[121].mxu0 }
 0x254   : > { %v5311_v19 = vpop.f32.mrb[117].mxu1  ;;  %v5206_v51 = vadd.f32 %v5205_v15, %v5204_v50  ;;  %v5207_v60 = vpop.f32.mrb[122].mxu0 }
 0x255   : > { %v5312_v55 = vadd.f32 %v5311_v19, %v5310_v7  ;;  %v5313_v27 = vpop.f32.mrb[118].mxu1  ;;  %v5208_v28 = vpop.f32.mrb[123].mxu0 }
 0x256   : > { %v5314_v23 = vpop.f32.mrb[119].mxu1  ;;  %v1738_v5 = vadd.f32 %v5206_v51, %v7223_v49  ;;  %v5209_v57 = vadd.f32 %v5208_v28, %v5207_v60 }
 0x257   : > { %v5315_v44 = vadd.f32 %v5314_v23, %v5313_v27  ;;  %v7315_v61 = vadd.f32 %v5312_v55, %v1736_v6  ;;  %v7327_v27 = vstv %s301_s13 }
 0x258   : > { %v1739_v3 = vadd.f32 %v5209_v57, %v7225_v9 }
 0x259   : > { %v7318_v29 = vadd.f32 %v5315_v44, %v1737_v52 }
 0x25a   : > { %v5210_v38 = vpop.f32.mrb[124].mxu0 }
 0x25b   : > { %v5316_v35 = vpop.f32.mrb[120].mxu1  ;;  %v5211_v34 = vpop.f32.mrb[125].mxu0 }
 0x25c   : > { %v5317_v58 = vpop.f32.mrb[121].mxu1  ;;  %v5212_v24 = vadd.f32 %v5211_v34, %v5210_v38  ;;  %v5213_v10 = vpop.f32.mrb[126].mxu0  ;;  %v6112_v38 = vld [vmem:[#allocation11 + $0x168] sm:$0xff]  }
 0x25d   : > { %v5318_v49 = vadd.f32 %v5317_v58, %v5316_v35  ;;  %v5319_v53 = vpop.f32.mrb[122].mxu1  ;;  %v5214_v18 = vpop.f32.mrb[127].mxu0  ;;  %5586 = vmatprep.subr.bf16.mxu1 %v6112_v38 }
 0x25e   : > { %v5320_v37 = vpop.f32.mrb[123].mxu1  ;;  %v1740_v6 = vadd.f32 %v5212_v24, %v7230_v8  ;;  %v5215_v2 = vadd.f32 %v5214_v18, %v5213_v10 }
 0x25f   : > { %v5321_v9 = vadd.f32 %v5320_v37, %v5319_v53  ;;  %v7321_v50 = vadd.f32 %v5318_v49, %v1738_v5 }
 0x260   : > { %v1741_v52 = vadd.f32 %v5215_v2, %v7233_v30 }
 0x261   : > { %v7324_v7 = vadd.f32 %v5321_v9, %v1739_v3 }
 0x262   : > { %v5842_v15 = vpop.f32.mrb[128].mxu0 }
 0x263   : > { %v5322_v19 = vpop.f32.mrb[124].mxu1  ;;  %v2341_v51 = vadd.f32 %v5842_v15, %v7243_v11  ;;  %v2212_v60 = vpop.f32.mrb[129].mxu0 }
 0x264   : > { %v5323_v55 = vpop.f32.mrb[125].mxu1  ;;  %v2339_v28 = vadd.f32 %v2212_v60, %v7236_v21  ;;  %v5843_v8 = vpop.f32.mrb[130].mxu0 }
 0x265   : > { %v5324_v23 = vadd.f32 %v5323_v55, %v5322_v19  ;;  %v5325_v57 = vpop.f32.mrb[126].mxu1  ;;  %v2405_v5 = vmin.f32 %v2341_v51, 0.0  ;;  %v2342_v42 = vadd.f32 %v5843_v8, %v7246_v0  ;;  %v2215_v59 = vpop.f32.mrb[131].mxu0  ;;  %v2373_v11 = vmax.f32 %v2341_v51, 0.0 }
 0x266   : > { %v5326_v30 = vpop.f32.mrb[127].mxu1  ;;  %v2403_v44 = vmin.f32 %v2339_v28, 0.0  ;;  %v2340_v3 = vadd.f32 %v2215_v59, %v7239_v54  ;;  %v2371_v24 = vmax.f32 %v2339_v28, 0.0 }
 0x267   : > { %v5327_v35 = vadd.f32 %v5326_v30, %v5325_v57  ;;  %v2438_v34 = vmul.f32 %v7327_v27, %v2405_v5  ;;  %v2406_v58 = vmin.f32 %v2342_v42, 0.0  ;;  %v7334_v49 = vadd.f32 %v5324_v23, %v1740_v6 }
 0x268   : > { %v2436_v21 = vmul.f32 %v7327_v27, %v2403_v44  ;;  %v2404_v10 = vmin.f32 %v2340_v3, 0.0  ;;  %v2374_v0 = vmax.f32 %v2342_v42, 0.0  ;;  %v2372_v37 = vmax.f32 %v2340_v3, 0.0  ;;  %v6113_v44 = vld [vmem:[#allocation11 + $0x128] sm:$0xff]  }
 0x269   : > { %v2470_v53 = vadd.f32 %v2438_v34, %v2373_v11  ;;  %v2439_v18 = vmul.f32 %v7327_v27, %v2406_v58  ;;  %v7337_v31 = vadd.f32 %v5327_v35, %v1741_v52  ;;  %5587 = vmatpush3.bf16.msra.mxu1 %v6113_v44 }
 0x26a   : > { %v2468_v54 = vadd.f32 %v2436_v21, %v2371_v24  ;;  %v2437_v2 = vmul.f32 %v7327_v27, %v2404_v10  ;;  %v5846_v9 = vpop.f32.mrb[132].mxu0 }
 0x26b   : > { %v2533_v15 = vrot.slane %v2470_v53, 7  ;;  %v2677_v19 = vrot.slane %v2470_v53, 1  ;;  %v2471_v51 = vadd.f32 %v2439_v18, %v2374_v0  ;;  %v2345_v60 = vadd.f32 %v5846_v9, %v7255_v20  ;;  %v2228_v55 = vpop.f32.mrb[133].mxu0 }
 0x26c   : > { %v2532_v6 = vrot.slane %v2468_v54, 7  ;;  %v2676_v28 = vrot.slane %v2468_v54, 1  ;;  %v2469_v8 = vadd.f32 %v2437_v2, %v2372_v37  ;;  %v2343_v23 = vadd.f32 %v2228_v55, %v7249_v56  ;;  %v5847_v57 = vpop.f32.mrb[134].mxu0 }
 0x26d   : > { %v2549_v5 = vrot.slane %v2471_v51, 7  ;;  %v2693_v52 = vrot.slane %v2471_v51, 1  ;;  %v2377_v42 = vmax.f32 %v2345_v60, 0.0  ;;  %v2409_v59 = vmin.f32 %v2345_v60, 0.0  ;;  %v2231_v30 = vpop.f32.mrb[135].mxu0 }
 0x26e   : > { %v2548_v3 = vrot.slane %v2469_v8, 7  ;;  %v2692_v38 = vrot.slane %v2469_v8, 1  ;;  %v2375_v35 = vmax.f32 %v2343_v23, 0.0  ;;  %v2407_v11 = vmin.f32 %v2343_v23, 0.0 }
 0x26f   : > { %v2565_v20 = vsel %vm410_vm3, %v2533_v15, %v2549_v5  ;;  %v2581_v34 = vsel %vm410_vm3, %v2549_v5, %v2533_v15  ;;  %v2709_v56 = vsel %vm559_vm4, %v2677_v19, %v2693_v52  ;;  %v2725_v58 = vsel %vm559_vm4, %v2693_v52, %v2677_v19 }
 0x270   : > { %v2597_v24 = vpack.c.bf16 %v2565_v20, %v2581_v34  ;;  %v2741_v21 = vpack.c.bf16 %v2725_v58, %v2709_v56  ;;  %v2564_v10 = vsel %vm410_vm3, %v2532_v6, %v2548_v3  ;;  %v2580_v0 = vsel %vm410_vm3, %v2548_v3, %v2532_v6 }
 0x271   : > { %v2596_v18 = vpack.c.bf16 %v2564_v10, %v2580_v0  ;;  %v2708_v37 = vsel %vm559_vm4, %v2676_v28, %v2692_v38  ;;  %v2724_v2 = vsel %vm559_vm4, %v2692_v38, %v2676_v28  ;;  %v2442_v9 = vmul.f32 %v7327_v27, %v2409_v59 }
 0x272   : > { %2613 = vst [vmem:[#allocation2 + $0x10] sm:$0xff] %v2597_v24  ;;  %2757 = vst [vmem:[#allocation4 + $0x10] sm:$0xff] %v2741_v21  ;;  %v2740_v15 = vpack.c.bf16 %v2724_v2, %v2708_v37  ;;  %v2440_v19 = vmul.f32 %v7327_v27, %v2407_v11  ;;  %v2346_v60 = vadd.f32 %v5847_v57, %v7258_v12  ;;  %v5850_v23 = vpop.f32.mrb[136].mxu0 }
 0x273   : > { %v2344_v55 = vadd.f32 %v2231_v30, %v7252_v25  ;;  %2612 = vst [vmem:[#allocation2 + $0x8] sm:$0xff] %v2596_v18  ;;  %v7362_v6 = vadd.f32 %v2442_v9, %v2377_v42  ;;  %v7364_v5 = vpack.c.bf16 %v2469_v8, %v2468_v54  ;;  %v2349_v52 = vadd.f32 %v5850_v23, %v7267_v26  ;;  %v2244_v28 = vpop.f32.mrb[137].mxu0 }
 0x274   : > { %v7367_v44 = vpack.c.bf16 %v2471_v51, %v2470_v53  ;;  %2756 = vst [vmem:[#allocation4 + $0x8] sm:$0xff] %v2740_v15  ;;  %v7369_v59 = vadd.f32 %v2440_v19, %v2375_v35  ;;  %v2410_v3 = vmin.f32 %v2346_v60, 0.0  ;;  %v5851_v38 = vpop.f32.mrb[138].mxu0  ;;  %v2378_v57 = vmax.f32 %v2346_v60, 0.0  ;;  %v6116_v51 = vld [vmem:[#allocation11 + $0x170] sm:$0xff]  }
 0x275   : > { %v2535_v12 = vrot.slane %v7362_v6, 7  ;;  %v2376_v25 = vmax.f32 %v2344_v55, 0.0  ;;  %v2408_v30 = vmin.f32 %v2344_v55, 0.0  ;;  %3027 = vmatprep.mubr.bf16.mxu1 %v7364_v5  ;;  %v2247_v42 = vpop.f32.mrb[139].mxu0  ;;  %v2679_v54 = vrot.slane %v7362_v6, 1  ;;  %5588 = vmatprep.subr.bf16.mxu1 %v6116_v51 }
 0x276   : > { %v2443_v26 = vmul.f32 %v7327_v27, %v2410_v3  ;;  %v2381_v8 = vmax.f32 %v2349_v52, 0.0  ;;  %v2413_v53 = vmin.f32 %v2349_v52, 0.0  ;;  %v2347_v11 = vadd.f32 %v2244_v28, %v7261_v40 }
 0x277   : > { %v2441_v35 = vmul.f32 %v7327_v27, %v2408_v30  ;;  %v2350_v20 = vadd.f32 %v5851_v38, %v7270_v47  ;;  %v7379_v34 = vadd.f32 %v2247_v42, %v7264_v39  ;;  %v2534_v56 = vrot.slane %v7369_v59, 7 }
 0x278   : > { %v2678_v58 = vrot.slane %v7369_v59, 1  ;;  %v7383_v24 = vadd.f32 %v2443_v26, %v2378_v57  ;;  %v2446_v21 = vmul.f32 %v7327_v27, %v2413_v53  ;;  %v2379_v0 = vmax.f32 %v2347_v11, 0.0  ;;  %v6117_v53 = vld [vmem:[#allocation11 + $0x130] sm:$0xff]  }
 0x279   : > { %v7386_v10 = vadd.f32 %v2441_v35, %v2376_v25  ;;  %v2411_v18 = vmin.f32 %v2347_v11, 0.0  ;;  %v2382_v37 = vmax.f32 %v2350_v20, 0.0  ;;  %v2414_v2 = vmin.f32 %v2350_v20, 0.0  ;;  %5589 = vmatpush3.bf16.msra.mxu1 %v6117_v53 }
 0x27a   : > { %v2551_v40 = vrot.slane %v7383_v24, 7  ;;  %v2695_v47 = vrot.slane %v7383_v24, 1  ;;  %v7390_v39 = vadd.f32 %v2446_v21, %v2381_v8  ;;  %v5854_v9 = vpop.f32.mrb[140].mxu0  ;;  %v2380_v55 = vmax.f32 %v7379_v34, 0.0 }
 0x27b   : > { %v2550_v15 = vrot.slane %v7386_v10, 7  ;;  %v2694_v19 = vrot.slane %v7386_v10, 1  ;;  %v2444_v60 = vmul.f32 %v7327_v27, %v2411_v18  ;;  %v2260_v23 = vpop.f32.mrb[141].mxu0  ;;  %v2412_v18 = vmin.f32 %v7379_v34, 0.0 }
 0x27c   : > { %v2567_v52 = vsel %vm410_vm3, %v2535_v12, %v2551_v40  ;;  %v2583_v28 = vsel %vm410_vm3, %v2551_v40, %v2535_v12  ;;  %v2711_v3 = vsel %vm559_vm4, %v2679_v54, %v2695_v47  ;;  %v2727_v38 = vsel %vm559_vm4, %v2695_v47, %v2679_v54  ;;  %v5855_v57 = vpop.f32.mrb[142].mxu0 }
 0x27d   : > { %v2599_v25 = vpack.c.bf16 %v2567_v52, %v2583_v28  ;;  %v2743_v30 = vpack.c.bf16 %v2727_v38, %v2711_v3  ;;  %v2566_v42 = vsel %vm410_vm3, %v2534_v56, %v2550_v15  ;;  %v2582_v26 = vsel %vm410_vm3, %v2550_v15, %v2534_v56  ;;  %v2263_v8 = vpop.f32.mrb[143].mxu0 }
 0x27e   : > { %v2598_v51 = vpack.c.bf16 %v2566_v42, %v2582_v26  ;;  %v2710_v12 = vsel %vm559_vm4, %v2678_v58, %v2694_v19  ;;  %v2726_v35 = vsel %vm559_vm4, %v2694_v19, %v2678_v58  ;;  %v2537_v54 = vrot.slane %v7390_v39, 7 }
 0x27f   : > { %2615 = vst [vmem:[#allocation2 + $0x20] sm:$0xff] %v2599_v25  ;;  %2759 = vst [vmem:[#allocation4 + $0x20] sm:$0xff] %v2743_v30  ;;  %v2742_v11 = vpack.c.bf16 %v2726_v35, %v2710_v12  ;;  %v2681_v20 = vrot.slane %v7390_v39, 1  ;;  %v7414_v21 = vadd.f32 %v2444_v60, %v2379_v0  ;;  %v2447_v56 = vmul.f32 %v7327_v27, %v2414_v2 }
 0x280   : > { %2614 = vst [vmem:[#allocation2 + $0x18] sm:$0xff] %v2598_v51  ;;  %v2353_v40 = vadd.f32 %v5854_v9, %v7279_v48  ;;  %v2351_v47 = vadd.f32 %v2260_v23, %v7273_v41  ;;  %v2354_v58 = vadd.f32 %v5855_v57, %v7282_v43  ;;  %v2352_v0 = vadd.f32 %v2263_v8, %v7276_v36 }
 0x281   : > { %2758 = vst [vmem:[#allocation4 + $0x18] sm:$0xff] %v2742_v11  ;;  %v2536_v15 = vrot.slane %v7414_v21, 7  ;;  %v2680_v19 = vrot.slane %v7414_v21, 1  ;;  %v7423_v52 = vadd.f32 %v2447_v56, %v2382_v37  ;;  %v2445_v2 = vmul.f32 %v7327_v27, %v2412_v18 }
 0x282   : > { %v2385_v60 = vmax.f32 %v2353_v40, 0.0  ;;  %v2417_v28 = vmin.f32 %v2353_v40, 0.0  ;;  %v2383_v34 = vmax.f32 %v2351_v47, 0.0  ;;  %v5858_v3 = vpop.f32.mrb[144].mxu0  ;;  %v2415_v43 = vmin.f32 %v2351_v47, 0.0 }
 0x283   : > { %v2553_v48 = vrot.slane %v7423_v52, 7  ;;  %v2697_v41 = vrot.slane %v7423_v52, 1  ;;  %v2386_v9 = vmax.f32 %v2354_v58, 0.0  ;;  %v2276_v23 = vpop.f32.mrb[145].mxu0  ;;  %v7429_v38 = vadd.f32 %v2445_v2, %v2380_v55  ;;  %v2628_v2 = vld [vmem:[#allocation2 + $0x8] sm:$0x1] }
 0x284   : > { %v2450_v37 = vmul.f32 %v7327_v27, %v2417_v28  ;;  %v2418_v57 = vmin.f32 %v2354_v58, 0.0  ;;  %v2384_v25 = vmax.f32 %v2352_v0, 0.0  ;;  %v5859_v36 = vpop.f32.mrb[146].mxu0  ;;  %v2448_v56 = vmul.f32 %v7327_v27, %v2415_v43 }
 0x285   : > { %v2569_v30 = vsel %vm410_vm3, %v2537_v54, %v2553_v48  ;;  %v2585_v42 = vsel %vm410_vm3, %v2553_v48, %v2537_v54  ;;  %v2713_v26 = vsel %vm559_vm4, %v2681_v20, %v2697_v41  ;;  %v2729_v8 = vsel %vm559_vm4, %v2697_v41, %v2681_v20  ;;  %v2279_v53 = vpop.f32.mrb[147].mxu0 }
 0x286   : > { %v2601_v55 = vpack.c.bf16 %v2569_v30, %v2585_v42  ;;  %v2745_v51 = vpack.c.bf16 %v2729_v8, %v2713_v26  ;;  %v2552_v12 = vrot.slane %v7429_v38, 7  ;;  %v2696_v35 = vrot.slane %v7429_v38, 1 }
 0x287   : > { %v7442_v11 = vadd.f32 %v2450_v37, %v2385_v60  ;;  %v2451_v18 = vmul.f32 %v7327_v27, %v2418_v57  ;;  %v2416_v54 = vmin.f32 %v2352_v0, 0.0  ;;  %v6120_v60 = vld [vmem:[#allocation11 + $0x178] sm:$0xff]   ;;  %v7456_v43 = vadd.f32 %v2448_v56, %v2383_v34 }
 0x288   : > { %2617 = vst [vmem:[#allocation2 + $0x30] sm:$0xff] %v2601_v55  ;;  %2761 = vst [vmem:[#allocation4 + $0x30] sm:$0xff] %v2745_v51  ;;  %v2568_v40 = vsel %vm410_vm3, %v2536_v15, %v2552_v12  ;;  %v2584_v20 = vsel %vm410_vm3, %v2552_v12, %v2536_v15  ;;  %v2712_v47 = vsel %vm559_vm4, %v2680_v19, %v2696_v35  ;;  %5590 = vmatprep.subr.bf16.mxu1 %v6120_v60 }
 0x289   : > { %v2728_v58 = vsel %vm559_vm4, %v2696_v35, %v2680_v19  ;;  %v2600_v28 = vpack.c.bf16 %v2568_v40, %v2584_v20  ;;  %v2539_v0 = vrot.slane %v7442_v11, 7  ;;  %v2683_v41 = vrot.slane %v7442_v11, 1 }
 0x28a   : > { %v2744_v48 = vpack.c.bf16 %v2728_v58, %v2712_v47  ;;  %v7458_v37 = vadd.f32 %v2451_v18, %v2386_v9  ;;  %v2449_v15 = vmul.f32 %v7327_v27, %v2416_v54  ;;  %v2357_v57 = vadd.f32 %v5858_v3, %v7291_v45  ;;  %v7462_v30 = vpop.f32.mrb[148].mxu0 }
 0x28b   : > { %2616 = vst [vmem:[#allocation2 + $0x28] sm:$0xff] %v2600_v28  ;;  %v2355_v19 = vadd.f32 %v2276_v23, %v7285_v4  ;;  %v2358_v42 = vadd.f32 %v5859_v36, %v7294_v14  ;;  %v2629_v26 = vsel %vm6584_vm6, 0, %v2628_v2  ;;  %v7469_v34 = vadd.f32 %v2279_v53, %v7288_v63  ;;  %v2292_v9 = vpop.f32.mrb[149].mxu0  ;;  %v6121_v63 = vld [vmem:[#allocation11 + $0x138] sm:$0xff]   ;;  %v2631_v28 = vld [vmem:[#allocation2 + $0x10] sm:$0x1] }
 0x28c   : > { %2760 = vst [vmem:[#allocation4 + $0x28] sm:$0xff] %v2744_v48  ;;  %v2538_v8 = vrot.slane %v7456_v43, 7  ;;  %v2682_v45 = vrot.slane %v7456_v43, 1  ;;  %v2555_v3 = vrot.slane %v7458_v37, 7  ;;  %v2699_v55 = vrot.slane %v7458_v37, 1  ;;  %v7475_v51 = vpop.f32.mrb[150].mxu0  ;;  %5591 = vmatpush3.bf16.msra.mxu1 %v6121_v63 }
 0x28d   : > { %2630 = vst [vmem:[#allocation2 + $0x8] sm:$0x1] %v2629_v26  ;;  %v7477_v4 = vadd.f32 %v2449_v15, %v2384_v25  ;;  %v2389_v14 = vmax.f32 %v2357_v57, 0.0  ;;  %v2421_v23 = vmin.f32 %v2357_v57, 0.0  ;;  %v2387_v36 = vmax.f32 %v2355_v19, 0.0  ;;  %v7479_v12 = vpop.f32.mrb[151].mxu0 }
 0x28e   : > { %v2571_v53 = vsel %vm410_vm3, %v2539_v0, %v2555_v3  ;;  %v2587_v35 = vsel %vm410_vm3, %v2555_v3, %v2539_v0  ;;  %v2715_v56 = vsel %vm559_vm4, %v2683_v41, %v2699_v55  ;;  %v2731_v18 = vsel %vm559_vm4, %v2699_v55, %v2683_v41  ;;  %v2772_v3 = vld [vmem:[#allocation4 + $0x8] sm:$0x80] }
 0x28f   : > { %v2603_v25 = vpack.c.bf16 %v2571_v53, %v2587_v35  ;;  %v2747_v54 = vpack.c.bf16 %v2731_v18, %v2715_v56  ;;  %v2554_v40 = vrot.slane %v7477_v4, 7  ;;  %v2698_v20 = vrot.slane %v7477_v4, 1 }
 0x290   : > { %v2454_v47 = vmul.f32 %v7327_v27, %v2421_v23  ;;  %v2419_v58 = vmin.f32 %v2355_v19, 0.0  ;;  %v2390_v2 = vmax.f32 %v2358_v42, 0.0  ;;  %v2422_v60 = vmin.f32 %v2358_v42, 0.0  ;;  %v6107_v23 = vld [vmem:[#allocation11 + $0x180] sm:$0xff]  }
 0x291   : > { %2619 = vst [vmem:[#allocation2 + $0x40] sm:$0xff] %v2603_v25  ;;  %2763 = vst [vmem:[#allocation4 + $0x40] sm:$0xff] %v2747_v54  ;;  %v2570_v48 = vsel %vm410_vm3, %v2538_v8, %v2554_v40  ;;  %v2586_v0 = vsel %vm410_vm3, %v2554_v40, %v2538_v8  ;;  %v2714_v41 = vsel %vm559_vm4, %v2682_v45, %v2698_v20  ;;  %v2388_v8 = vmax.f32 %v7469_v34, 0.0 }
 0x292   : > { %v2730_v15 = vsel %vm559_vm4, %v2698_v20, %v2682_v45  ;;  %v2602_v57 = vpack.c.bf16 %v2570_v48, %v2586_v0  ;;  %v7500_v19 = vadd.f32 %v2454_v47, %v2389_v14  ;;  %v2452_v42 = vmul.f32 %v7327_v27, %v2419_v58  ;;  %v7503_v55 = vpop.f32.mrb[152].mxu0  ;;  %v6110_v14 = vld [vmem:[#allocation11 + $0x1c8] sm:$0xff]   ;;  %v6139_v58 = vld [vmem:[#allocation2] sm:$0xff] }
 0x293   : > { %v2746_v26 = vpack.c.bf16 %v2730_v15, %v2714_v41  ;;  %v2455_v63 = vmul.f32 %v7327_v27, %v2422_v60  ;;  %v2420_v35 = vmin.f32 %v7469_v34, 0.0  ;;  %v2632_v45 = vsel %vm6584_vm6, 0, %v2631_v28  ;;  %v7510_v56 = vpop.f32.mrb[153].mxu0  ;;  %v6111_v0 = vld [vmem:[#allocation11 + $0x188] sm:$0xff]  }
 0x294   : > { %v2828_v53 = vld [vmem:[#allocation2 + $0x8] sm:$0xff]  ;;  %2618 = vst [vmem:[#allocation2 + $0x38] sm:$0xff] %v2602_v57  ;;  %v2541_v18 = vrot.slane %v7500_v19, 7  ;;  %v2685_v25 = vrot.slane %v7500_v19, 1  ;;  %v7514_v54 = vadd.f32 %v2452_v42, %v2387_v36  ;;  %2633 = vst [vmem:[#allocation2 + $0x10] sm:$0x1] %v2632_v45  ;;  %v2361_v34 = vadd.f32 %v7462_v30, %v7303_v13 }
 0x295   : > { %2762 = vst [vmem:[#allocation4 + $0x38] sm:$0xff] %v2746_v26  ;;  %3028 = vmatmul.mubr.bf16.gmra.mrb[132].mxu1 %v2828_v53  ;;  %3372 = vmatprep.mubr.bf16.mxu0 %v2828_v53  ;;  %v7518_v40 = vpop.f32.mrb[154].mxu0  ;;  %v7520_v20 = vadd.f32 %v2455_v63, %v2390_v2  ;;  %v2453_v47 = vmul.f32 %v7327_v27, %v2420_v35  ;;  %v2773_v36 = vsel %vm6609_vm7, 0, %v2772_v3  ;;  %v7535_v26 = vld [vmem:[#allocation11 + $0x200] sm:$0xff]  }
 0x296   : > { %3035 = vmatprep.mubr.bf16.mxu1 %v7367_v44  ;;  %3373 = vmatmul.mubr.bf16.vlgmr.msra.gmra.mrb[160].mxu0 %v6139_v58  ;;  %v2359_v60 = vadd.f32 %v2292_v9, %v7297_v46  ;;  %v7527_v28 = vpop.f32.mrb[155].mxu0  ;;  %v2540_v48 = vrot.slane %v7514_v54, 7  ;;  %v2684_v13 = vrot.slane %v7514_v54, 1  ;;  %v2393_v30 = vmax.f32 %v2361_v34, 0.0  ;;  %2774 = vst [vmem:[#allocation4 + $0x8] sm:$0x80] %v2773_v36 }
 0x297   : > { %v2425_v2 = vmin.f32 %v2361_v34, 0.0  ;;  %5689 = vmatpush3.bf16.msra.mxu0 %v6107_v23  ;;  %v2557_v41 = vrot.slane %v7520_v20, 7  ;;  %v2701_v15 = vrot.slane %v7520_v20, 1  ;;  %v7533_v57 = vadd.f32 %v2453_v47, %v2388_v8  ;;  %v6114_v9 = vld [vmem:[#allocation11 + $0x1d0] sm:$0xff]   ;;  %5872 = vmatprep.subr.bf16.mxu1 %v7535_v26 }
 0x298   : > { %v2391_v46 = vmax.f32 %v2359_v60, 0.0  ;;  %5690 = vmatprep.subr.bf16.mxu0 %v6110_v14  ;;  %v2423_v3 = vmin.f32 %v2359_v60, 0.0  ;;  %v2362_v63 = vadd.f32 %v7475_v51, %v7306_v62  ;;  %v7542_v23 = vadd.f32 %v7479_v12, %v7300_v33  ;;  %v6115_v36 = vld [vmem:[#allocation11 + $0x190] sm:$0xff]  }
 0x299   : > { %v2458_v42 = vmul.f32 %v7327_v27, %v2425_v2  ;;  %v2573_v53 = vsel %vm410_vm3, %v2541_v18, %v2557_v41  ;;  %v2589_v8 = vsel %vm410_vm3, %v2557_v41, %v2541_v18  ;;  %v2717_v35 = vsel %vm559_vm4, %v2685_v25, %v2701_v15 }
 0x29a   : > { %v2733_v45 = vsel %vm559_vm4, %v2701_v15, %v2685_v25  ;;  %v2605_v14 = vpack.c.bf16 %v2573_v53, %v2589_v8  ;;  %v2556_v51 = vrot.slane %v7533_v57, 7  ;;  %v2700_v33 = vrot.slane %v7533_v57, 1  ;;  %v7555_v12 = vpop.f32.mrb[156].mxu0  ;;  %v2634_v15 = vld [vmem:[#allocation2 + $0x18] sm:$0x1] }
 0x29b   : > { %v2749_v62 = vpack.c.bf16 %v2733_v45, %v2717_v35  ;;  %5691 = vmatpush3.bf16.msra.mxu0 %v6111_v0  ;;  %v7557_v34 = vld [vmem:[#allocation2 + $0x10] sm:$0xff]  ;;  %v7559_v18 = vadd.f32 %v2458_v42, %v2393_v30  ;;  %v2456_v47 = vmul.f32 %v7327_v27, %v2423_v3  ;;  %v2394_v58 = vmax.f32 %v2362_v63, 0.0  ;;  %v7562_v25 = vpop.f32.mrb[157].mxu0 }
 0x29c   : > { %v2426_v60 = vmin.f32 %v2362_v63, 0.0  ;;  %5692 = vmatprep.subr.bf16.mxu0 %v6114_v9  ;;  %2621 = vst [vmem:[#allocation2 + $0x50] sm:$0xff] %v2605_v14  ;;  %v2572_v2 = vsel %vm410_vm3, %v2540_v48, %v2556_v51  ;;  %v2588_v0 = vsel %vm410_vm3, %v2556_v51, %v2540_v48  ;;  %v2716_v30 = vsel %vm559_vm4, %v2684_v13, %v2700_v33  ;;  %v7573_v42 = vpop.f32.mrb[158].mxu0  ;;  %v6118_v9 = vld [vmem:[#allocation11 + $0x1d8] sm:$0xff]  }
 0x29d   : > { %2765 = vst [vmem:[#allocation4 + $0x50] sm:$0xff] %v2749_v62  ;;  %v2732_v41 = vsel %vm559_vm4, %v2700_v33, %v2684_v13  ;;  %3380 = vmatprep.mubr.bf16.mxu0 %v7557_v34  ;;  %v2604_v3 = vpack.c.bf16 %v2572_v2, %v2588_v0  ;;  %v2543_v53 = vrot.slane %v7559_v18, 7  ;;  %v2687_v8 = vrot.slane %v7559_v18, 1  ;;  %3036 = vmatmul.mubr.bf16.gmra.mrb[136].mxu1 %v7557_v34  ;;  %v7578_v48 = vld [vmem:[#allocation4 + $0x8] sm:$0xff]  ;;  %v7580_v35 = vpop.f32.mrb[159].mxu0 }
 0x29e   : > { %v2748_v63 = vpack.c.bf16 %v2732_v41, %v2716_v30  ;;  %v7582_v45 = vadd.f32 %v2456_v47, %v2391_v46  ;;  %v2459_v13 = vmul.f32 %v7327_v27, %v2426_v60  ;;  %v2392_v14 = vmax.f32 %v7542_v23, 0.0  ;;  %3381 = vmatmul.mubr.bf16.gmra.mrb[164].mxu0 %v7578_v48  ;;  %v6119_v60 = vld [vmem:[#allocation11 + $0x198] sm:$0xff]  }
 0x29f   : > { %v2424_v62 = vmin.f32 %v7542_v23, 0.0  ;;  %2620 = vst [vmem:[#allocation2 + $0x48] sm:$0xff] %v2604_v3  ;;  %v7590_v51 = vpack.c.bf16 %v7386_v10, %v7369_v59  ;;  %v2635_v33 = vsel %vm6584_vm6, 0, %v2634_v15  ;;  %v2365_v46 = vadd.f32 %v7503_v55, %v7315_v61  ;;  %5693 = vmatpush3.bf16.msra.mxu0 %v6115_v36  ;;  %v6122_v10 = vld [vmem:[#allocation11 + $0x1e0] sm:$0xff]  }
 0x2a0   : > { %2764 = vst [vmem:[#allocation4 + $0x48] sm:$0xff] %v2748_v63  ;;  %v2363_v47 = vadd.f32 %v7510_v56, %v7309_v22  ;;  %v2542_v23 = vrot.slane %v7582_v45, 7  ;;  %v2686_v2 = vrot.slane %v7582_v45, 1  ;;  %v7600_v0 = vadd.f32 %v2459_v13, %v2394_v58  ;;  %2636 = vst [vmem:[#allocation2 + $0x18] sm:$0x1] %v2635_v33  ;;  %5694 = vmatprep.subr.bf16.mxu0 %v6118_v9  ;;  %v6123_v13 = vld [vmem:[#allocation11 + $0x1a0] sm:$0xff]  }
 0x2a1   : > { %v2457_v59 = vmul.f32 %v7327_v27, %v2424_v62  ;;  %3043 = vmatprep.mubr.bf16.mxu1 %v7590_v51  ;;  %v2397_v30 = vmax.f32 %v2365_v46, 0.0  ;;  %v2429_v61 = vmin.f32 %v2365_v46, 0.0  ;;  %v2366_v58 = vadd.f32 %v7518_v40, %v7318_v29  ;;  %v6124_v33 = vld [vmem:[#allocation11 + $0x1e8] sm:$0xff]  }
 0x2a2   : > { %v2395_v55 = vmax.f32 %v2363_v47, 0.0  ;;  %v2427_v41 = vmin.f32 %v2363_v47, 0.0  ;;  %v2559_v22 = vrot.slane %v7600_v0, 7  ;;  %v2703_v56 = vrot.slane %v7600_v0, 1 }
 0x2a3   : > { %v7606_v36 = vadd.f32 %v2457_v59, %v2392_v14  ;;  %v2462_v15 = vmul.f32 %v7327_v27, %v2429_v61  ;;  %v7614_v3 = vadd.f32 %v7527_v28, %v7312_v16  ;;  %v7618_v63 = vpack.c.bf16 %v7383_v24, %v7362_v6  ;;  %5695 = vmatpush3.bf16.msra.mxu0 %v6119_v60  ;;  %v2775_v59 = vld [vmem:[#allocation4 + $0x10] sm:$0x80] }
 0x2a4   : > { %v2460_v9 = vmul.f32 %v7327_v27, %v2427_v41  ;;  %v2575_v14 = vsel %vm410_vm3, %v2543_v53, %v2559_v22  ;;  %v2591_v29 = vsel %vm410_vm3, %v2559_v22, %v2543_v53  ;;  %v2719_v40 = vsel %vm559_vm4, %v2687_v8, %v2703_v56  ;;  %5696 = vmatprep.subr.bf16.mxu0 %v6122_v10  ;;  %v6125_v22 = vld [vmem:[#allocation11 + $0x1a8] sm:$0xff]  }
 0x2a5   : > { %v2735_v62 = vsel %vm559_vm4, %v2703_v56, %v2687_v8  ;;  %v2607_v16 = vpack.c.bf16 %v2575_v14, %v2591_v29  ;;  %v2558_v6 = vrot.slane %v7606_v36, 7  ;;  %v2702_v24 = vrot.slane %v7606_v36, 1 }
 0x2a6   : > { %v2751_v28 = vpack.c.bf16 %v2735_v62, %v2719_v40  ;;  %v7630_v46 = vadd.f32 %v2462_v15, %v2397_v30  ;;  %v7632_v47 = vadd.f32 %v2460_v9, %v2395_v55  ;;  %v2398_v60 = vmax.f32 %v2366_v58, 0.0  ;;  %v2637_v55 = vld [vmem:[#allocation2 + $0x20] sm:$0x1] }
 0x2a7   : > { %v2430_v53 = vmin.f32 %v2366_v58, 0.0  ;;  %2623 = vst [vmem:[#allocation2 + $0x60] sm:$0xff] %v2607_v16  ;;  %v2574_v8 = vsel %vm410_vm3, %v2542_v23, %v2558_v6  ;;  %v2590_v10 = vsel %vm410_vm3, %v2558_v6, %v2542_v23  ;;  %v2718_v61 = vsel %vm559_vm4, %v2686_v2, %v2702_v24  ;;  %v7642_v41 = vld [vmem:[#allocation2 + $0x18] sm:$0xff]  ;;  %5697 = vmatpush3.bf16.msra.mxu0 %v6123_v13  ;;  %v6127_v23 = vld [vmem:[#allocation11 + $0x1f0] sm:$0xff]  }
 0x2a8   : > { %2767 = vst [vmem:[#allocation4 + $0x60] sm:$0xff] %v2751_v28  ;;  %v2734_v30 = vsel %vm559_vm4, %v2702_v24, %v2686_v2  ;;  %v2606_v56 = vpack.c.bf16 %v2574_v8, %v2590_v10  ;;  %3388 = vmatprep.mubr.bf16.mxu0 %v7642_v41  ;;  %v2545_v15 = vrot.slane %v7630_v46, 7  ;;  %v2689_v9 = vrot.slane %v7630_v46, 1  ;;  %3044 = vmatmul.mubr.bf16.gmra.mrb[140].mxu1 %v7642_v41 }
 0x2a9   : > { %v2750_v58 = vpack.c.bf16 %v2734_v30, %v2718_v61  ;;  %v2544_v14 = vrot.slane %v7632_v47, 7  ;;  %v2688_v2 = vrot.slane %v7632_v47, 1  ;;  %v2463_v29 = vmul.f32 %v7327_v27, %v2430_v53  ;;  %3051 = vmatprep.mubr.bf16.mxu1 %v7618_v63  ;;  %5698 = vmatprep.subr.bf16.mxu0 %v6124_v33  ;;  %v6128_v53 = vld [vmem:[#allocation11 + $0x1b0] sm:$0xff]  }
 0x2aa   : > { %v2396_v13 = vmax.f32 %v7614_v3, 0.0  ;;  %2622 = vst [vmem:[#allocation2 + $0x58] sm:$0xff] %v2606_v56  ;;  %v2428_v40 = vmin.f32 %v7614_v3, 0.0  ;;  %v2776_v62 = vsel %vm6609_vm7, 0, %v2775_v59  ;;  %v2638_v16 = vsel %vm6584_vm6, 0, %v2637_v55 }
 0x2ab   : > { %2766 = vst [vmem:[#allocation4 + $0x58] sm:$0xff] %v2750_v58  ;;  %v2369_v28 = vadd.f32 %v7555_v12, %v7334_v49  ;;  %v7660_v6 = vadd.f32 %v2463_v29, %v2398_v60  ;;  %2777 = vst [vmem:[#allocation4 + $0x10] sm:$0x80] %v2776_v62  ;;  %v2367_v24 = vadd.f32 %v7562_v25, %v7321_v50  ;;  %5699 = vmatpush3.bf16.msra.mxu0 %v6125_v22  ;;  %v6129_v60 = vld [vmem:[#allocation11 + $0x1f8] sm:$0xff]   ;;  %v2781_v29 = vld [vmem:[#allocation4 + $0x20] sm:$0x80] }
 0x2ac   : > { %2639 = vst [vmem:[#allocation2 + $0x20] sm:$0x1] %v2638_v16  ;;  %v2370_v33 = vadd.f32 %v7573_v42, %v7337_v31  ;;  %v7668_v3 = vadd.f32 %v7580_v35, %v7324_v7  ;;  %v2461_v59 = vmul.f32 %v7327_v27, %v2428_v40  ;;  %v7673_v12 = vpack.c.bf16 %v7429_v38, %v7414_v21  ;;  %v2778_v16 = vld [vmem:[#allocation4 + $0x18] sm:$0x80] }
 0x2ad   : > { %v2401_v8 = vmax.f32 %v2369_v28, 0.0  ;;  %v2433_v49 = vmin.f32 %v2369_v28, 0.0  ;;  %5700 = vmatprep.subr.bf16.mxu0 %v6127_v23  ;;  %v2561_v50 = vrot.slane %v7660_v6, 7  ;;  %v2705_v31 = vrot.slane %v7660_v6, 1  ;;  %v2643_v28 = vld [vmem:[#allocation2 + $0x30] sm:$0x1] }
 0x2ae   : > { %v2399_v25 = vmax.f32 %v2367_v24, 0.0  ;;  %v2431_v42 = vmin.f32 %v2367_v24, 0.0  ;;  %v7677_v7 = vadd.f32 %v2461_v59, %v2396_v13  ;;  %v2402_v10 = vmax.f32 %v2370_v33, 0.0 }
 0x2af   : > { %v2466_v35 = vmul.f32 %v7327_v27, %v2433_v49  ;;  %v2434_v61 = vmin.f32 %v2370_v33, 0.0  ;;  %v2577_v30 = vsel %vm410_vm3, %v2545_v15, %v2561_v50  ;;  %v2593_v21 = vsel %vm410_vm3, %v2561_v50, %v2545_v15  ;;  %5701 = vmatpush3.bf16.msra.mxu0 %v6128_v53 }
 0x2b0   : > { %v2721_v38 = vsel %vm559_vm4, %v2689_v9, %v2705_v31  ;;  %v2737_v55 = vsel %vm559_vm4, %v2705_v31, %v2689_v9  ;;  %v2609_v22 = vpack.c.bf16 %v2577_v30, %v2593_v21  ;;  %v2560_v58 = vrot.slane %v7677_v7, 7  ;;  %5702 = vmatprep.subr.bf16.mxu0 %v6129_v60  ;;  %v6130_v9 = vld [vmem:[#allocation11 + $0x1b8] sm:$0xff]   ;;  %v2640_v60 = vld [vmem:[#allocation2 + $0x28] sm:$0x1] }
 0x2b1   : > { %v2753_v56 = vpack.c.bf16 %v2737_v55, %v2721_v38  ;;  %v2704_v23 = vrot.slane %v7677_v7, 1  ;;  %v7690_v13 = vadd.f32 %v2466_v35, %v2401_v8  ;;  %v2464_v40 = vmul.f32 %v7327_v27, %v2431_v42  ;;  %v2784_v21 = vld [vmem:[#allocation4 + $0x28] sm:$0x80]  ;;  %v2646_v38 = vld [vmem:[#allocation2 + $0x38] sm:$0x1] }
 0x2b2   : > { %v2467_v15 = vmul.f32 %v7327_v27, %v2434_v61  ;;  %v2400_v62 = vmax.f32 %v7668_v3, 0.0  ;;  %2625 = vst [vmem:[#allocation2 + $0x70] sm:$0xff] %v2609_v22  ;;  %v2576_v24 = vsel %vm410_vm3, %v2544_v14, %v2560_v58  ;;  %v2592_v33 = vsel %vm410_vm3, %v2560_v58, %v2544_v14  ;;  %v7703_v8 = vld [vmem:[#allocation4 + $0x10] sm:$0xff] }
 0x2b3   : > { %2769 = vst [vmem:[#allocation4 + $0x70] sm:$0xff] %v2753_v56  ;;  %v2720_v53 = vsel %vm559_vm4, %v2688_v2, %v2704_v23  ;;  %v2736_v59 = vsel %vm559_vm4, %v2704_v23, %v2688_v2  ;;  %v7705_v49 = vld [vmem:[#allocation2 + $0x20] sm:$0xff]  ;;  %v2608_v50 = vpack.c.bf16 %v2576_v24, %v2592_v33  ;;  %3389 = vmatmul.mubr.bf16.gmra.mrb[168].mxu0 %v7703_v8  ;;  %v2547_v42 = vrot.slane %v7690_v13, 7 }
 0x2b4   : > { %v2752_v31 = vpack.c.bf16 %v2736_v59, %v2720_v53  ;;  %v2691_v35 = vrot.slane %v7690_v13, 1  ;;  %3052 = vmatmul.mubr.bf16.gmra.mrb[144].mxu1 %v7705_v49  ;;  %3396 = vmatprep.mubr.bf16.mxu0 %v7705_v49  ;;  %v7712_v14 = vadd.f32 %v2464_v40, %v2399_v25  ;;  %v7714_v2 = vadd.f32 %v2467_v15, %v2402_v10 }
 0x2b5   : > { %v2432_v61 = vmin.f32 %v7668_v3, 0.0  ;;  %3059 = vmatprep.mubr.bf16.mxu1 %v7673_v12  ;;  %v2779_v30 = vsel %vm6609_vm7, 0, %v2778_v16  ;;  %2624 = vst [vmem:[#allocation2 + $0x68] sm:$0xff] %v2608_v50  ;;  %v2641_v55 = vsel %vm6584_vm6, 0, %v2640_v60  ;;  %v7724_v25 = vpack.c.bf16 %v7423_v52, %v7390_v39  ;;  %5703 = vmatpush3.bf16.msra.mxu0 %v6130_v9  ;;  %v2787_v39 = vld [vmem:[#allocation4 + $0x30] sm:$0x80] }
 0x2b6   : > { %2768 = vst [vmem:[#allocation4 + $0x68] sm:$0xff] %v2752_v31  ;;  %2780 = vst [vmem:[#allocation4 + $0x18] sm:$0x80] %v2779_v30  ;;  %v2782_v3 = vsel %vm6609_vm7, 0, %v2781_v29  ;;  %v2644_v10 = vsel %vm6584_vm6, 0, %v2643_v28  ;;  %v2546_v22 = vrot.slane %v7712_v14, 7  ;;  %v7737_v29 = vpack.c.bf16 %v7477_v4, %v7456_v43 }
 0x2b7   : > { %v2690_v56 = vrot.slane %v7712_v14, 1  ;;  %v2563_v58 = vrot.slane %v7714_v2, 7  ;;  %v2707_v23 = vrot.slane %v7714_v2, 1  ;;  %2642 = vst [vmem:[#allocation2 + $0x28] sm:$0x1] %v2641_v55  ;;  %v2465_v52 = vmul.f32 %v7327_v27, %v2432_v61 }
 0x2b8   : > { %2783 = vst [vmem:[#allocation4 + $0x20] sm:$0x80] %v2782_v3  ;;  %2645 = vst [vmem:[#allocation2 + $0x30] sm:$0x1] %v2644_v10  ;;  %v2785_v40 = vsel %vm6609_vm7, 0, %v2784_v21  ;;  %v2647_v15 = vsel %vm6584_vm6, 0, %v2646_v38  ;;  %v7755_v60 = vpack.c.bf16 %v7458_v37, %v7442_v11  ;;  %v7763_v30 = vpack.c.bf16 %v7533_v57, %v7514_v54 }
 0x2b9   : > { %v2649_v16 = vld [vmem:[#allocation2 + $0x40] sm:$0x1]  ;;  %v2790_v28 = vld [vmem:[#allocation4 + $0x38] sm:$0x80]  ;;  %v2579_v9 = vsel %vm410_vm3, %v2547_v42, %v2563_v58  ;;  %v2595_v24 = vsel %vm410_vm3, %v2563_v58, %v2547_v42  ;;  %v2723_v27 = vsel %vm559_vm4, %v2691_v35, %v2707_v23  ;;  %v2739_v43 = vsel %vm559_vm4, %v2707_v23, %v2691_v35  ;;  %2786 = vst [vmem:[#allocation4 + $0x28] sm:$0x80] %v2785_v40 }
 0x2ba   : > { %2648 = vst [vmem:[#allocation2 + $0x38] sm:$0x1] %v2647_v15  ;;  %v2652_v4 = vld [vmem:[#allocation2 + $0x48] sm:$0x1]  ;;  %v2611_v33 = vpack.c.bf16 %v2579_v9, %v2595_v24  ;;  %v2755_v53 = vpack.c.bf16 %v2739_v43, %v2723_v27  ;;  %v7751_v59 = vadd.f32 %v2465_v52, %v2400_v62  ;;  %v2793_v50 = vld [vmem:[#allocation4 + $0x40] sm:$0x80]  ;;  %v7773_v54 = vpack.c.bf16 %v7520_v20, %v7500_v19 }
 0x2bb   : > { %v2655_v31 = vld [vmem:[#allocation2 + $0x50] sm:$0x1]  ;;  %v2796_v42 = vld [vmem:[#allocation4 + $0x48] sm:$0x80]  ;;  %v2788_v61 = vsel %vm6609_vm7, 0, %v2787_v39  ;;  %v2650_v35 = vsel %vm6584_vm6, 0, %v2649_v16  ;;  %v7783_v39 = vpack.c.bf16 %v7606_v36, %v7582_v45  ;;  %v7804_v32 = vpack.c.bf16 %v7600_v0, %v7559_v18 }
 0x2bc   : > { %v2791_v62 = vsel %vm6609_vm7, 0, %v2790_v28  ;;  %v2799_v21 = vld [vmem:[#allocation4 + $0x50] sm:$0x80]  ;;  %v2661_v38 = vld [vmem:[#allocation2 + $0x60] sm:$0x1]  ;;  %2627 = vst [vmem:[#allocation2 + $0x80] sm:$0xff] %v2611_v33  ;;  %v7813_v33 = vpack.c.bf16 %v7677_v7, %v7632_v47  ;;  %v7821_v0 = vpack.c.bf16 %v7660_v6, %v7630_v46  ;;  %v7829_v7 = vpack.c.bf16 %v7751_v59, %v7712_v14 }
 0x2bd   : > { %2771 = vst [vmem:[#allocation4 + $0x80] sm:$0xff] %v2755_v53  ;;  %v2562_v11 = vrot.slane %v7751_v59, 7  ;;  %v2706_v37 = vrot.slane %v7751_v59, 1  ;;  %2789 = vst [vmem:[#allocation4 + $0x30] sm:$0x80] %v2788_v61  ;;  %v2653_v55 = vsel %vm6584_vm6, 0, %v2652_v4  ;;  %v7837_v6 = vpack.c.bf16 %v7714_v2, %v7690_v13 }
 0x2be   : > { %2651 = vst [vmem:[#allocation2 + $0x40] sm:$0x1] %v2650_v35  ;;  %2792 = vst [vmem:[#allocation4 + $0x38] sm:$0x80] %v2791_v62  ;;  %v2658_v57 = vld [vmem:[#allocation2 + $0x58] sm:$0x1] }
 0x2bf   : > { %v2805_v3 = vld [vmem:[#allocation4 + $0x60] sm:$0x80]  ;;  %v7775_v10 = vld [vmem:[#allocation4 + $0x18] sm:$0xff]  ;;  %2654 = vst [vmem:[#allocation2 + $0x48] sm:$0x1] %v2653_v55  ;;  %v2794_v58 = vsel %vm6609_vm7, 0, %v2793_v50  ;;  %v2578_v20 = vsel %vm410_vm3, %v2546_v22, %v2562_v11  ;;  %v2594_v40 = vsel %vm410_vm3, %v2562_v11, %v2546_v22  ;;  %v2722_v15 = vsel %vm559_vm4, %v2690_v56, %v2706_v37 }
 0x2c0   : > { %v2656_v23 = vsel %vm6584_vm6, 0, %v2655_v31  ;;  %v2797_v52 = vsel %vm6609_vm7, 0, %v2796_v42  ;;  %v2802_v19 = vld [vmem:[#allocation4 + $0x58] sm:$0x80]  ;;  %v2738_v16 = vsel %vm559_vm4, %v2706_v37, %v2690_v56  ;;  %3397 = vmatmul.mubr.bf16.gmra.mrb[172].mxu0 %v7775_v10  ;;  %2795 = vst [vmem:[#allocation4 + $0x40] sm:$0x80] %v2794_v58  ;;  %v2610_v9 = vpack.c.bf16 %v2578_v20, %v2594_v40 }
 0x2c1   : > { %v7796_v45 = vld [vmem:[#allocation2 + $0x28] sm:$0xff]  ;;  %2657 = vst [vmem:[#allocation2 + $0x50] sm:$0x1] %v2656_v23  ;;  %2798 = vst [vmem:[#allocation4 + $0x48] sm:$0x80] %v2797_v52  ;;  %v2754_v24 = vpack.c.bf16 %v2738_v16, %v2722_v15  ;;  %v2659_v22 = vsel %vm6584_vm6, 0, %v2658_v57 }
 0x2c2   : > { %v2664_v36 = vld [vmem:[#allocation2 + $0x68] sm:$0x1]  ;;  %v2667_v28 = vld [vmem:[#allocation2 + $0x70] sm:$0x1]  ;;  %3404 = vmatprep.mubr.bf16.mxu0 %v7796_v45  ;;  %3060 = vmatmul.mubr.bf16.gmra.mrb[148].mxu1 %v7796_v45  ;;  %v2808_v56 = vld [vmem:[#allocation4 + $0x68] sm:$0x80] }
 0x2c3   : > { %v2811_v27 = vld [vmem:[#allocation4 + $0x70] sm:$0x80]  ;;  %3067 = vmatprep.mubr.bf16.mxu1 %v7724_v25  ;;  %2660 = vst [vmem:[#allocation2 + $0x58] sm:$0x1] %v2659_v22  ;;  %v2800_v43 = vsel %vm6609_vm7, 0, %v2799_v21  ;;  %v2662_v4 = vsel %vm6584_vm6, 0, %v2661_v38 }
 0x2c4   : > { %v2803_v53 = vsel %vm6609_vm7, 0, %v2802_v19  ;;  %2626 = vst [vmem:[#allocation2 + $0x78] sm:$0xff] %v2610_v9  ;;  %2770 = vst [vmem:[#allocation4 + $0x78] sm:$0xff] %v2754_v24  ;;  %v2665_v18 = vsel %vm6584_vm6, 0, %v2664_v36  ;;  %v2806_v50 = vsel %vm6609_vm7, 0, %v2805_v3  ;;  %v2668_v47 = vsel %vm6584_vm6, 0, %v2667_v28 }
 0x2c5   : > { %2801 = vst [vmem:[#allocation4 + $0x50] sm:$0x80] %v2800_v43  ;;  %2663 = vst [vmem:[#allocation2 + $0x60] sm:$0x1] %v2662_v4  ;;  %v2809_v31 = vsel %vm6609_vm7, 0, %v2808_v56  ;;  %v2812_v46 = vsel %vm6609_vm7, 0, %v2811_v27 }
 0x2c6   : > { %2804 = vst [vmem:[#allocation4 + $0x58] sm:$0x80] %v2803_v53  ;;  %2666 = vst [vmem:[#allocation2 + $0x68] sm:$0x1] %v2665_v18  ;;  %v2673_v42 = vld [vmem:[#allocation2 + $0x80] sm:$0x1] }
 0x2c7   : > { %2807 = vst [vmem:[#allocation4 + $0x60] sm:$0x80] %v2806_v50  ;;  %2669 = vst [vmem:[#allocation2 + $0x70] sm:$0x1] %v2668_v47  ;;  %v2817_v61 = vld [vmem:[#allocation4 + $0x80] sm:$0x80] }
 0x2c8   : > { %2810 = vst [vmem:[#allocation4 + $0x68] sm:$0x80] %v2809_v31  ;;  %2813 = vst [vmem:[#allocation4 + $0x70] sm:$0x80] %v2812_v46  ;;  %v7839_v35 = vld [vmem:[#allocation4 + $0x20] sm:$0xff]  ;;  %v2674_v14 = vsel %vm6584_vm6, 0, %v2673_v42 }
 0x2c9   : > { %v2818_v59 = vsel %vm6609_vm7, 0, %v2817_v61  ;;  %3405 = vmatmul.mubr.bf16.gmra.mrb[176].mxu0 %v7839_v35  ;;  %v7846_v62 = vld [vmem:[#allocation2 + $0x30] sm:$0xff]  ;;  %2675 = vst [vmem:[#allocation2 + $0x80] sm:$0x1] %v2674_v14  ;;  %v7855_v11 = vld [vmem:[#allocation4 + $0x28] sm:$0xff]  ;;  %v7863_v1 = vld [vmem:[#allocation4 + $0x30] sm:$0xff] }
 0x2ca   : > { %2819 = vst [vmem:[#allocation4 + $0x80] sm:$0x80] %v2818_v59  ;;  %3412 = vmatprep.mubr.bf16.mxu0 %v7846_v62  ;;  %3068 = vmatmul.mubr.bf16.gmra.mrb[152].mxu1 %v7846_v62  ;;  %v7858_v37 = vld [vmem:[#allocation2 + $0x38] sm:$0xff]  ;;  %v7866_v55 = vld [vmem:[#allocation2 + $0x40] sm:$0xff]  ;;  %v7871_v17 = vld [vmem:[#allocation4 + $0x38] sm:$0xff]  ;;  %v5368_v23 = vpop.f32.mrb[128].mxu1 }
 0x2cb   : > { %3075 = vmatprep.mubr.bf16.mxu1 %v7737_v29  ;;  %v2670_v13 = vld [vmem:[#allocation2 + $0x78] sm:$0x1]  ;;  %v2814_v21 = vld [vmem:[#allocation4 + $0x78] sm:$0x80]  ;;  %v7879_v3 = vld [vmem:[#allocation4 + $0x40] sm:$0xff]  ;;  %v5369_v20 = vpop.f32.mrb[129].mxu1 }
 0x2cc   : > { %v2671_v2 = vsel %vm6584_vm6, 0, %v2670_v13  ;;  %v2815_v38 = vsel %vm6609_vm7, 0, %v2814_v21  ;;  %v7874_v57 = vld [vmem:[#allocation2 + $0x48] sm:$0xff]  ;;  %v7882_v58 = vld [vmem:[#allocation2 + $0x50] sm:$0xff]  ;;  %v7887_v52 = vld [vmem:[#allocation4 + $0x48] sm:$0xff]  ;;  %v7894_v40 = vadd.f32 %v5369_v20, %v5368_v23  ;;  %v5371_v15 = vpop.f32.mrb[130].mxu1 }
 0x2cd   : > { %2672 = vst [vmem:[#allocation2 + $0x78] sm:$0x1] %v2671_v2  ;;  %2816 = vst [vmem:[#allocation4 + $0x78] sm:$0x80] %v2815_v38  ;;  %v7890_v19 = vld [vmem:[#allocation2 + $0x58] sm:$0xff]  ;;  %v5372_v16 = vpop.f32.mrb[131].mxu1 }
 0x2ce   : > { %v7897_v36 = vadd.f32 %v5372_v16, %v5371_v15  ;;  %v7899_v28 = vld [vmem:[#allocation4 + $0x50] sm:$0xff]  ;;  %v7907_v24 = vld [vmem:[#allocation4 + $0x58] sm:$0xff]  ;;  %v7915_v56 = vld [vmem:[#allocation4 + $0x60] sm:$0xff] }
 0x2cf   : > { %v7902_v9 = vld [vmem:[#allocation2 + $0x60] sm:$0xff]  ;;  %v7910_v22 = vld [vmem:[#allocation2 + $0x68] sm:$0xff]  ;;  %v7918_v27 = vld [vmem:[#allocation2 + $0x70] sm:$0xff] }
 0x2d0   : > { %v7923_v43 = vld [vmem:[#allocation4 + $0x68] sm:$0xff]  ;;  %v7931_v53 = vld [vmem:[#allocation4 + $0x70] sm:$0xff]  ;;  %v6131_v18 = vld [vmem:[#allocation11 + $0x208] sm:$0xff]  }
 0x2d1   : > { %3413 = vmatmul.mubr.bf16.gmra.mrb[180].mxu0 %v7855_v11  ;;  %v7934_v50 = vld [vmem:[#allocation2 + $0x80] sm:$0xff]  ;;  %v6132_v47 = vld [vmem:[#allocation11 + $0x210] sm:$0xff]  }
 0x2d2   : > { %3420 = vmatprep.mubr.bf16.mxu0 %v7858_v37  ;;  %3076 = vmatmul.mubr.bf16.gmra.mrb[156].mxu1 %v7858_v37 }
 0x2d3   : > { %3083 = vmatprep.mubr.bf16.mxu1 %v7755_v60 }
 0x2d4   : > { %v7926_v4 = vld [vmem:[#allocation2 + $0x78] sm:$0xff]  ;;  %v7940_v31 = vld [vmem:[#allocation4 + $0x78] sm:$0xff] }
 0x2d9   : > { %3421 = vmatmul.mubr.bf16.gmra.mrb[184].mxu0 %v7863_v1 }
 0x2da   : > { %3428 = vmatprep.mubr.bf16.mxu0 %v7866_v55  ;;  %3084 = vmatmul.mubr.bf16.gmra.mrb[160].mxu1 %v7866_v55 }
 0x2db   : > { %3091 = vmatprep.mubr.bf16.mxu1 %v7763_v30 }
 0x2e1   : > { %3429 = vmatmul.mubr.bf16.gmra.mrb[188].mxu0 %v7871_v17 }
 0x2e2   : > { %3436 = vmatprep.mubr.bf16.mxu0 %v7874_v57  ;;  %3092 = vmatmul.mubr.bf16.gmra.mrb[164].mxu1 %v7874_v57 }
 0x2e3   : > { %3099 = vmatprep.mubr.bf16.mxu1 %v7773_v54 }
 0x2e9   : > { %3437 = vmatmul.mubr.bf16.gmra.mrb[192].mxu0 %v7879_v3 }
 0x2ea   : > { %3444 = vmatprep.mubr.bf16.mxu0 %v7882_v58  ;;  %3100 = vmatmul.mubr.bf16.gmra.mrb[168].mxu1 %v7882_v58 }
 0x2eb   : > { %3107 = vmatprep.mubr.bf16.mxu1 %v7783_v39 }
 0x2f1   : > { %3445 = vmatmul.mubr.bf16.gmra.mrb[196].mxu0 %v7887_v52 }
 0x2f2   : > { %3452 = vmatprep.mubr.bf16.mxu0 %v7890_v19  ;;  %3108 = vmatmul.mubr.bf16.gmra.mrb[172].mxu1 %v7890_v19 }
 0x2f3   : > { %3115 = vmatprep.mubr.bf16.mxu1 %v7804_v32 }
 0x2f9   : > { %3453 = vmatmul.mubr.bf16.gmra.mrb[200].mxu0 %v7899_v28 }
 0x2fa   : > { %3460 = vmatprep.mubr.bf16.mxu0 %v7902_v9  ;;  %3116 = vmatmul.mubr.bf16.gmra.mrb[176].mxu1 %v7902_v9 }
 0x2fb   : > { %3123 = vmatprep.mubr.bf16.mxu1 %v7813_v33 }
 0x301   : > { %3461 = vmatmul.mubr.bf16.gmra.mrb[204].mxu0 %v7907_v24 }
 0x302   : > { %3468 = vmatprep.mubr.bf16.mxu0 %v7910_v22  ;;  %3124 = vmatmul.mubr.bf16.gmra.mrb[180].mxu1 %v7910_v22 }
 0x303   : > { %3131 = vmatprep.mubr.bf16.mxu1 %v7821_v0 }
 0x309   : > { %3469 = vmatmul.mubr.bf16.gmra.mrb[208].mxu0 %v7915_v56 }
 0x30a   : > { %3476 = vmatprep.mubr.bf16.mxu0 %v7918_v27  ;;  %3132 = vmatmul.mubr.bf16.gmra.mrb[184].mxu1 %v7918_v27 }
 0x30b   : > { %3139 = vmatprep.mubr.bf16.mxu1 %v7829_v7 }
 0x311   : > { %3477 = vmatmul.mubr.bf16.gmra.mrb[212].mxu0 %v7923_v43 }
 0x312   : > { %3484 = vmatprep.mubr.bf16.mxu0 %v7926_v4  ;;  %3140 = vmatmul.mubr.bf16.gmra.mrb[188].mxu1 %v7926_v4 }
 0x313   : > { %3725 = vmatprep.mubr.bf16.mxu1 %v7578_v48  ;;  %v6133_v48 = vld [vmem:[#allocation11 + $0x218] sm:$0xff]  }
 0x319   : > { %3485 = vmatmul.mubr.bf16.gmra.mrb[216].mxu0 %v7931_v53 }
 0x31a   : > { %3492 = vmatprep.mubr.bf16.mxu0 %v7934_v50  ;;  %3726 = vmatmul.mubr.bf16.vlgmr.msra.gmra.mrb[192].mxu1 %v7364_v5  ;;  %v6134_v5 = vld [vmem:[#allocation11 + $0x220] sm:$0xff]  }
 0x31b   : > { %3733 = vmatprep.mubr.bf16.mxu1 %v7703_v8  ;;  %5873 = vmatpush3.bf16.msra.mxu1 %v7535_v26  ;;  %v6135_v26 = vld [vmem:[#allocation11 + $0x228] sm:$0xff]   ;;  %v6136_v8 = vld [vmem:[#allocation11 + $0x230] sm:$0xff]  }
 0x31c   : > { %5874 = vmatprep.subr.bf16.mxu1 %v6131_v18 }
 0x31f   : > { %5875 = vmatpush3.bf16.msra.mxu1 %v6131_v18 }
 0x320   : > { %5876 = vmatprep.subr.bf16.mxu1 %v6132_v47 }
 0x321   : > { %3493 = vmatmul.mubr.bf16.gmra.mrb[220].mxu0 %v7940_v31 }
 0x322   : > { %4078 = vmatprep.mubr.bf16.mxu0 %v7367_v44  ;;  %3734 = vmatmul.mubr.bf16.gmra.mrb[196].mxu1 %v7367_v44  ;;  %v6137_v44 = vld [vmem:[#allocation11 + $0x238] sm:$0xff]  }
 0x323   : > { %3741 = vmatprep.mubr.bf16.mxu1 %v7775_v10  ;;  %5877 = vmatpush3.bf16.msra.mxu1 %v6132_v47 }
 0x324   : > { %5878 = vmatprep.subr.bf16.mxu1 %v6133_v48 }
 0x327   : > { %5879 = vmatpush3.bf16.msra.mxu1 %v6133_v48 }
 0x328   : > { %5880 = vmatprep.subr.bf16.mxu1 %v6134_v5 }
 0x329   : > { %4079 = vmatmul.mubr.bf16.vlgmr.msra.gmra.mrb[224].mxu0 %v7557_v34  ;;  %v7985_v34 = vld [vmem:[%s8377_s4] ss:$0 sm:$0xff] }
 0x32a   : > { %4086 = vmatprep.mubr.bf16.mxu0 %v7590_v51  ;;  %3742 = vmatmul.mubr.bf16.gmra.mrb[200].mxu1 %v7590_v51  ;;  %v3149_v46 = vadd.f32 %v7897_v36, %v7985_v34 }
 0x32b   : > { %3749 = vmatprep.mubr.bf16.mxu1 %v7839_v35  ;;  %5881 = vmatpush3.bf16.msra.mxu1 %v6134_v5  ;;  %v8016_v5 = vld [vmem:[#allocation4 + $0x80] sm:$0xff] }
 0x32c   : > { %5882 = vmatprep.subr.bf16.mxu1 %v6135_v26 }
 0x32f   : > { %5883 = vmatpush3.bf16.msra.mxu1 %v6135_v26 }
 0x330   : > { %5884 = vmatprep.subr.bf16.mxu1 %v6136_v8 }
 0x331   : > { %4087 = vmatmul.mubr.bf16.gmra.mrb[228].mxu0 %v7642_v41 }
 0x332   : > { %4094 = vmatprep.mubr.bf16.mxu0 %v7618_v63  ;;  %3750 = vmatmul.mubr.bf16.gmra.mrb[204].mxu1 %v7618_v63 }
 0x333   : > { %3757 = vmatprep.mubr.bf16.mxu1 %v7855_v11  ;;  %5885 = vmatpush3.bf16.msra.mxu1 %v6136_v8 }
 0x334   : > { %5886 = vmatprep.subr.bf16.mxu1 %v6137_v44 }
 0x337   : > { %5887 = vmatpush3.bf16.msra.mxu1 %v6137_v44 }
 0x339   : > { %4095 = vmatmul.mubr.bf16.gmra.mrb[232].mxu0 %v7705_v49 }
 0x33a   : > { %4102 = vmatprep.mubr.bf16.mxu0 %v7673_v12  ;;  %3758 = vmatmul.mubr.bf16.gmra.mrb[208].mxu1 %v7673_v12 }
 0x33b   : > { %3765 = vmatprep.mubr.bf16.mxu1 %v7863_v1 }
 0x341   : > { %4103 = vmatmul.mubr.bf16.gmra.mrb[236].mxu0 %v7796_v45 }
 0x342   : > { %4110 = vmatprep.mubr.bf16.mxu0 %v7724_v25  ;;  %3766 = vmatmul.mubr.bf16.gmra.mrb[212].mxu1 %v7724_v25 }
 0x343   : > { %3773 = vmatprep.mubr.bf16.mxu1 %v7871_v17 }
 0x349   : > { %4111 = vmatmul.mubr.bf16.gmra.mrb[240].mxu0 %v7846_v62 }
 0x34a   : > { %4118 = vmatprep.mubr.bf16.mxu0 %v7737_v29  ;;  %3774 = vmatmul.mubr.bf16.gmra.mrb[216].mxu1 %v7737_v29  ;;  %v3148_v29 = vadd.f32 %v7894_v40, %v7985_v34 }
 0x34b   : > { %3781 = vmatprep.mubr.bf16.mxu1 %v7879_v3 }
 0x351   : > { %4119 = vmatmul.mubr.bf16.gmra.mrb[244].mxu0 %v7858_v37 }
 0x352   : > { %4126 = vmatprep.mubr.bf16.mxu0 %v7755_v60  ;;  %3782 = vmatmul.mubr.bf16.gmra.mrb[220].mxu1 %v7755_v60 }
 0x353   : > { %3789 = vmatprep.mubr.bf16.mxu1 %v7887_v52 }
 0x359   : > { %4127 = vmatmul.mubr.bf16.gmra.mrb[248].mxu0 %v7866_v55 }
 0x35a   : > { %4134 = vmatprep.mubr.bf16.mxu0 %v7763_v30  ;;  %3790 = vmatmul.mubr.bf16.gmra.mrb[224].mxu1 %v7763_v30 }
 0x35b   : > { %3797 = vmatprep.mubr.bf16.mxu1 %v7899_v28 }
 0x361   : > { %4135 = vmatmul.mubr.bf16.gmra.mrb[252].mxu0 %v7874_v57 }
 0x362   : > { %4142 = vmatprep.mubr.bf16.mxu0 %v7773_v54  ;;  %3798 = vmatmul.mubr.bf16.gmra.mrb[228].mxu1 %v7773_v54 }
 0x363   : > { %3805 = vmatprep.mubr.bf16.mxu1 %v7907_v24 }
 0x368   : > { %v5374_v51 = vpop.f32.mrb[132].mxu1 }
 0x369   : > { %4143 = vmatmul.mubr.bf16.gmra.mrb[0].mxu0 %v7882_v58  ;;  %v5375_v63 = vpop.f32.mrb[133].mxu1  ;;  %v5480_v41 = vpop.f32.mrb[160].mxu0 }
 0x36a   : > { %4150 = vmatprep.mubr.bf16.mxu0 %v7783_v39  ;;  %3806 = vmatmul.mubr.bf16.gmra.mrb[232].mxu1 %v7783_v39  ;;  %v5376_v12 = vadd.f32 %v5375_v63, %v5374_v51  ;;  %v5377_v49 = vpop.f32.mrb[134].mxu1  ;;  %v5481_v25 = vpop.f32.mrb[161].mxu0 }
 0x36b   : > { %3813 = vmatprep.mubr.bf16.mxu1 %v7915_v56  ;;  %v5482_v60 = vadd.f32 %v5481_v25, %v5480_v41  ;;  %v5378_v30 = vpop.f32.mrb[135].mxu1  ;;  %v5483_v54 = vpop.f32.mrb[162].mxu0 }
 0x36c   : > { %v5379_v39 = vadd.f32 %v5378_v30, %v5377_v49  ;;  %v5484_v45 = vpop.f32.mrb[163].mxu0  ;;  %v3150_v37 = vadd.f32 %v5376_v12, %v7985_v34  ;;  %v4239_v30 = vld [vmem:[#allocation4 + $0x10] sm:$0xff] }
 0x36d   : > { %v7991_v42 = vadd.f32 %v5482_v60, %v3148_v29  ;;  %v5485_v61 = vadd.f32 %v5484_v45, %v5483_v54 }
 0x36f   : > { %v7996_v14 = vadd.f32 %v5485_v61, %v3149_v46 }
 0x370   : > { %v5380_v59 = vpop.f32.mrb[136].mxu1 }
 0x371   : > { %4151 = vmatmul.mubr.bf16.gmra.mrb[4].mxu0 %v7890_v19  ;;  %v5381_v62 = vpop.f32.mrb[137].mxu1  ;;  %v5486_v13 = vpop.f32.mrb[164].mxu0 }
 0x372   : > { %4158 = vmatprep.mubr.bf16.mxu0 %v7804_v32  ;;  %3814 = vmatmul.mubr.bf16.gmra.mrb[236].mxu1 %v7804_v32  ;;  %v5382_v2 = vadd.f32 %v5381_v62, %v5380_v59  ;;  %v5383_v21 = vpop.f32.mrb[138].mxu1  ;;  %v5487_v38 = vpop.f32.mrb[165].mxu0  ;;  %v3151_v32 = vadd.f32 %v5379_v39, %v7985_v34 }
 0x373   : > { %3821 = vmatprep.mubr.bf16.mxu1 %v7923_v43  ;;  %v5488_v55 = vadd.f32 %v5487_v38, %v5486_v13  ;;  %v5384_v57 = vpop.f32.mrb[139].mxu1  ;;  %v5489_v58 = vpop.f32.mrb[166].mxu0 }
 0x374   : > { %v5385_v23 = vadd.f32 %v5384_v57, %v5383_v21  ;;  %v5490_v19 = vpop.f32.mrb[167].mxu0 }
 0x375   : > { %v8002_v20 = vadd.f32 %v5488_v55, %v3150_v37  ;;  %v5491_v40 = vadd.f32 %v5490_v19, %v5489_v58  ;;  %v8035_v58 = vld [vmem:[#allocation2] sm:$0xff] }
 0x376   : > { %v3153_v49 = vadd.f32 %v5385_v23, %v7985_v34 }
 0x377   : > { %v8007_v15 = vadd.f32 %v5491_v40, %v3151_v32 }
 0x379   : > { %4159 = vmatmul.mubr.bf16.gmra.mrb[8].mxu0 %v7902_v9 }
 0x37a   : > { %4166 = vmatprep.mubr.bf16.mxu0 %v7813_v33  ;;  %3822 = vmatmul.mubr.bf16.gmra.mrb[240].mxu1 %v7813_v33 }
 0x37b   : > { %3829 = vmatprep.mubr.bf16.mxu1 %v7931_v53  ;;  %v5386_v16 = vpop.f32.mrb[140].mxu1 }
 0x37c   : > { %v5387_v36 = vpop.f32.mrb[141].mxu1 }
 0x37d   : > { %v5388_v18 = vadd.f32 %v5387_v36, %v5386_v16  ;;  %v5389_v47 = vpop.f32.mrb[142].mxu1 }
 0x37e   : > { %v5390_v9 = vpop.f32.mrb[143].mxu1 }
 0x37f   : > { %v5391_v48 = vadd.f32 %v5390_v9, %v5389_v47  ;;  %v3154_v46 = vadd.f32 %v5388_v18, %v7985_v34 }
 0x381   : > { %4167 = vmatmul.mubr.bf16.gmra.mrb[12].mxu0 %v7910_v22  ;;  %v3155_v38 = vadd.f32 %v5391_v48, %v7985_v34 }
 0x382   : > { %4174 = vmatprep.mubr.bf16.mxu0 %v7821_v0  ;;  %3830 = vmatmul.mubr.bf16.gmra.mrb[244].mxu1 %v7821_v0  ;;  %v3152_v0 = vadd.f32 %v5382_v2, %v7985_v34 }
 0x383   : > { %3837 = vmatprep.mubr.bf16.mxu1 %v7940_v31 }
 0x386   : > { %v5492_v33 = vpop.f32.mrb[168].mxu0 }
 0x387   : > { %v5392_v22 = vpop.f32.mrb[144].mxu1  ;;  %v5493_v26 = vpop.f32.mrb[169].mxu0 }
 0x388   : > { %v5393_v8 = vpop.f32.mrb[145].mxu1  ;;  %v5494_v44 = vadd.f32 %v5493_v26, %v5492_v33  ;;  %v5495_v51 = vpop.f32.mrb[170].mxu0 }
 0x389   : > { %4175 = vmatmul.mubr.bf16.gmra.mrb[16].mxu0 %v7918_v27  ;;  %v5394_v63 = vadd.f32 %v5393_v8, %v5392_v22  ;;  %v5395_v41 = vpop.f32.mrb[146].mxu1  ;;  %v5496_v12 = vpop.f32.mrb[171].mxu0 }
 0x38a   : > { %4182 = vmatprep.mubr.bf16.mxu0 %v7829_v7  ;;  %3838 = vmatmul.mubr.bf16.gmra.mrb[248].mxu1 %v7829_v7  ;;  %v5396_v27 = vpop.f32.mrb[147].mxu1  ;;  %v8021_v25 = vadd.f32 %v5494_v44, %v3152_v0  ;;  %v5497_v7 = vadd.f32 %v5496_v12, %v5495_v51 }
 0x38b   : > { %3845 = vmatprep.mubr.bf16.mxu1 %v8016_v5  ;;  %v5397_v29 = vadd.f32 %v5396_v27, %v5395_v41  ;;  %v3156_v40 = vadd.f32 %v5394_v63, %v7985_v34 }
 0x38c   : > { %v8023_v60 = vadd.f32 %v5497_v7, %v3153_v49 }
 0x38d   : > { %v3157_v48 = vadd.f32 %v5397_v29, %v7985_v34 }
 0x391   : > { %4183 = vmatmul.mubr.bf16.gmra.mrb[20].mxu0 %v7926_v4 }
 0x392   : > { %4190 = vmatprep.mubr.bf16.mxu0 %v7837_v6  ;;  %3846 = vmatmul.mubr.bf16.gmra.mrb[252].mxu1 %v7837_v6 }
 0x393   : > { %5888 = vmatprep.mubr.bf16.mxu1 %v4239_v30  ;;  %v5498_v54 = vpop.f32.mrb[172].mxu0 }
 0x394   : > { %v5499_v39 = vpop.f32.mrb[173].mxu0 }
 0x395   : > { %v5398_v45 = vpop.f32.mrb[148].mxu1  ;;  %v5500_v61 = vadd.f32 %v5499_v39, %v5498_v54  ;;  %v5501_v59 = vpop.f32.mrb[174].mxu0 }
 0x396   : > { %v5399_v62 = vpop.f32.mrb[149].mxu1  ;;  %v5502_v13 = vpop.f32.mrb[175].mxu0 }
 0x397   : > { %v5400_v2 = vadd.f32 %v5399_v62, %v5398_v45  ;;  %v5401_v21 = vpop.f32.mrb[150].mxu1  ;;  %v8030_v4 = vadd.f32 %v5500_v61, %v3154_v46  ;;  %v5503_v37 = vadd.f32 %v5502_v13, %v5501_v59 }
 0x398   : > { %v5402_v55 = vpop.f32.mrb[151].mxu1 }
 0x399   : > { %4191 = vmatmul.mubr.bf16.gmra.mrb[24].mxu0 %v7934_v50  ;;  %v5403_v6 = vadd.f32 %v5402_v55, %v5401_v21  ;;  %v8033_v57 = vadd.f32 %v5503_v37, %v3155_v38  ;;  %v3158_v51 = vadd.f32 %v5400_v2, %v7985_v34 }
 0x39a   : > { %4198 = vmatprep.mubr.bf16.mxu0 %v8035_v58  ;;  %5889 = vmatmul.mubr.bf16.vlgmr.msra.gmra.mrb[0].mxu1 %v7775_v10 }
 0x39b   : > { %5892 = vmatprep.mubr.bf16.mxu1 %v7839_v35  ;;  %v3159_v29 = vadd.f32 %v5403_v6, %v7985_v34 }
 0x39c   : > { %v5504_v23 = vpop.f32.mrb[176].mxu0 }
 0x39d   : > { %v5505_v19 = vpop.f32.mrb[177].mxu0  ;;  %v5404_v32 = vpop.f32.mrb[152].mxu1 }
 0x39e   : > { %v5506_v16 = vadd.f32 %v5505_v19, %v5504_v23  ;;  %v5507_v36 = vpop.f32.mrb[178].mxu0  ;;  %v5405_v18 = vpop.f32.mrb[153].mxu1 }
 0x39f   : > { %v5508_v50 = vpop.f32.mrb[179].mxu0  ;;  %v5406_v47 = vadd.f32 %v5405_v18, %v5404_v32  ;;  %v5407_v9 = vpop.f32.mrb[154].mxu1 }
 0x3a0   : > { %v8042_v33 = vadd.f32 %v5506_v16, %v3156_v40  ;;  %v5509_v22 = vadd.f32 %v5508_v50, %v5507_v36  ;;  %v5408_v26 = vpop.f32.mrb[155].mxu1 }
 0x3a1   : > { %4199 = vmatmul.mubr.bf16.gmra.mrb[28].mxu0 %v8035_v58  ;;  %v5409_v10 = vadd.f32 %v5408_v26, %v5407_v9  ;;  %v3160_v59 = vadd.f32 %v5406_v47, %v7985_v34 }
 0x3a2   : > { %v8045_v35 = vadd.f32 %v5509_v22, %v3157_v48  ;;  %5893 = vmatmul.mubr.bf16.gmra.mrb[4].mxu1 %v7855_v11 }
 0x3a3   : > { %5896 = vmatprep.mubr.bf16.mxu1 %v7863_v1  ;;  %v3161_v55 = vadd.f32 %v5409_v10, %v7985_v34 }
 0x3a4   : > { %v5510_v8 = vpop.f32.mrb[180].mxu0 }
 0x3a5   : > { %v5511_v0 = vpop.f32.mrb[181].mxu0  ;;  %v5410_v44 = vpop.f32.mrb[156].mxu1 }
 0x3a6   : > { %v5512_v63 = vadd.f32 %v5511_v0, %v5510_v8  ;;  %v5513_v41 = vpop.f32.mrb[182].mxu0  ;;  %v5411_v12 = vpop.f32.mrb[157].mxu1 }
 0x3a7   : > { %v5514_v27 = vpop.f32.mrb[183].mxu0  ;;  %v5412_v49 = vadd.f32 %v5411_v12, %v5410_v44  ;;  %v5413_v7 = vpop.f32.mrb[158].mxu1 }
 0x3a8   : > { %v8051_v30 = vadd.f32 %v5512_v63, %v3158_v51  ;;  %v5515_v54 = vadd.f32 %v5514_v27, %v5513_v41  ;;  %v5414_v39 = vpop.f32.mrb[159].mxu1 }
 0x3a9   : > { %v5415_v11 = vadd.f32 %v5414_v39, %v5413_v7  ;;  %v3162_v36 = vadd.f32 %v5412_v49, %v7985_v34 }
 0x3aa   : > { %v8053_v45 = vadd.f32 %v5515_v54, %v3159_v29  ;;  %5897 = vmatmul.mubr.bf16.gmra.mrb[8].mxu1 %v7871_v17 }
 0x3ab   : > { %5900 = vmatprep.mubr.bf16.mxu1 %v7879_v3  ;;  %v3163_v26 = vadd.f32 %v5415_v11, %v7985_v34 }
 0x3ac   : > { %v5516_v1 = vpop.f32.mrb[184].mxu0 }
 0x3ad   : > { %v5517_v46 = vpop.f32.mrb[185].mxu0  ;;  %v5416_v61 = vpop.f32.mrb[160].mxu1 }
 0x3ae   : > { %v5518_v62 = vadd.f32 %v5517_v46, %v5516_v1  ;;  %v5519_v13 = vpop.f32.mrb[186].mxu0  ;;  %v5417_v2 = vpop.f32.mrb[161].mxu1 }
 0x3af   : > { %v5520_v21 = vpop.f32.mrb[187].mxu0  ;;  %v5418_v38 = vadd.f32 %v5417_v2, %v5416_v61  ;;  %v5419_v37 = vpop.f32.mrb[162].mxu1 }
 0x3b0   : > { %v8059_v6 = vadd.f32 %v5518_v62, %v3160_v59  ;;  %v5521_v23 = vadd.f32 %v5520_v21, %v5519_v13  ;;  %v5420_v19 = vpop.f32.mrb[163].mxu1 }
 0x3b1   : > { %v5421_v17 = vadd.f32 %v5420_v19, %v5419_v37  ;;  %v3164_v41 = vadd.f32 %v5418_v38, %v7985_v34 }
 0x3b2   : > { %v8061_v32 = vadd.f32 %v5521_v23, %v3161_v55  ;;  %5901 = vmatmul.mubr.bf16.gmra.mrb[12].mxu1 %v7887_v52 }
 0x3b3   : > { %5904 = vmatprep.mubr.bf16.mxu1 %v7899_v28  ;;  %v3165_v39 = vadd.f32 %v5421_v17, %v7985_v34 }
 0x3b4   : > { %v5522_v3 = vpop.f32.mrb[188].mxu0 }
 0x3b5   : > { %v5523_v40 = vpop.f32.mrb[189].mxu0  ;;  %v5422_v16 = vpop.f32.mrb[164].mxu1 }
 0x3b6   : > { %v5524_v18 = vadd.f32 %v5523_v40, %v5522_v3  ;;  %v5525_v50 = vpop.f32.mrb[190].mxu0  ;;  %v5423_v47 = vpop.f32.mrb[165].mxu1 }
 0x3b7   : > { %v5526_v9 = vpop.f32.mrb[191].mxu0  ;;  %v5424_v48 = vadd.f32 %v5423_v47, %v5422_v16  ;;  %v5425_v22 = vpop.f32.mrb[166].mxu1 }
 0x3b8   : > { %v8067_v10 = vadd.f32 %v5524_v18, %v3162_v36  ;;  %v5527_v8 = vadd.f32 %v5526_v9, %v5525_v50  ;;  %v5426_v0 = vpop.f32.mrb[167].mxu1 }
 0x3b9   : > { %v5427_v52 = vadd.f32 %v5426_v0, %v5425_v22  ;;  %v3166_v13 = vadd.f32 %v5424_v48, %v7985_v34 }
 0x3ba   : > { %v8069_v44 = vadd.f32 %v5527_v8, %v3163_v26  ;;  %5905 = vmatmul.mubr.bf16.gmra.mrb[16].mxu1 %v7907_v24 }
 0x3bb   : > { %5908 = vmatprep.mubr.bf16.mxu1 %v7915_v56  ;;  %v3167_v19 = vadd.f32 %v5427_v52, %v7985_v34 }
 0x3bc   : > { %v5528_v28 = vpop.f32.mrb[192].mxu0 }
 0x3bd   : > { %v5529_v51 = vpop.f32.mrb[193].mxu0  ;;  %v5428_v63 = vpop.f32.mrb[168].mxu1 }
 0x3be   : > { %v5530_v12 = vadd.f32 %v5529_v51, %v5528_v28  ;;  %v5531_v27 = vpop.f32.mrb[194].mxu0  ;;  %v5429_v49 = vpop.f32.mrb[169].mxu1 }
 0x3bf   : > { %v5532_v7 = vpop.f32.mrb[195].mxu0  ;;  %v5430_v29 = vadd.f32 %v5429_v49, %v5428_v63  ;;  %v5431_v54 = vpop.f32.mrb[170].mxu1 }
 0x3c0   : > { %v8075_v11 = vadd.f32 %v5530_v12, %v3164_v41  ;;  %v5533_v1 = vadd.f32 %v5532_v7, %v5531_v27  ;;  %v5432_v46 = vpop.f32.mrb[171].mxu1 }
 0x3c1   : > { %v5433_v24 = vadd.f32 %v5432_v46, %v5431_v54  ;;  %v3168_v50 = vadd.f32 %v5430_v29, %v7985_v34 }
 0x3c2   : > { %v8077_v61 = vadd.f32 %v5533_v1, %v3165_v39  ;;  %5909 = vmatmul.mubr.bf16.gmra.mrb[20].mxu1 %v7923_v43 }
 0x3c3   : > { %5912 = vmatprep.mubr.bf16.mxu1 %v7931_v53  ;;  %v3169_v0 = vadd.f32 %v5433_v24, %v7985_v34 }
 0x3c4   : > { %v5534_v56 = vpop.f32.mrb[196].mxu0 }
 0x3c5   : > { %v5535_v59 = vpop.f32.mrb[197].mxu0  ;;  %v5434_v62 = vpop.f32.mrb[172].mxu1 }
 0x3c6   : > { %v5536_v2 = vadd.f32 %v5535_v59, %v5534_v56  ;;  %v5537_v21 = vpop.f32.mrb[198].mxu0  ;;  %v5435_v38 = vpop.f32.mrb[173].mxu1 }
 0x3c7   : > { %v5538_v37 = vpop.f32.mrb[199].mxu0  ;;  %v5436_v55 = vadd.f32 %v5435_v38, %v5434_v62  ;;  %v5437_v23 = vpop.f32.mrb[174].mxu1 }
 0x3c8   : > { %v8083_v17 = vadd.f32 %v5536_v2, %v3166_v13  ;;  %v5539_v3 = vadd.f32 %v5538_v37, %v5537_v21  ;;  %v5438_v40 = vpop.f32.mrb[175].mxu1 }
 0x3c9   : > { %v5439_v43 = vadd.f32 %v5438_v40, %v5437_v23  ;;  %v3170_v27 = vadd.f32 %v5436_v55, %v7985_v34 }
 0x3ca   : > { %v8085_v16 = vadd.f32 %v5539_v3, %v3167_v19  ;;  %5913 = vmatmul.mubr.bf16.gmra.mrb[24].mxu1 %v7940_v31 }
 0x3cb   : > { %5916 = vmatprep.mubr.bf16.mxu1 %v8016_v5  ;;  %v3171_v46 = vadd.f32 %v5439_v43, %v7985_v34 }
 0x3cc   : > { %v5540_v53 = vpop.f32.mrb[200].mxu0 }
 0x3cd   : > { %v5541_v36 = vpop.f32.mrb[201].mxu0  ;;  %v5440_v18 = vpop.f32.mrb[176].mxu1 }
 0x3ce   : > { %v5542_v47 = vadd.f32 %v5541_v36, %v5540_v53  ;;  %v5543_v9 = vpop.f32.mrb[202].mxu0  ;;  %v5441_v48 = vpop.f32.mrb[177].mxu1 }
 0x3cf   : > { %v5544_v22 = vpop.f32.mrb[203].mxu0  ;;  %v5442_v26 = vadd.f32 %v5441_v48, %v5440_v18  ;;  %v5443_v8 = vpop.f32.mrb[178].mxu1 }
 0x3d0   : > { %v8091_v52 = vadd.f32 %v5542_v47, %v3168_v50  ;;  %v5545_v28 = vadd.f32 %v5544_v22, %v5543_v9  ;;  %v5444_v51 = vpop.f32.mrb[179].mxu1 }
 0x3d1   : > { %v5445_v31 = vadd.f32 %v5444_v51, %v5443_v8  ;;  %v3172_v38 = vadd.f32 %v5442_v26, %v7985_v34 }
 0x3d2   : > { %v8093_v63 = vadd.f32 %v5545_v28, %v3169_v0  ;;  %5917 = vmatmul.mubr.bf16.gmra.mrb[28].mxu1 %v8035_v58 }
 0x3d3   : > { %v3173_v43 = vadd.f32 %v5445_v31, %v7985_v34 }
 0x3d4   : > { %v5546_v5 = vpop.f32.mrb[204].mxu0 }
 0x3d5   : > { %v5547_v41 = vpop.f32.mrb[205].mxu0  ;;  %v5446_v12 = vpop.f32.mrb[180].mxu1 }
 0x3d6   : > { %v5548_v49 = vadd.f32 %v5547_v41, %v5546_v5  ;;  %v5549_v7 = vpop.f32.mrb[206].mxu0  ;;  %v5447_v29 = vpop.f32.mrb[181].mxu1 }
 0x3d7   : > { %v5550_v54 = vpop.f32.mrb[207].mxu0  ;;  %v5448_v39 = vadd.f32 %v5447_v29, %v5446_v12  ;;  %v5449_v1 = vpop.f32.mrb[182].mxu1 }
 0x3d8   : > { %v8098_v24 = vadd.f32 %v5548_v49, %v3170_v27  ;;  %v5551_v56 = vadd.f32 %v5550_v54, %v5549_v7  ;;  %v5450_v59 = vpop.f32.mrb[183].mxu1 }
 0x3d9   : > { %v5451_v62 = vadd.f32 %v5450_v59, %v5449_v1  ;;  %v3174_v26 = vadd.f32 %v5448_v39, %v7985_v34 }
 0x3da   : > { %v8100_v13 = vadd.f32 %v5551_v56, %v3171_v46 }
 0x3db   : > { %v3175_v31 = vadd.f32 %v5451_v62, %v7985_v34 }
 0x3dc   : > { %v5552_v58 = vpop.f32.mrb[208].mxu0 }
 0x3dd   : > { %v5553_v2 = vpop.f32.mrb[209].mxu0  ;;  %v5452_v21 = vpop.f32.mrb[184].mxu1 }
 0x3de   : > { %v5554_v37 = vadd.f32 %v5553_v2, %v5552_v58  ;;  %v5555_v55 = vpop.f32.mrb[210].mxu0  ;;  %v5453_v23 = vpop.f32.mrb[185].mxu1 }
 0x3df   : > { %v5556_v19 = vpop.f32.mrb[211].mxu0  ;;  %v5454_v3 = vadd.f32 %v5453_v23, %v5452_v21  ;;  %v5455_v40 = vpop.f32.mrb[186].mxu1 }
 0x3e0   : > { %v8104_v53 = vadd.f32 %v5554_v37, %v3172_v38  ;;  %v5557_v36 = vadd.f32 %v5556_v19, %v5555_v55  ;;  %v5456_v18 = vpop.f32.mrb[187].mxu1 }
 0x3e1   : > { %v5457_v50 = vadd.f32 %v5456_v18, %v5455_v40  ;;  %v3176_v39 = vadd.f32 %v5454_v3, %v7985_v34 }
 0x3e2   : > { %v8106_v47 = vadd.f32 %v5557_v36, %v3173_v43 }
 0x3e3   : > { %v3177_v62 = vadd.f32 %v5457_v50, %v7985_v34 }
 0x3e4   : > { %v5558_v9 = vpop.f32.mrb[212].mxu0 }
 0x3e5   : > { %v5559_v48 = vpop.f32.mrb[213].mxu0  ;;  %v5458_v22 = vpop.f32.mrb[188].mxu1 }
 0x3e6   : > { %v5560_v8 = vadd.f32 %v5559_v48, %v5558_v9  ;;  %v5561_v0 = vpop.f32.mrb[214].mxu0  ;;  %v5459_v28 = vpop.f32.mrb[189].mxu1 }
 0x3e7   : > { %v5562_v51 = vpop.f32.mrb[215].mxu0  ;;  %v5460_v5 = vadd.f32 %v5459_v28, %v5458_v22  ;;  %v5461_v41 = vpop.f32.mrb[190].mxu1 }
 0x3e8   : > { %v8110_v12 = vadd.f32 %v5560_v8, %v3174_v26  ;;  %v5563_v27 = vadd.f32 %v5562_v51, %v5561_v0  ;;  %v5462_v49 = vpop.f32.mrb[191].mxu1 }
 0x3e9   : > { %v5463_v7 = vadd.f32 %v5462_v49, %v5461_v41  ;;  %v3178_v48 = vadd.f32 %v5460_v5, %v7985_v34 }
 0x3ea   : > { %v8112_v29 = vadd.f32 %v5563_v27, %v3175_v31 }
 0x3eb   : > { %v3179_v51 = vadd.f32 %v5463_v7, %v7985_v34 }
 0x3ec   : > { %v5564_v54 = vpop.f32.mrb[216].mxu0 }
 0x3ed   : > { %v5565_v1 = vpop.f32.mrb[217].mxu0  ;;  %v5592_v46 = vpop.f32.mrb[192].mxu1 }
 0x3ee   : > { %v5566_v56 = vadd.f32 %v5565_v1, %v5564_v54  ;;  %v5567_v59 = vpop.f32.mrb[218].mxu0  ;;  %v5593_v58 = vpop.f32.mrb[193].mxu1 }
 0x3ef   : > { %v5568_v2 = vpop.f32.mrb[219].mxu0  ;;  %v5594_v21 = vadd.f32 %v5593_v58, %v5592_v46  ;;  %v5595_v38 = vpop.f32.mrb[194].mxu1 }
 0x3f0   : > { %v8116_v37 = vadd.f32 %v5566_v56, %v3176_v39  ;;  %v5569_v55 = vadd.f32 %v5568_v2, %v5567_v59  ;;  %v5596_v23 = vpop.f32.mrb[195].mxu1 }
 0x3f1   : > { %v3854_v19 = vadd.f32 %v5594_v21, %v7991_v42  ;;  %v5597_v40 = vadd.f32 %v5596_v23, %v5595_v38 }
 0x3f2   : > { %v8119_v43 = vadd.f32 %v5569_v55, %v3177_v62 }
 0x3f3   : > { %v3855_v36 = vadd.f32 %v5597_v40, %v7996_v14 }
 0x3f4   : > { %v5570_v3 = vpop.f32.mrb[220].mxu0 }
 0x3f5   : > { %v5571_v18 = vpop.f32.mrb[221].mxu0  ;;  %v5598_v9 = vpop.f32.mrb[196].mxu1 }
 0x3f6   : > { %v5572_v22 = vadd.f32 %v5571_v18, %v5570_v3  ;;  %v5573_v26 = vpop.f32.mrb[222].mxu0  ;;  %v5599_v8 = vpop.f32.mrb[197].mxu1 }
 0x3f7   : > { %v5574_v50 = vpop.f32.mrb[223].mxu0  ;;  %v5600_v0 = vadd.f32 %v5599_v8, %v5598_v9  ;;  %v5601_v28 = vpop.f32.mrb[198].mxu1 }
 0x3f8   : > { %v8124_v41 = vadd.f32 %v5572_v22, %v3178_v48  ;;  %v5575_v42 = vadd.f32 %v5574_v50, %v5573_v26  ;;  %v5602_v31 = vpop.f32.mrb[199].mxu1 }
 0x3f9   : > { %v3856_v27 = vadd.f32 %v5600_v0, %v8002_v20  ;;  %v5603_v14 = vadd.f32 %v5602_v31, %v5601_v28 }
 0x3fa   : > { %v8127_v49 = vadd.f32 %v5575_v42, %v3179_v51 }
 0x3fb   : > { %v3857_v54 = vadd.f32 %v5603_v14, %v8007_v15 }
 0x3fc   : > { %v5704_v5 = vpop.f32.mrb[224].mxu0 }
 0x3fd   : > { %v5705_v1 = vpop.f32.mrb[225].mxu0  ;;  %v5604_v46 = vpop.f32.mrb[200].mxu1 }
 0x3fe   : > { %v5706_v39 = vadd.f32 %v5705_v1, %v5704_v5  ;;  %v5707_v56 = vpop.f32.mrb[226].mxu0  ;;  %v5605_v59 = vpop.f32.mrb[201].mxu1 }
 0x3ff   : > { %v5708_v58 = vpop.f32.mrb[227].mxu0  ;;  %v5606_v2 = vadd.f32 %v5605_v59, %v5604_v46  ;;  %v5607_v34 = vpop.f32.mrb[202].mxu1 }
 0x400   : > { %v5709_v7 = vadd.f32 %v5708_v58, %v5707_v56  ;;  %v5608_v21 = vpop.f32.mrb[203].mxu1  ;;  %v8130_v38 = vadd.f32 %v5706_v39, %v3854_v19 }
 0x401   : > { %v3858_v20 = vadd.f32 %v5606_v2, %v8021_v25  ;;  %v5609_v62 = vadd.f32 %v5608_v21, %v5607_v34 }
 0x402   : > { %v8133_v55 = vadd.f32 %v5709_v7, %v3855_v36 }
 0x403   : > { %v3859_v15 = vadd.f32 %v5609_v62, %v8023_v60 }
 0x404   : > { %v5710_v23 = vpop.f32.mrb[228].mxu0 }
 0x405   : > { %v5711_v40 = vpop.f32.mrb[229].mxu0  ;;  %v5610_v3 = vpop.f32.mrb[204].mxu1 }
 0x406   : > { %v5712_v18 = vadd.f32 %v5711_v40, %v5710_v23  ;;  %v5713_v9 = vpop.f32.mrb[230].mxu0  ;;  %v5611_v48 = vpop.f32.mrb[205].mxu1 }
 0x407   : > { %v5714_v22 = vpop.f32.mrb[231].mxu0  ;;  %v5612_v26 = vadd.f32 %v5611_v48, %v5610_v3  ;;  %v5613_v8 = vpop.f32.mrb[206].mxu1 }
 0x408   : > { %v5715_v50 = vadd.f32 %v5714_v22, %v5713_v9  ;;  %v5614_v0 = vpop.f32.mrb[207].mxu1  ;;  %v8136_v19 = vadd.f32 %v5712_v18, %v3856_v27 }
 0x409   : > { %v3860_v25 = vadd.f32 %v5612_v26, %v8030_v4  ;;  %v5615_v28 = vadd.f32 %v5614_v0, %v5613_v8 }
 0x40a   : > { %v8139_v36 = vadd.f32 %v5715_v50, %v3857_v54 }
 0x40b   : > { %v3861_v60 = vadd.f32 %v5615_v28, %v8033_v57 }
 0x40c   : > { %v5716_v51 = vpop.f32.mrb[232].mxu0 }
 0x40d   : > { %v5717_v42 = vpop.f32.mrb[233].mxu0  ;;  %v5616_v31 = vpop.f32.mrb[208].mxu1 }
 0x40e   : > { %v5718_v14 = vadd.f32 %v5717_v42, %v5716_v51  ;;  %v5719_v5 = vpop.f32.mrb[234].mxu0  ;;  %v5617_v1 = vpop.f32.mrb[209].mxu1 }
 0x40f   : > { %v5720_v46 = vpop.f32.mrb[235].mxu0  ;;  %v5618_v39 = vadd.f32 %v5617_v1, %v5616_v31  ;;  %v5619_v56 = vpop.f32.mrb[210].mxu1 }
 0x410   : > { %v5721_v59 = vadd.f32 %v5720_v46, %v5719_v5  ;;  %v5620_v58 = vpop.f32.mrb[211].mxu1  ;;  %v8142_v27 = vadd.f32 %v5718_v14, %v3858_v20 }
 0x411   : > { %v3862_v4 = vadd.f32 %v5618_v39, %v8042_v33  ;;  %v5621_v2 = vadd.f32 %v5620_v58, %v5619_v56 }
 0x412   : > { %v8145_v54 = vadd.f32 %v5721_v59, %v3859_v15 }
 0x413   : > { %v3863_v57 = vadd.f32 %v5621_v2, %v8045_v35 }
 0x414   : > { %v5722_v34 = vpop.f32.mrb[236].mxu0 }
 0x415   : > { %v5723_v7 = vpop.f32.mrb[237].mxu0  ;;  %v5622_v21 = vpop.f32.mrb[212].mxu1 }
 0x416   : > { %v5724_v62 = vadd.f32 %v5723_v7, %v5722_v34  ;;  %v5725_v23 = vpop.f32.mrb[238].mxu0  ;;  %v5623_v40 = vpop.f32.mrb[213].mxu1 }
 0x417   : > { %v5726_v3 = vpop.f32.mrb[239].mxu0  ;;  %v5624_v18 = vadd.f32 %v5623_v40, %v5622_v21  ;;  %v5625_v9 = vpop.f32.mrb[214].mxu1 }
 0x418   : > { %v5727_v48 = vadd.f32 %v5726_v3, %v5725_v23  ;;  %v5626_v22 = vpop.f32.mrb[215].mxu1  ;;  %v8148_v20 = vadd.f32 %v5724_v62, %v3860_v25 }
 0x419   : > { %v3864_v33 = vadd.f32 %v5624_v18, %v8051_v30  ;;  %v5627_v26 = vadd.f32 %v5626_v22, %v5625_v9 }
 0x41a   : > { %v8151_v15 = vadd.f32 %v5727_v48, %v3861_v60 }
 0x41b   : > { %v3865_v35 = vadd.f32 %v5627_v26, %v8053_v45 }
 0x41c   : > { %v5728_v8 = vpop.f32.mrb[240].mxu0 }
 0x41d   : > { %v5729_v50 = vpop.f32.mrb[241].mxu0  ;;  %v5628_v0 = vpop.f32.mrb[216].mxu1 }
 0x41e   : > { %v5730_v28 = vadd.f32 %v5729_v50, %v5728_v8  ;;  %v5731_v51 = vpop.f32.mrb[242].mxu0  ;;  %v5629_v42 = vpop.f32.mrb[217].mxu1 }
 0x41f   : > { %v5732_v31 = vpop.f32.mrb[243].mxu0  ;;  %v5630_v14 = vadd.f32 %v5629_v42, %v5628_v0  ;;  %v5631_v5 = vpop.f32.mrb[218].mxu1 }
 0x420   : > { %v5733_v1 = vadd.f32 %v5732_v31, %v5731_v51  ;;  %v5632_v46 = vpop.f32.mrb[219].mxu1  ;;  %v8154_v25 = vadd.f32 %v5730_v28, %v3862_v4 }
 0x421   : > { %v3866_v30 = vadd.f32 %v5630_v14, %v8059_v6  ;;  %v5633_v39 = vadd.f32 %v5632_v46, %v5631_v5 }
 0x422   : > { %v8157_v60 = vadd.f32 %v5733_v1, %v3863_v57 }
 0x423   : > { %v3867_v45 = vadd.f32 %v5633_v39, %v8061_v32 }
 0x424   : > { %v5734_v56 = vpop.f32.mrb[244].mxu0 }
 0x425   : > { %v5735_v59 = vpop.f32.mrb[245].mxu0  ;;  %v5634_v58 = vpop.f32.mrb[220].mxu1 }
 0x426   : > { %v5736_v2 = vadd.f32 %v5735_v59, %v5734_v56  ;;  %v5737_v34 = vpop.f32.mrb[246].mxu0  ;;  %v5635_v7 = vpop.f32.mrb[221].mxu1 }
 0x427   : > { %v5738_v21 = vpop.f32.mrb[247].mxu0  ;;  %v5636_v62 = vadd.f32 %v5635_v7, %v5634_v58  ;;  %v5637_v23 = vpop.f32.mrb[222].mxu1 }
 0x428   : > { %v5739_v40 = vadd.f32 %v5738_v21, %v5737_v34  ;;  %v5638_v3 = vpop.f32.mrb[223].mxu1  ;;  %v8160_v4 = vadd.f32 %v5736_v2, %v3864_v33 }
 0x429   : > { %v3868_v6 = vadd.f32 %v5636_v62, %v8067_v10  ;;  %v5639_v18 = vadd.f32 %v5638_v3, %v5637_v23 }
 0x42a   : > { %v8163_v57 = vadd.f32 %v5739_v40, %v3865_v35 }
 0x42b   : > { %v3869_v32 = vadd.f32 %v5639_v18, %v8069_v44 }
 0x42c   : > { %v5740_v9 = vpop.f32.mrb[248].mxu0 }
 0x42d   : > { %v5741_v48 = vpop.f32.mrb[249].mxu0  ;;  %v5640_v22 = vpop.f32.mrb[224].mxu1 }
 0x42e   : > { %v5742_v26 = vadd.f32 %v5741_v48, %v5740_v9  ;;  %v5743_v8 = vpop.f32.mrb[250].mxu0  ;;  %v5641_v50 = vpop.f32.mrb[225].mxu1 }
 0x42f   : > { %v5744_v0 = vpop.f32.mrb[251].mxu0  ;;  %v5642_v28 = vadd.f32 %v5641_v50, %v5640_v22  ;;  %v5643_v51 = vpop.f32.mrb[226].mxu1 }
 0x430   : > { %v5745_v42 = vadd.f32 %v5744_v0, %v5743_v8  ;;  %v5644_v31 = vpop.f32.mrb[227].mxu1  ;;  %v8166_v33 = vadd.f32 %v5742_v26, %v3866_v30 }
 0x431   : > { %v3870_v10 = vadd.f32 %v5642_v28, %v8075_v11  ;;  %v5645_v14 = vadd.f32 %v5644_v31, %v5643_v51 }
 0x432   : > { %v8169_v35 = vadd.f32 %v5745_v42, %v3867_v45 }
 0x433   : > { %v3871_v44 = vadd.f32 %v5645_v14, %v8077_v61 }
 0x434   : > { %v5746_v5 = vpop.f32.mrb[252].mxu0 }
 0x435   : > { %v5747_v1 = vpop.f32.mrb[253].mxu0  ;;  %v5646_v46 = vpop.f32.mrb[228].mxu1 }
 0x436   : > { %v5748_v39 = vadd.f32 %v5747_v1, %v5746_v5  ;;  %v5749_v56 = vpop.f32.mrb[254].mxu0  ;;  %v5647_v59 = vpop.f32.mrb[229].mxu1 }
 0x437   : > { %v5750_v58 = vpop.f32.mrb[255].mxu0  ;;  %v5648_v2 = vadd.f32 %v5647_v59, %v5646_v46  ;;  %v5649_v34 = vpop.f32.mrb[230].mxu1 }
 0x438   : > { %v5751_v7 = vadd.f32 %v5750_v58, %v5749_v56  ;;  %v5650_v21 = vpop.f32.mrb[231].mxu1  ;;  %v8172_v30 = vadd.f32 %v5748_v39, %v3868_v6 }
 0x439   : > { %v3872_v11 = vadd.f32 %v5648_v2, %v8083_v17  ;;  %v5651_v62 = vadd.f32 %v5650_v21, %v5649_v34 }
 0x43a   : > { %v8175_v45 = vadd.f32 %v5751_v7, %v3869_v32 }
 0x43b   : > { %v3873_v61 = vadd.f32 %v5651_v62, %v8085_v16 }
 0x43c   : > { %v5752_v23 = vpop.f32.mrb[0].mxu0 }
 0x43d   : > { %v5753_v40 = vpop.f32.mrb[1].mxu0  ;;  %v5652_v3 = vpop.f32.mrb[232].mxu1 }
 0x43e   : > { %v5754_v18 = vadd.f32 %v5753_v40, %v5752_v23  ;;  %v5755_v9 = vpop.f32.mrb[2].mxu0  ;;  %v5653_v48 = vpop.f32.mrb[233].mxu1 }
 0x43f   : > { %v5756_v22 = vpop.f32.mrb[3].mxu0  ;;  %v5654_v26 = vadd.f32 %v5653_v48, %v5652_v3  ;;  %v5655_v8 = vpop.f32.mrb[234].mxu1 }
 0x440   : > { %v5757_v50 = vadd.f32 %v5756_v22, %v5755_v9  ;;  %v5656_v0 = vpop.f32.mrb[235].mxu1  ;;  %v8178_v6 = vadd.f32 %v5754_v18, %v3870_v10 }
 0x441   : > { %v3874_v17 = vadd.f32 %v5654_v26, %v8091_v52  ;;  %v5657_v28 = vadd.f32 %v5656_v0, %v5655_v8 }
 0x442   : > { %v8181_v32 = vadd.f32 %v5757_v50, %v3871_v44 }
 0x443   : > { %v3875_v16 = vadd.f32 %v5657_v28, %v8093_v63 }
 0x444   : > { %v5758_v51 = vpop.f32.mrb[4].mxu0 }
 0x445   : > { %v5759_v42 = vpop.f32.mrb[5].mxu0  ;;  %v5658_v31 = vpop.f32.mrb[236].mxu1 }
 0x446   : > { %v5760_v14 = vadd.f32 %v5759_v42, %v5758_v51  ;;  %v5761_v5 = vpop.f32.mrb[6].mxu0  ;;  %v5659_v1 = vpop.f32.mrb[237].mxu1 }
 0x447   : > { %v5762_v46 = vpop.f32.mrb[7].mxu0  ;;  %v5660_v39 = vadd.f32 %v5659_v1, %v5658_v31  ;;  %v5661_v56 = vpop.f32.mrb[238].mxu1 }
 0x448   : > { %v5763_v59 = vadd.f32 %v5762_v46, %v5761_v5  ;;  %v5662_v58 = vpop.f32.mrb[239].mxu1  ;;  %v8184_v10 = vadd.f32 %v5760_v14, %v3872_v11 }
 0x449   : > { %v3876_v52 = vadd.f32 %v5660_v39, %v8098_v24  ;;  %v5663_v2 = vadd.f32 %v5662_v58, %v5661_v56 }
 0x44a   : > { %v8187_v44 = vadd.f32 %v5763_v59, %v3873_v61 }
 0x44b   : > { %v3877_v63 = vadd.f32 %v5663_v2, %v8100_v13 }
 0x44c   : > { %v5764_v34 = vpop.f32.mrb[8].mxu0 }
 0x44d   : > { %v5765_v7 = vpop.f32.mrb[9].mxu0  ;;  %v5664_v21 = vpop.f32.mrb[240].mxu1 }
 0x44e   : > { %v5766_v62 = vadd.f32 %v5765_v7, %v5764_v34  ;;  %v5767_v23 = vpop.f32.mrb[10].mxu0  ;;  %v5665_v40 = vpop.f32.mrb[241].mxu1 }
 0x44f   : > { %v5768_v3 = vpop.f32.mrb[11].mxu0  ;;  %v5666_v18 = vadd.f32 %v5665_v40, %v5664_v21  ;;  %v5667_v9 = vpop.f32.mrb[242].mxu1 }
 0x450   : > { %v5769_v48 = vadd.f32 %v5768_v3, %v5767_v23  ;;  %v5668_v22 = vpop.f32.mrb[243].mxu1  ;;  %v8190_v11 = vadd.f32 %v5766_v62, %v3874_v17 }
 0x451   : > { %v3878_v24 = vadd.f32 %v5666_v18, %v8104_v53  ;;  %v5669_v26 = vadd.f32 %v5668_v22, %v5667_v9 }
 0x452   : > { %v8193_v61 = vadd.f32 %v5769_v48, %v3875_v16 }
 0x453   : > { %v3879_v13 = vadd.f32 %v5669_v26, %v8106_v47 }
 0x454   : > { %v5770_v8 = vpop.f32.mrb[12].mxu0 }
 0x455   : > { %v5771_v50 = vpop.f32.mrb[13].mxu0  ;;  %v5670_v0 = vpop.f32.mrb[244].mxu1 }
 0x456   : > { %v5772_v28 = vadd.f32 %v5771_v50, %v5770_v8  ;;  %v5773_v51 = vpop.f32.mrb[14].mxu0  ;;  %v5671_v42 = vpop.f32.mrb[245].mxu1 }
 0x457   : > { %v5774_v31 = vpop.f32.mrb[15].mxu0  ;;  %v5672_v14 = vadd.f32 %v5671_v42, %v5670_v0  ;;  %v5673_v5 = vpop.f32.mrb[246].mxu1 }
 0x458   : > { %v5775_v1 = vadd.f32 %v5774_v31, %v5773_v51  ;;  %v5674_v46 = vpop.f32.mrb[247].mxu1  ;;  %v8196_v17 = vadd.f32 %v5772_v28, %v3876_v52 }
 0x459   : > { %v3880_v53 = vadd.f32 %v5672_v14, %v8110_v12  ;;  %v5675_v39 = vadd.f32 %v5674_v46, %v5673_v5 }
 0x45a   : > { %v8199_v16 = vadd.f32 %v5775_v1, %v3877_v63 }
 0x45b   : > { %v3881_v47 = vadd.f32 %v5675_v39, %v8112_v29  ;;  %v4514_v39 = vld [vmem:[%s6526_s11 + $0x10] sm:$0xff] }
 0x45c   : > { %v5776_v56 = vpop.f32.mrb[16].mxu0 }
 0x45d   : > { %v5777_v59 = vpop.f32.mrb[17].mxu0  ;;  %v5676_v58 = vpop.f32.mrb[248].mxu1 }
 0x45e   : > { %v5778_v2 = vadd.f32 %v5777_v59, %v5776_v56  ;;  %v5779_v34 = vpop.f32.mrb[18].mxu0  ;;  %v5677_v7 = vpop.f32.mrb[249].mxu1 }
 0x45f   : > { %v5780_v21 = vpop.f32.mrb[19].mxu0  ;;  %v5678_v62 = vadd.f32 %v5677_v7, %v5676_v58  ;;  %v5679_v23 = vpop.f32.mrb[250].mxu1 }
 0x460   : > { %v5781_v40 = vadd.f32 %v5780_v21, %v5779_v34  ;;  %v5680_v3 = vpop.f32.mrb[251].mxu1  ;;  %v8202_v52 = vadd.f32 %v5778_v2, %v3878_v24  ;;  %v4512_v2 = vld [vmem:[%s6526_s11] sm:$0xff] }
 0x461   : > { %v3882_v12 = vadd.f32 %v5678_v62, %v8116_v37  ;;  %v5681_v18 = vadd.f32 %v5680_v3, %v5679_v23 }
 0x462   : > { %v8205_v63 = vadd.f32 %v5781_v40, %v3879_v13  ;;  %v4513_v40 = vld [vmem:[%s6526_s11 + $0x8] sm:$0xff] }
 0x463   : > { %v3883_v29 = vadd.f32 %v5681_v18, %v8119_v43 }
 0x464   : > { %v5782_v9 = vpop.f32.mrb[20].mxu0 }
 0x465   : > { %v5783_v48 = vpop.f32.mrb[21].mxu0  ;;  %v5682_v22 = vpop.f32.mrb[252].mxu1 }
 0x466   : > { %v5784_v26 = vadd.f32 %v5783_v48, %v5782_v9  ;;  %v5785_v8 = vpop.f32.mrb[22].mxu0  ;;  %v5683_v50 = vpop.f32.mrb[253].mxu1 }
 0x467   : > { %v5786_v0 = vpop.f32.mrb[23].mxu0  ;;  %v5684_v28 = vadd.f32 %v5683_v50, %v5682_v22  ;;  %v5685_v51 = vpop.f32.mrb[254].mxu1  ;;  %v4518_v22 = vld [vmem:[%s6526_s11 + $0x30] sm:$0xff] }
 0x468   : > { %v5787_v24 = vadd.f32 %v5786_v0, %v5785_v8  ;;  %v5686_v42 = vpop.f32.mrb[255].mxu1  ;;  %v8208_v31 = vadd.f32 %v5784_v26, %v3880_v53 }
 0x469   : > { %v3884_v37 = vadd.f32 %v5684_v28, %v8124_v41  ;;  %v5687_v13 = vadd.f32 %v5686_v42, %v5685_v51  ;;  %v4516_v28 = vld [vmem:[%s6526_s11 + $0x20] sm:$0xff]  ;;  %v4519_v42 = vld [vmem:[%s6526_s11 + $0x38] sm:$0xff] }
 0x46a   : > { %v8211_v43 = vadd.f32 %v5787_v24, %v3881_v47  ;;  %v4515_v47 = vld [vmem:[%s6526_s11 + $0x18] sm:$0xff] }
 0x46b   : > { %v3885_v14 = vadd.f32 %v5687_v13, %v8127_v49 }
 0x46c   : > { %v5788_v5 = vpop.f32.mrb[24].mxu0 }
 0x46d   : > { %v5789_v1 = vpop.f32.mrb[25].mxu0  ;;  %v5890_v46 = vpop.f32.mrb[0].mxu1 }
 0x46e   : > { %v5790_v56 = vadd.f32 %v5789_v1, %v5788_v5  ;;  %v5791_v59 = vpop.f32.mrb[26].mxu0  ;;  %v4482_v58 = vadd.f32 %v5890_v46, %v8136_v19  ;;  %v4353_v53 = vpop.f32.mrb[1].mxu1 }
 0x46f   : > { %v5792_v34 = vpop.f32.mrb[27].mxu0  ;;  %v4480_v41 = vadd.f32 %v4353_v53, %v8130_v38  ;;  %v5891_v7 = vpop.f32.mrb[2].mxu1 }
 0x470   : > { %v5793_v21 = vadd.f32 %v5792_v34, %v5791_v59  ;;  %v4546_v62 = vadd.f32 %v4514_v39, %v4482_v58  ;;  %v4483_v49 = vadd.f32 %v5891_v7, %v8139_v36  ;;  %v4356_v23 = vpop.f32.mrb[3].mxu1  ;;  %v8221_v3 = vadd.f32 %v5790_v56, %v3882_v12  ;;  %v4517_v39 = vld [vmem:[%s6526_s11 + $0x28] sm:$0xff]  ;;  %v4523_v7 = vld [vmem:[%s6526_s11 + $0x58] sm:$0xff] }
 0x471   : > { %v4544_v18 = vadd.f32 %v4512_v2, %v4480_v41  ;;  %v4481_v9 = vadd.f32 %v4356_v23, %v8133_v55  ;;  %v4522_v2 = vld [vmem:[%s6526_s11 + $0x50] sm:$0xff]  ;;  %v4520_v41 = vld [vmem:[%s6526_s11 + $0x40] sm:$0xff] }
 0x472   : > { %4578 = vst [vmem:[%s8226_s8 + $0x10] sm:$0xff] %v4546_v62  ;;  %v4547_v38 = vadd.f32 %v4515_v47, %v4483_v49  ;;  %v8229_v19 = vadd.f32 %v5793_v21, %v3883_v29  ;;  %v4521_v49 = vld [vmem:[%s6526_s11 + $0x48] sm:$0xff] }
 0x473   : > { %4576 = vst [vmem:[%s8226_s8] sm:$0xff] %v4544_v18  ;;  %v4545_v36 = vadd.f32 %v4513_v40, %v4481_v9  ;;  %v4526_v9 = vld [vmem:[%s6526_s11 + $0x70] sm:$0xff] }
 0x474   : > { %v5794_v12 = vpop.f32.mrb[28].mxu0  ;;  %4579 = vst [vmem:[%s8226_s8 + $0x18] sm:$0xff] %v4547_v38 }
 0x475   : > { %v5795_v48 = vpop.f32.mrb[29].mxu0  ;;  %4577 = vst [vmem:[%s8226_s8 + $0x8] sm:$0xff] %v4545_v36  ;;  %v5894_v55 = vpop.f32.mrb[4].mxu1  ;;  %v4524_v36 = vld [vmem:[%s6526_s11 + $0x60] sm:$0xff] }
 0x476   : > { %v5796_v26 = vadd.f32 %v5795_v48, %v5794_v12  ;;  %v5797_v8 = vpop.f32.mrb[30].mxu0  ;;  %v4486_v50 = vadd.f32 %v5894_v55, %v8148_v20  ;;  %v4369_v0 = vpop.f32.mrb[5].mxu1  ;;  %v4527_v48 = vld [vmem:[%s6526_s11 + $0x78] sm:$0xff] }
 0x477   : > { %v5798_v29 = vpop.f32.mrb[31].mxu0  ;;  %v4484_v51 = vadd.f32 %v4369_v0, %v8142_v27  ;;  %v5895_v24 = vpop.f32.mrb[6].mxu1 }
 0x478   : > { %v5799_v13 = vadd.f32 %v5798_v29, %v5797_v8  ;;  %v4550_v5 = vadd.f32 %v4518_v22, %v4486_v50  ;;  %v4487_v1 = vadd.f32 %v5895_v24, %v8151_v15  ;;  %v4372_v46 = vpop.f32.mrb[7].mxu1  ;;  %v8241_v56 = vadd.f32 %v5796_v26, %v3884_v37  ;;  %v4525_v8 = vld [vmem:[%s6526_s11 + $0x68] sm:$0xff]  ;;  %v4530_v29 = vld [vmem:[%s6526_s11 + $0x90] sm:$0xff]  ;;  %v4528_v24 = vld [vmem:[%s6526_s11 + $0x80] sm:$0xff] }
 0x479   : > { %v4548_v20 = vadd.f32 %v4516_v28, %v4484_v51  ;;  %v4485_v59 = vadd.f32 %v4372_v46, %v8145_v54 }
 0x47a   : > { %4582 = vst [vmem:[%s8226_s8 + $0x30] sm:$0xff] %v4550_v5  ;;  %v4551_v27 = vadd.f32 %v4519_v42, %v4487_v1  ;;  %v8245_v58 = vadd.f32 %v5799_v13, %v3885_v14  ;;  %v4531_v13 = vld [vmem:[%s6526_s11 + $0x98] sm:$0xff] }
 0x47b   : > { %4580 = vst [vmem:[%s8226_s8 + $0x20] sm:$0xff] %v4548_v20  ;;  %v4549_v53 = vadd.f32 %v4517_v39, %v4485_v59  ;;  %v4529_v39 = vld [vmem:[%s6526_s11 + $0x88] sm:$0xff] }
 0x47c   : > { %4583 = vst [vmem:[%s8226_s8 + $0x38] sm:$0xff] %v4551_v27 }
 0x47d   : > { %4581 = vst [vmem:[%s8226_s8 + $0x28] sm:$0xff] %v4549_v53  ;;  %v5898_v15 = vpop.f32.mrb[8].mxu1  ;;  %v4534_v53 = vld [vmem:[%s6526_s11 + $0xb0] sm:$0xff] }
 0x47e   : > { %v4490_v37 = vadd.f32 %v5898_v15, %v8160_v4  ;;  %v4385_v34 = vpop.f32.mrb[9].mxu1 }
 0x47f   : > { %v4488_v54 = vadd.f32 %v4385_v34, %v8154_v25  ;;  %v5899_v14 = vpop.f32.mrb[10].mxu1  ;;  %v4535_v34 = vld [vmem:[%s6526_s11 + $0xb8] sm:$0xff] }
 0x480   : > { %v4554_v47 = vadd.f32 %v4522_v2, %v4490_v37  ;;  %v4491_v21 = vadd.f32 %v5899_v14, %v8163_v57  ;;  %v4388_v62 = vpop.f32.mrb[11].mxu1  ;;  %v4532_v2 = vld [vmem:[%s6526_s11 + $0xa0] sm:$0xff] }
 0x481   : > { %v4552_v23 = vadd.f32 %v4520_v41, %v4488_v54  ;;  %v4489_v40 = vadd.f32 %v4388_v62, %v8157_v60 }
 0x482   : > { %4586 = vst [vmem:[%s8226_s8 + $0x50] sm:$0xff] %v4554_v47  ;;  %v4555_v4 = vadd.f32 %v4523_v7, %v4491_v21  ;;  %v4533_v7 = vld [vmem:[%s6526_s11 + $0xa8] sm:$0xff] }
 0x483   : > { %4584 = vst [vmem:[%s8226_s8 + $0x40] sm:$0xff] %v4552_v23  ;;  %v4553_v18 = vadd.f32 %v4521_v49, %v4489_v40  ;;  %v4538_v49 = vld [vmem:[%s6526_s11 + $0xd0] sm:$0xff]  ;;  %v4536_v40 = vld [vmem:[%s6526_s11 + $0xc0] sm:$0xff] }
 0x484   : > { %4587 = vst [vmem:[%s8226_s8 + $0x58] sm:$0xff] %v4555_v4 }
 0x485   : > { %4585 = vst [vmem:[%s8226_s8 + $0x48] sm:$0xff] %v4553_v18  ;;  %v5902_v25 = vpop.f32.mrb[12].mxu1  ;;  %v4539_v18 = vld [vmem:[%s6526_s11 + $0xd8] sm:$0xff] }
 0x486   : > { %v4494_v38 = vadd.f32 %v5902_v25, %v8172_v30  ;;  %v4401_v57 = vpop.f32.mrb[13].mxu1 }
 0x487   : > { %v4492_v12 = vadd.f32 %v4401_v57, %v8166_v33  ;;  %v5903_v60 = vpop.f32.mrb[14].mxu1  ;;  %v4537_v57 = vld [vmem:[%s6526_s11 + $0xc8] sm:$0xff] }
 0x488   : > { %v4558_v55 = vadd.f32 %v4526_v9, %v4494_v38  ;;  %v4495_v22 = vadd.f32 %v5903_v60, %v8175_v45  ;;  %v4404_v26 = vpop.f32.mrb[15].mxu1 }
 0x489   : > { %v4556_v50 = vadd.f32 %v4524_v36, %v4492_v12  ;;  %v4493_v0 = vadd.f32 %v4404_v26, %v8169_v35 }
 0x48a   : > { %4590 = vst [vmem:[%s8226_s8 + $0x70] sm:$0xff] %v4558_v55  ;;  %v4559_v30 = vadd.f32 %v4527_v48, %v4495_v22  ;;  %v4542_v48 = vld [vmem:[%s6526_s11 + $0xf0] sm:$0xff]  ;;  %v4540_v22 = vld [vmem:[%s6526_s11 + $0xe0] sm:$0xff] }
 0x48b   : > { %4588 = vst [vmem:[%s8226_s8 + $0x60] sm:$0xff] %v4556_v50  ;;  %v4557_v28 = vadd.f32 %v4525_v8, %v4493_v0 }
 0x48c   : > { %4591 = vst [vmem:[%s8226_s8 + $0x78] sm:$0xff] %v4559_v30 }
 0x48d   : > { %4589 = vst [vmem:[%s8226_s8 + $0x68] sm:$0xff] %v4557_v28  ;;  %v5906_v33 = vpop.f32.mrb[16].mxu1  ;;  %v4541_v28 = vld [vmem:[%s6526_s11 + $0xe8] sm:$0xff] }
 0x48e   : > { %v4498_v51 = vadd.f32 %v5906_v33, %v8184_v10  ;;  %v4417_v45 = vpop.f32.mrb[17].mxu1 }
 0x48f   : > { %v4496_v42 = vadd.f32 %v4417_v45, %v8178_v6  ;;  %v5907_v35 = vpop.f32.mrb[18].mxu1 }
 0x490   : > { %v4562_v5 = vadd.f32 %v4530_v29, %v4498_v51  ;;  %v4499_v1 = vadd.f32 %v5907_v35, %v8187_v44  ;;  %v4420_v46 = vpop.f32.mrb[19].mxu1 }
 0x491   : > { %v4560_v20 = vadd.f32 %v4528_v24, %v4496_v42  ;;  %v4497_v59 = vadd.f32 %v4420_v46, %v8181_v32 }
 0x492   : > { %4594 = vst [vmem:[%s8226_s8 + $0x90] sm:$0xff] %v4562_v5  ;;  %v4563_v10 = vadd.f32 %v4531_v13, %v4499_v1 }
 0x493   : > { %4592 = vst [vmem:[%s8226_s8 + $0x80] sm:$0xff] %v4560_v20  ;;  %v4561_v27 = vadd.f32 %v4529_v39, %v4497_v59 }
 0x494   : > { %4595 = vst [vmem:[%s8226_s8 + $0x98] sm:$0xff] %v4563_v10 }
 0x495   : > { %4593 = vst [vmem:[%s8226_s8 + $0x88] sm:$0xff] %v4561_v27  ;;  %v5910_v6 = vpop.f32.mrb[20].mxu1 }
 0x496   : > { %v4502_v15 = vadd.f32 %v5910_v6, %v8196_v17  ;;  %v4433_v44 = vpop.f32.mrb[21].mxu1 }
 0x497   : > { %v4500_v37 = vadd.f32 %v4433_v44, %v8190_v11  ;;  %v5911_v32 = vpop.f32.mrb[22].mxu1 }
 0x498   : > { %v4566_v41 = vadd.f32 %v4534_v53, %v4502_v15  ;;  %v4503_v54 = vadd.f32 %v5911_v32, %v8199_v16  ;;  %v4436_v14 = vpop.f32.mrb[23].mxu1 }
 0x499   : > { %v4564_v47 = vadd.f32 %v4532_v2, %v4500_v37  ;;  %v4501_v21 = vadd.f32 %v4436_v14, %v8193_v61 }
 0x49a   : > { %4598 = vst [vmem:[%s8226_s8 + $0xb0] sm:$0xff] %v4566_v41  ;;  %v4567_v17 = vadd.f32 %v4535_v34, %v4503_v54 }
 0x49b   : > { %4596 = vst [vmem:[%s8226_s8 + $0xa0] sm:$0xff] %v4564_v47  ;;  %v4565_v62 = vadd.f32 %v4533_v7, %v4501_v21 }
 0x49c   : > { %4599 = vst [vmem:[%s8226_s8 + $0xb8] sm:$0xff] %v4567_v17 }
 0x49d   : > { %4597 = vst [vmem:[%s8226_s8 + $0xa8] sm:$0xff] %v4565_v62  ;;  %v5914_v11 = vpop.f32.mrb[24].mxu1 }
 0x49e   : > { %v4506_v23 = vadd.f32 %v5914_v11, %v8208_v31  ;;  %v4449_v16 = vpop.f32.mrb[25].mxu1 }
 0x49f   : > { %v4504_v4 = vadd.f32 %v4449_v16, %v8202_v52  ;;  %v5915_v61 = vpop.f32.mrb[26].mxu1 }
 0x4a0   : > { %v4570_v25 = vadd.f32 %v4538_v49, %v4506_v23  ;;  %v4507_v9 = vadd.f32 %v5915_v61, %v8211_v43  ;;  %v4452_v38 = vpop.f32.mrb[27].mxu1 }
 0x4a1   : > { %v4568_v36 = vadd.f32 %v4536_v40, %v4504_v4  ;;  %v4505_v31 = vadd.f32 %v4452_v38, %v8205_v63  ;;  %v4543_v63 = vld [vmem:[%s6526_s11 + $0xf8] sm:$0xff]  ;;  %s6233_s11 = scalar_lea.vmem %s6232_s12, 8192 }
 0x4a2   : > { %4602 = vst [vmem:[%s8226_s8 + $0xd0] sm:$0xff] %v4570_v25  ;;  %v4571_v12 = vadd.f32 %v4539_v18, %v4507_v9  ;;  %p6235_p9 = scmp.lt.s32.totalorder %s6233_s11, %s6227_s18 }
 0x4a3   : > { %4600 = vst [vmem:[%s8226_s8 + $0xc0] sm:$0xff] %v4568_v36  ;;  %v4569_v60 = vadd.f32 %v4537_v57, %v4505_v31 }
 0x4a4   : > { %4603 = vst [vmem:[%s8226_s8 + $0xd8] sm:$0xff] %v4571_v12  ;;  %p6236_p12 = por %p6235_p9, %p6234_p7 }
 0x4a5   : > { %4601 = vst [vmem:[%s8226_s8 + $0xc8] sm:$0xff] %v4569_v60  ;;  %v5918_v52 = vpop.f32.mrb[28].mxu1 }
 0x4a6   : > { %v4510_v43 = vadd.f32 %v5918_v52, %v8241_v56  ;;  %v4465_v55 = vpop.f32.mrb[29].mxu1  ;;  %p6237_p2 = pnand %p6236_p12, %p6230_p3 }
 0x4a7   : > { %v4508_v26 = vadd.f32 %v4465_v55, %v8221_v3  ;;  %v5919_v8 = vpop.f32.mrb[30].mxu1 }
 0x4a8   : > { %v4574_v50 = vadd.f32 %v4542_v48, %v4510_v43  ;;  %v4511_v0 = vadd.f32 %v5919_v8, %v8245_v58  ;;  %v4468_v30 = vpop.f32.mrb[31].mxu1 }
 0x4a9   : > { %v4572_v33 = vadd.f32 %v4540_v22, %v4508_v26  ;;  %v4509_v56 = vadd.f32 %v4468_v30, %v8229_v19 }
 0x4aa   : > { %4606 = vst [vmem:[%s8226_s8 + $0xf0] sm:$0xff] %v4574_v50  ;;  %v4575_v29 = vadd.f32 %v4543_v63, %v4511_v0 }
 0x4ab   : > { %4604 = vst [vmem:[%s8226_s8 + $0xe0] sm:$0xff] %v4572_v33  ;;  %v4573_v3 = vadd.f32 %v4541_v28, %v4509_v56 }
 0x4ac   : > { %4607 = vst [vmem:[%s8226_s8 + $0xf8] sm:$0xff] %v4575_v29 }
 0x4ad   : > { %4605 = vst [vmem:[%s8226_s8 + $0xe8] sm:$0xff] %v4573_v3 }
 0x4ae   : > { %6240 = shalt.err (!%p6237_p2)
}
 0x4af   : > { %s6241_s28 = scalar_lea.hbm %s8324_s17, 4096  ;;  %s6245_s15 = scalar_lea.hbm %s8379_s6, 8192 }
 0x4b0   : > { %p6242_p13 = scmp.ne.s32.totalorder %s8324_s17, %s6241_s28  ;;  %p6246_p4 = scmp.lt.u32.totalorder %s8324_s17, %s8379_s6 }
 0x4b1   : > { %p6247_p5 = scmp.lt.u32.totalorder %s6245_s15, %s6241_s28  ;;  %p6249_p11 = scmp.lt.u32.totalorder %s6241_s28, %s8324_s17 }
 0x4b2   : > { %p6243_p6 = pnand %p6242_p13, %p8397_p0 }
 0x4b3   : > { %p6248_p8 = por %p6247_p5, %p6246_p4 }
 0x4b4   : > { %p6244_p10 = pneg %p6243_p6 }
 0x4b5   : > { %p6250_p1 = por %p6249_p11, %p6248_p8 }
 0x4b7   : > { %p6251_p3 = pnand %p6250_p1, %p6244_p10 }
 0x4b9   : > { %6254 = shalt.err (!%p6251_p3)
}
 0x4ba   : > { %s6308_s10 = smov 128   ;;  %s6309_s21 = smov 8  }
 0x4bb   : > { %5930 = dma.vmem_to_hbm [thread:$0]  (%p8397_p0), %s8326_s20, 4096, %s8324_s17, %s4609_s5, %s6308_s10, %s6308_s10, %s6309_s21  }
 0x4bc PF: > { %s4637_s14 = sand.u32 1, %s6285_s23   ;;  %p8398_p7 = scmp.ne.s32.totalorder %s8384_s29, 0 }
 0x4bd   : > { %p8399_p9 = scmp.ge.s32.totalorder %s6297_s26, 2  ;;  %s4638_s18 = scalar_lea.sflag [#allocation8], %s4637_s14 }
 0x4bf   : > { %p5944_p12 = pnand %p8399_p9, %p8398_p7 }
 0x4c1   : > { %6280 = dma.done.wait (!%p5944_p12), %s4638_s18, 4096  }
 0x4c2   : > { %6282 = vsyncadd (!%p5944_p12), %s4638_s18, 4294963200  ;;  %p21_p2 = scmp.ge.s32.totalorder %s6458_s19, 4   ;;  %s8400_s23 = smov %s6289_s24 }
 0x4c3   : > { %s8401_s24 = smov %s6293_s25  ;;  %s8402_s25 = smov %s6474_s7 }
 0x4c4   : > { %s8403_s26 = smov %s6458_s19  ;;  %23 = sbr.rel (!%p21_p2) target bundleno = 8 (0x8), region = 106 }
 0x4cb   :  { %4643 = vsyncpa [#allocation7], 1 }
 0x4cc   :  { %4645 = vsyncpa [#allocation7 + $0x1], 1 }
 0x4cd   :  { %4646 = vsyncpa [#allocation10], 1 }
 0x4ce   :  { %4647 = vsyncpa [#allocation8], 1 }
 0x4cf   :  { %4649 = vsyncpa [#allocation8 + $0x1], 1 }

</bundles_post_ra>
